<compile_context>
chip_gen: v6e
topology: v6e:2x2x1
jax: 0.10.0
libtpu: 0.0.40
codegen_flags: <defaults>
</compile_context>

<pallas_src>
import functools

import jax
import jax.numpy as jnp
from jax import lax
from jax.experimental import pallas as pl
from jax.experimental.pallas import tpu as pltpu

_OUT_PAD = 8  # sublane padding of the per-utterance output block


# ----------------------------- Pallas kernel --------------------------------


def dvector_kernel(
    seg_ref,      # [1, S*Np, M]   this utterance's segments, time-major rows of Np
    w_ih0_ref,    # [M, 4H]        layer-0 input weights (pre-transposed, i/f/o/g order)
    w_hh0_ref,    # [H, 4H]        layer-0 recurrent weights
    b0_ref,       # [1, 4H]        layer-0 bias (b_ih + b_hh)
    w_ih_r_ref,   # [L-1, H, 4H]   layers 1..L-1 input weights
    w_hh_r_ref,   # [L-1, H, 4H]   layers 1..L-1 recurrent weights
    b_r_ref,      # [L-1, 1, 4H]   layers 1..L-1 biases
    w_p_ref,      # [H, E]         projection weight (pre-transposed)
    b_p_ref,      # [1, E]         projection bias
    out_ref,      # [1, 8, E]      L2-normalized utterance embedding (broadcast over rows)
    seq_ref,      # VMEM scratch [S*Np, H]   hidden sequence of the previous layer
    gates_ref,    # VMEM scratch [S*Np, 4H]  hoisted input projections of the current layer
    *,
    S, Np, N, H, E, L,
):
    def run_recurrence(w_hh, write_seq):
        """Serial LSTM recurrence over S steps; gates_ref already holds
        x_t @ W_ih^T + b for every t.  Returns sum_t h_t when write_seq=False."""
        zeros = jnp.zeros((Np, H), jnp.float32)

        def cell(t, h, c):
            r = pl.multiple_of(t * Np, 8)
            g = gates_ref[pl.ds(r, Np), :] + jnp.dot(
                h, w_hh, preferred_element_type=jnp.float32)
            sig = jax.nn.sigmoid(g[:, : 3 * H])            # i | f | o in one EUP pass
            c_new = sig[:, H:2 * H] * c + sig[:, :H] * jnp.tanh(g[:, 3 * H:])
            h_new = sig[:, 2 * H:3 * H] * jnp.tanh(c_new)
            return h_new, c_new, r

        if write_seq:
            def step(t, carry):
                h, c = carry
                h, c, r = cell(t, h, c)
                seq_ref[pl.ds(r, Np), :] = h
                return (h, c)
            lax.fori_loop(0, S, step, (zeros, zeros), unroll=True)
            return None
        else:
            def step(t, carry):
                h, c, hsum = carry
                h, c, _ = cell(t, h, c)
                return (h, c, hsum + h)
            _, _, hsum = lax.fori_loop(0, S, step, (zeros, zeros, zeros),
                                       unroll=True)
            return hsum

    # ----- layer 0: hoisted input projection (one MXU matmul for all S steps) -----
    gates_ref[...] = (
        jnp.dot(seg_ref[0], w_ih0_ref[...], preferred_element_type=jnp.float32)
        + b0_ref[...]
    )
    if L == 1:
        hsum = run_recurrence(w_hh0_ref[...], write_seq=False)
    else:
        run_recurrence(w_hh0_ref[...], write_seq=True)
        hsum = None
        # ----- layers 1 .. L-1 -----
        for l in range(L - 1):
            # Project the WHOLE previous-layer sequence before the in-place recurrence
            # overwrites seq_ref (keeps the hoist correct).
            gates_ref[...] = (
                jnp.dot(seq_ref[...], w_ih_r_ref[l],
                        preferred_element_type=jnp.float32)
                + b_r_ref[l]
            )
            hsum = run_recurrence(w_hh_r_ref[l], write_seq=(l < L - 2))

    # ----- mean over time (lstm_average=True) -----
    mean_h = hsum * (1.0 / S)                                         # [Np, H]

    # ----- projection to embedding space -----
    seg_emb = (
        jnp.dot(mean_h, w_p_ref[...], preferred_element_type=jnp.float32)
        + b_p_ref[...]
    )                                                                 # [Np, E]

    # ----- mean over the N real segments + L2 normalize (rsqrt) -----
    row = lax.broadcasted_iota(jnp.int32, (Np, 1), 0)
    emb = jnp.sum(jnp.where(row < N, seg_emb, 0.0), axis=0,
                  keepdims=True) * (1.0 / N)                          # [1, E]
    ssq = jnp.sum(emb * emb, axis=1, keepdims=True)
    inv = lax.rsqrt(jnp.maximum(ssq, 1e-24))                          # ~ 1/max(||e||,1e-12)
    out_ref[...] = jnp.broadcast_to((emb * inv).reshape(1, 1, E),
                                    (1, _OUT_PAD, E))


# ------------------------------ JAX wrapper ----------------------------------


def dvector_forward(spectrograms, params, *, segment_length, n_lstm_layers,
                    hidden_size, embedding_size):
    """spectrograms: [B, M, T] float32  ->  [B, E] float32 (L2-normalized)."""
    B, M, T = spectrograms.shape
    S = segment_length
    hop = S // 2
    H, E, L = hidden_size, embedding_size, n_lstm_layers

    # --- pad + unfold into overlapping segments (glue, plain JAX) ---
    right_pad = max(S - T, 0)
    spec = jnp.pad(spectrograms, ((0, 0), (0, 0), (0, right_pad)))
    Tp = spec.shape[-1]
    N = (Tp - S) // hop + 1
    idx = (jnp.arange(N) * hop)[:, None] + jnp.arange(S)[None, :]     # [N, S]
    seg = spec[:, :, idx]                                             # [B, M, N, S]
    seg = jnp.transpose(seg, (0, 3, 2, 1))                            # [B, S, N, M]
    Np = ((N + 7) // 8) * 8                                           # sublane-pad segments
    seg = jnp.pad(seg, ((0, 0), (0, 0), (0, Np - N), (0, 0)))
    seg = seg.reshape(B, S * Np, M).astype(jnp.float32)               # [B, S*Np, M]

    # --- reorder gate rows (i,f,g,o) -> (i,f,o,g) and pre-transpose weights ---
    perm = jnp.concatenate([jnp.arange(0, H), jnp.arange(H, 2 * H),
                            jnp.arange(3 * H, 4 * H), jnp.arange(2 * H, 3 * H)])
    w_ih0 = params["w_ih0"][perm].T                                   # [M, 4H]
    w_hh0 = params["w_hh0"][perm].T                                   # [H, 4H]
    b0 = params["b0"][:, perm]                                        # [1, 4H]
    w_ih_r = jnp.transpose(params["w_ih_r"][:, perm, :], (0, 2, 1))   # [L-1, H, 4H]
    w_hh_r = jnp.transpose(params["w_hh_r"][:, perm, :], (0, 2, 1))   # [L-1, H, 4H]
    b_r = params["b_r"][:, :, perm]                                   # [L-1, 1, 4H]
    w_p = params["w_proj"].T                                          # [H, E]
    b_p = params["b_proj"]                                            # [1, E]
    # TODO(synk): at production sizes (H=768, S=160) cast weights/activations to bf16
    # (keep f32 accumulation) on v6e/v7x to halve VMEM footprint and feed the MXU.

    kernel = functools.partial(dvector_kernel, S=S, Np=Np, N=N, H=H, E=E, L=L)
    vmem = pl.BlockSpec(memory_space=pltpu.MemorySpace.VMEM)

    out = pl.pallas_call(
        kernel,
        out_shape=jax.ShapeDtypeStruct((B, _OUT_PAD, E), jnp.float32),
        grid_spec=pltpu.PrefetchScalarGridSpec(
            num_scalar_prefetch=0,
            grid=(B,),
            in_specs=[
                pl.BlockSpec((1, S * Np, M), lambda b: (b, 0, 0)),
                vmem, vmem, vmem, vmem, vmem, vmem, vmem, vmem,
            ],
            out_specs=pl.BlockSpec((1, _OUT_PAD, E), lambda b: (b, 0, 0)),
            scratch_shapes=[
                pltpu.VMEM((S * Np, H), jnp.float32),
                pltpu.VMEM((S * Np, 4 * H), jnp.float32),
            ],
        ),
        compiler_params=pltpu.CompilerParams(
            dimension_semantics=("parallel",)),
    )(seg, w_ih0, w_hh0, b0, w_ih_r, w_hh_r, b_r, w_p, b_p)
    return out[:, 0, :]


# --------------------------- reference (pure JAX) -----------------------------


def dvector_reference(spectrograms, params, *, segment_length, n_lstm_layers,
                      hidden_size, embedding_size):
    B, M, T = spectrograms.shape
    S, hop, H, E, L = (segment_length, segment_length // 2, hidden_size,
                       embedding_size, n_lstm_layers)
    right_pad = max(S - T, 0)
    spec = jnp.pad(spectrograms, ((0, 0), (0, 0), (0, right_pad)))
    Tp = spec.shape[-1]
    N = (Tp - S) // hop + 1
    idx = (jnp.arange(N) * hop)[:, None] + jnp.arange(S)[None, :]
    seg = spec[:, :, idx]
    seg = jnp.transpose(seg, (3, 0, 2, 1)).reshape(S, B * N, M)       # [S, BN, M]

    def run_layer(x_seq, w_ih, w_hh, b):
        def step(carry, x_t):
            h, c = carry
            g = x_t @ w_ih.T + h @ w_hh.T + b
            i = jax.nn.sigmoid(g[:, 0 * H:1 * H])
            f = jax.nn.sigmoid(g[:, 1 * H:2 * H])
            gg = jnp.tanh(g[:, 2 * H:3 * H])
            o = jax.nn.sigmoid(g[:, 3 * H:4 * H])
            c = f * c + i * gg
            h = o * jnp.tanh(c)
            return (h, c), h
        init = (jnp.zeros((B * N, H)), jnp.zeros((B * N, H)))
        _, hs = lax.scan(step, init, x_seq)
        return hs                                                     # [S, BN, H]

    hs = run_layer(seg, params["w_ih0"], params["w_hh0"], params["b0"][0])
    for l in range(L - 1):
        hs = run_layer(hs, params["w_ih_r"][l], params["w_hh_r"][l],
                       params["b_r"][l, 0])
    mean_h = hs.mean(axis=0)
    seg_emb = mean_h @ params["w_proj"].T + params["b_proj"][0]
    emb = seg_emb.reshape(B, N, E).mean(axis=1)
    return emb / jnp.maximum(jnp.linalg.norm(emb, axis=1, keepdims=True), 1e-12)


# ---------------------------------- main --------------------------------------


def init_params(key, *, n_mels, hidden_size, n_lstm_layers, embedding_size):
    H, M, L, E = hidden_size, n_mels, n_lstm_layers, embedding_size
    k = 1.0 / jnp.sqrt(H)
    keys = jax.random.split(key, 8)
    u = lambda kk, shape: jax.random.uniform(kk, shape, jnp.float32, -k, k)
    return {
        "w_ih0": u(keys[0], (4 * H, M)),
        "w_hh0": u(keys[1], (4 * H, H)),
        "b0": u(keys[2], (1, 4 * H)),                 # b_ih + b_hh folded together
        "w_ih_r": u(keys[3], (L - 1, 4 * H, H)),
        "w_hh_r": u(keys[4], (L - 1, 4 * H, H)),
        "b_r": u(keys[5], (L - 1, 1, 4 * H)),
        "w_proj": u(keys[6], (E, H)),
        "b_proj": u(keys[7], (1, E)),
    }


if __name__ == "__main__":
    # Small shapes consistent with the module's forward:
    B, n_mels, T = 2, 16, 24
    segment_length = 16          # hop = 8 -> N = 2 segments per utterance
    hidden_size = 32
    n_lstm_layers = 3
    embedding_size = 32

    key = jax.random.PRNGKey(0)
    k_x, k_p = jax.random.split(key)
    spectrograms = jax.random.normal(k_x, (B, n_mels, T), dtype=jnp.float32)
    params = init_params(k_p, n_mels=n_mels, hidden_size=hidden_size,
                         n_lstm_layers=n_lstm_layers, embedding_size=embedding_size)

    out = dvector_forward(
        spectrograms, params,
        segment_length=segment_length, n_lstm_layers=n_lstm_layers,
        hidden_size=hidden_size, embedding_size=embedding_size)
    out = jax.block_until_ready(out)

    ref = dvector_reference(
        spectrograms, params,
        segment_length=segment_length, n_lstm_layers=n_lstm_layers,
        hidden_size=hidden_size, embedding_size=embedding_size)

    assert out.shape == (B, embedding_size)
    assert jnp.allclose(out, ref, atol=1e-3, rtol=1e-3), "mismatch vs JAX reference"
    print("KERNEL_OK")
</pallas_src>

<mosaic_0001>
module attributes {stable_mosaic.version = 11 : i64} {
  func.func @dvector_kernel(%arg0: i32, %arg1: memref<1x128x16xf32, #tpu.memory_space<vmem>>, %arg2: memref<16x128xf32, #tpu.memory_space<vmem>>, %arg3: memref<32x128xf32, #tpu.memory_space<vmem>>, %arg4: memref<1x128xf32, #tpu.memory_space<vmem>>, %arg5: memref<2x32x128xf32, #tpu.memory_space<vmem>>, %arg6: memref<2x32x128xf32, #tpu.memory_space<vmem>>, %arg7: memref<2x1x128xf32, #tpu.memory_space<vmem>>, %arg8: memref<32x32xf32, #tpu.memory_space<vmem>>, %arg9: memref<1x32xf32, #tpu.memory_space<vmem>>, %arg10: memref<1x8x32xf32, #tpu.memory_space<vmem>>, %arg11: memref<128x32xf32, #tpu.memory_space<vmem>>, %arg12: memref<128x128xf32, #tpu.memory_space<vmem>>) attributes {dimension_semantics = [#tpu.dimension_semantics<parallel>], iteration_bounds = array<i64: 2>, scalar_prefetch = 0 : i64, scratch_operands = 2 : i64, tpu.core_type = #tpu.core_type<tc>, window_params = [{transform_indices = @transform_0, window_bounds = array<i64: 1, 128, 16>}, {pipeline_mode = #tpu.pipeline_mode<synchronous>, transform_indices = @transform_1, window_bounds = array<i64: 16, 128>}, {pipeline_mode = #tpu.pipeline_mode<synchronous>, transform_indices = @transform_2, window_bounds = array<i64: 32, 128>}, {pipeline_mode = #tpu.pipeline_mode<synchronous>, transform_indices = @transform_3, window_bounds = array<i64: 1, 128>}, {pipeline_mode = #tpu.pipeline_mode<synchronous>, transform_indices = @transform_4, window_bounds = array<i64: 2, 32, 128>}, {pipeline_mode = #tpu.pipeline_mode<synchronous>, transform_indices = @transform_5, window_bounds = array<i64: 2, 32, 128>}, {pipeline_mode = #tpu.pipeline_mode<synchronous>, transform_indices = @transform_6, window_bounds = array<i64: 2, 1, 128>}, {pipeline_mode = #tpu.pipeline_mode<synchronous>, transform_indices = @transform_7, window_bounds = array<i64: 32, 32>}, {pipeline_mode = #tpu.pipeline_mode<synchronous>, transform_indices = @transform_8, window_bounds = array<i64: 1, 32>}, {transform_indices = @transform_9, window_bounds = array<i64: 1, 8, 32>}]} {
    %c0 = arith.constant 0 : index
    %c0_0 = arith.constant 0 : index
    %c0_1 = arith.constant 0 : index
    %0 = vector.load %arg1[%c0, %c0_0, %c0_1] : memref<1x128x16xf32, #tpu.memory_space<vmem>>, vector<1x128x16xf32>
    %1 = vector.shape_cast %0 : vector<1x128x16xf32> to vector<128x16xf32>
    %c0_2 = arith.constant 0 : index
    %c0_3 = arith.constant 0 : index
    %2 = vector.load %arg2[%c0_2, %c0_3] : memref<16x128xf32, #tpu.memory_space<vmem>>, vector<16x128xf32>
    %cst = arith.constant dense<0.000000e+00> : vector<128x128xf32>
    %3 = tpu.matmul %1, %2, %cst {dimension_numbers = #tpu.dot_dimension_numbers<[1], [0], [0], [1], [0, 0, 1, 1], [], []>} : vector<128x16xf32>, vector<16x128xf32>, vector<128x128xf32> -> vector<128x128xf32>
    %c0_4 = arith.constant 0 : index
    %c0_5 = arith.constant 0 : index
    %4 = vector.load %arg4[%c0_4, %c0_5] : memref<1x128xf32, #tpu.memory_space<vmem>>, vector<1x128xf32>
    %5 = vector.broadcast %4 : vector<1x128xf32> to vector<128x128xf32>
    %6 = arith.addf %3, %5 : vector<128x128xf32>
    %c0_6 = arith.constant 0 : index
    %c0_7 = arith.constant 0 : index
    %7 = vector.load %arg12[%c0_6, %c0_7] : memref<128x128xf32, #tpu.memory_space<vmem>>, vector<128x128xf32>
    tpu.vector_store %arg12[%c0_6, %c0_7], %6 {strides = array<i32>} : memref<128x128xf32, #tpu.memory_space<vmem>>, vector<128x128xf32>,
    %c0_8 = arith.constant 0 : index
    %c0_9 = arith.constant 0 : index
    %8 = vector.load %arg3[%c0_8, %c0_9] : memref<32x128xf32, #tpu.memory_space<vmem>>, vector<32x128xf32>
    %cst_10 = arith.constant 0.000000e+00 : f32
    %9 = vector.broadcast %cst_10 : f32 to vector<8x32xf32>
    %c0_i32 = arith.constant 0 : i32
    %c8_i32 = arith.constant 8 : i32
    %10 = arith.muli %c0_i32, %c8_i32 : i32
    %11 = tpu.assume_multiple %10, 8 : i32
    %12 = arith.index_cast %11 : i32 to index
    %c0_11 = arith.constant 0 : index
    %13 = vector.load %arg12[%12, %c0_11] : memref<128x128xf32, #tpu.memory_space<vmem>>, vector<8x128xf32>
    %cst_12 = arith.constant dense<0.000000e+00> : vector<8x128xf32>
    %14 = tpu.matmul %9, %8, %cst_12 {dimension_numbers = #tpu.dot_dimension_numbers<[1], [0], [0], [1], [0, 0, 1, 1], [], []>} : vector<8x32xf32>, vector<32x128xf32>, vector<8x128xf32> -> vector<8x128xf32>
    %15 = arith.addf %13, %14 : vector<8x128xf32>
    %16 = vector.extract_strided_slice %15 {offsets = [0, 0], sizes = [8, 96], strides = [1, 1]} : vector<8x128xf32> to vector<8x96xf32>
    %17 = arith.negf %16 : vector<8x96xf32>
    %18 = math.exp %17 : vector<8x96xf32>
    %cst_13 = arith.constant 1.000000e+00 : f32
    %19 = vector.broadcast %cst_13 : f32 to vector<8x96xf32>
    %20 = arith.addf %19, %18 : vector<8x96xf32>
    %21 = arith.divf %19, %20 : vector<8x96xf32>
    %22 = vector.extract_strided_slice %21 {offsets = [0, 32], sizes = [8, 32], strides = [1, 1]} : vector<8x96xf32> to vector<8x32xf32>
    %23 = arith.mulf %22, %9 : vector<8x32xf32>
    %24 = vector.extract_strided_slice %21 {offsets = [0, 0], sizes = [8, 32], strides = [1, 1]} : vector<8x96xf32> to vector<8x32xf32>
    %25 = vector.extract_strided_slice %15 {offsets = [0, 96], sizes = [8, 32], strides = [1, 1]} : vector<8x128xf32> to vector<8x32xf32>
    %26 = math.tanh %25 : vector<8x32xf32>
    %27 = arith.mulf %24, %26 : vector<8x32xf32>
    %28 = arith.addf %23, %27 : vector<8x32xf32>
    %29 = vector.extract_strided_slice %21 {offsets = [0, 64], sizes = [8, 32], strides = [1, 1]} : vector<8x96xf32> to vector<8x32xf32>
    %30 = math.tanh %28 : vector<8x32xf32>
    %31 = arith.mulf %29, %30 : vector<8x32xf32>
    %32 = arith.index_cast %11 : i32 to index
    %c0_14 = arith.constant 0 : index
    %33 = vector.load %arg11[%32, %c0_14] : memref<128x32xf32, #tpu.memory_space<vmem>>, vector<8x32xf32>
    tpu.vector_store %arg11[%32, %c0_14], %31 {strides = array<i32>} : memref<128x32xf32, #tpu.memory_space<vmem>>, vector<8x32xf32>,
    %c1_i32 = arith.constant 1 : i32
    %c8_i32_15 = arith.constant 8 : i32
    %34 = arith.muli %c1_i32, %c8_i32_15 : i32
    %35 = tpu.assume_multiple %34, 8 : i32
    %36 = arith.index_cast %35 : i32 to index
    %c0_16 = arith.constant 0 : index
    %37 = vector.load %arg12[%36, %c0_16] : memref<128x128xf32, #tpu.memory_space<vmem>>, vector<8x128xf32>
    %cst_17 = arith.constant dense<0.000000e+00> : vector<8x128xf32>
    %38 = tpu.matmul %31, %8, %cst_17 {dimension_numbers = #tpu.dot_dimension_numbers<[1], [0], [0], [1], [0, 0, 1, 1], [], []>} : vector<8x32xf32>, vector<32x128xf32>, vector<8x128xf32> -> vector<8x128xf32>
    %39 = arith.addf %37, %38 : vector<8x128xf32>
    %40 = vector.extract_strided_slice %39 {offsets = [0, 0], sizes = [8, 96], strides = [1, 1]} : vector<8x128xf32> to vector<8x96xf32>
    %41 = arith.negf %40 : vector<8x96xf32>
    %42 = math.exp %41 : vector<8x96xf32>
    %cst_18 = arith.constant 1.000000e+00 : f32
    %43 = vector.broadcast %cst_18 : f32 to vector<8x96xf32>
    %44 = arith.addf %43, %42 : vector<8x96xf32>
    %45 = arith.divf %43, %44 : vector<8x96xf32>
    %46 = vector.extract_strided_slice %45 {offsets = [0, 32], sizes = [8, 32], strides = [1, 1]} : vector<8x96xf32> to vector<8x32xf32>
    %47 = arith.mulf %46, %28 : vector<8x32xf32>
    %48 = vector.extract_strided_slice %45 {offsets = [0, 0], sizes = [8, 32], strides = [1, 1]} : vector<8x96xf32> to vector<8x32xf32>
    %49 = vector.extract_strided_slice %39 {offsets = [0, 96], sizes = [8, 32], strides = [1, 1]} : vector<8x128xf32> to vector<8x32xf32>
    %50 = math.tanh %49 : vector<8x32xf32>
    %51 = arith.mulf %48, %50 : vector<8x32xf32>
    %52 = arith.addf %47, %51 : vector<8x32xf32>
    %53 = vector.extract_strided_slice %45 {offsets = [0, 64], sizes = [8, 32], strides = [1, 1]} : vector<8x96xf32> to vector<8x32xf32>
    %54 = math.tanh %52 : vector<8x32xf32>
    %55 = arith.mulf %53, %54 : vector<8x32xf32>
    %56 = arith.index_cast %35 : i32 to index
    %c0_19 = arith.constant 0 : index
    %57 = vector.load %arg11[%56, %c0_19] : memref<128x32xf32, #tpu.memory_space<vmem>>, vector<8x32xf32>
    tpu.vector_store %arg11[%56, %c0_19], %55 {strides = array<i32>} : memref<128x32xf32, #tpu.memory_space<vmem>>, vector<8x32xf32>,
    %c2_i32 = arith.constant 2 : i32
    %c8_i32_20 = arith.constant 8 : i32
    %58 = arith.muli %c2_i32, %c8_i32_20 : i32
    %59 = tpu.assume_multiple %58, 8 : i32
    %60 = arith.index_cast %59 : i32 to index
    %c0_21 = arith.constant 0 : index
    %61 = vector.load %arg12[%60, %c0_21] : memref<128x128xf32, #tpu.memory_space<vmem>>, vector<8x128xf32>
    %cst_22 = arith.constant dense<0.000000e+00> : vector<8x128xf32>
    %62 = tpu.matmul %55, %8, %cst_22 {dimension_numbers = #tpu.dot_dimension_numbers<[1], [0], [0], [1], [0, 0, 1, 1], [], []>} : vector<8x32xf32>, vector<32x128xf32>, vector<8x128xf32> -> vector<8x128xf32>
    %63 = arith.addf %61, %62 : vector<8x128xf32>
    %64 = vector.extract_strided_slice %63 {offsets = [0, 0], sizes = [8, 96], strides = [1, 1]} : vector<8x128xf32> to vector<8x96xf32>
    %65 = arith.negf %64 : vector<8x96xf32>
    %66 = math.exp %65 : vector<8x96xf32>
    %cst_23 = arith.constant 1.000000e+00 : f32
    %67 = vector.broadcast %cst_23 : f32 to vector<8x96xf32>
    %68 = arith.addf %67, %66 : vector<8x96xf32>
    %69 = arith.divf %67, %68 : vector<8x96xf32>
    %70 = vector.extract_strided_slice %69 {offsets = [0, 32], sizes = [8, 32], strides = [1, 1]} : vector<8x96xf32> to vector<8x32xf32>
    %71 = arith.mulf %70, %52 : vector<8x32xf32>
    %72 = vector.extract_strided_slice %69 {offsets = [0, 0], sizes = [8, 32], strides = [1, 1]} : vector<8x96xf32> to vector<8x32xf32>
    %73 = vector.extract_strided_slice %63 {offsets = [0, 96], sizes = [8, 32], strides = [1, 1]} : vector<8x128xf32> to vector<8x32xf32>
    %74 = math.tanh %73 : vector<8x32xf32>
    %75 = arith.mulf %72, %74 : vector<8x32xf32>
    %76 = arith.addf %71, %75 : vector<8x32xf32>
    %77 = vector.extract_strided_slice %69 {offsets = [0, 64], sizes = [8, 32], strides = [1, 1]} : vector<8x96xf32> to vector<8x32xf32>
    %78 = math.tanh %76 : vector<8x32xf32>
    %79 = arith.mulf %77, %78 : vector<8x32xf32>
    %80 = arith.index_cast %59 : i32 to index
    %c0_24 = arith.constant 0 : index
    %81 = vector.load %arg11[%80, %c0_24] : memref<128x32xf32, #tpu.memory_space<vmem>>, vector<8x32xf32>
    tpu.vector_store %arg11[%80, %c0_24], %79 {strides = array<i32>} : memref<128x32xf32, #tpu.memory_space<vmem>>, vector<8x32xf32>,
    %c3_i32 = arith.constant 3 : i32
    %c8_i32_25 = arith.constant 8 : i32
    %82 = arith.muli %c3_i32, %c8_i32_25 : i32
    %83 = tpu.assume_multiple %82, 8 : i32
    %84 = arith.index_cast %83 : i32 to index
    %c0_26 = arith.constant 0 : index
    %85 = vector.load %arg12[%84, %c0_26] : memref<128x128xf32, #tpu.memory_space<vmem>>, vector<8x128xf32>
    %cst_27 = arith.constant dense<0.000000e+00> : vector<8x128xf32>
    %86 = tpu.matmul %79, %8, %cst_27 {dimension_numbers = #tpu.dot_dimension_numbers<[1], [0], [0], [1], [0, 0, 1, 1], [], []>} : vector<8x32xf32>, vector<32x128xf32>, vector<8x128xf32> -> vector<8x128xf32>
    %87 = arith.addf %85, %86 : vector<8x128xf32>
    %88 = vector.extract_strided_slice %87 {offsets = [0, 0], sizes = [8, 96], strides = [1, 1]} : vector<8x128xf32> to vector<8x96xf32>
    %89 = arith.negf %88 : vector<8x96xf32>
    %90 = math.exp %89 : vector<8x96xf32>
    %cst_28 = arith.constant 1.000000e+00 : f32
    %91 = vector.broadcast %cst_28 : f32 to vector<8x96xf32>
    %92 = arith.addf %91, %90 : vector<8x96xf32>
    %93 = arith.divf %91, %92 : vector<8x96xf32>
    %94 = vector.extract_strided_slice %93 {offsets = [0, 32], sizes = [8, 32], strides = [1, 1]} : vector<8x96xf32> to vector<8x32xf32>
    %95 = arith.mulf %94, %76 : vector<8x32xf32>
    %96 = vector.extract_strided_slice %93 {offsets = [0, 0], sizes = [8, 32], strides = [1, 1]} : vector<8x96xf32> to vector<8x32xf32>
    %97 = vector.extract_strided_slice %87 {offsets = [0, 96], sizes = [8, 32], strides = [1, 1]} : vector<8x128xf32> to vector<8x32xf32>
    %98 = math.tanh %97 : vector<8x32xf32>
    %99 = arith.mulf %96, %98 : vector<8x32xf32>
    %100 = arith.addf %95, %99 : vector<8x32xf32>
    %101 = vector.extract_strided_slice %93 {offsets = [0, 64], sizes = [8, 32], strides = [1, 1]} : vector<8x96xf32> to vector<8x32xf32>
    %102 = math.tanh %100 : vector<8x32xf32>
    %103 = arith.mulf %101, %102 : vector<8x32xf32>
    %104 = arith.index_cast %83 : i32 to index
    %c0_29 = arith.constant 0 : index
    %105 = vector.load %arg11[%104, %c0_29] : memref<128x32xf32, #tpu.memory_space<vmem>>, vector<8x32xf32>
    tpu.vector_store %arg11[%104, %c0_29], %103 {strides = array<i32>} : memref<128x32xf32, #tpu.memory_space<vmem>>, vector<8x32xf32>,
    %c4_i32 = arith.constant 4 : i32
    %c8_i32_30 = arith.constant 8 : i32
    %106 = arith.muli %c4_i32, %c8_i32_30 : i32
    %107 = tpu.assume_multiple %106, 8 : i32
    %108 = arith.index_cast %107 : i32 to index
    %c0_31 = arith.constant 0 : index
    %109 = vector.load %arg12[%108, %c0_31] : memref<128x128xf32, #tpu.memory_space<vmem>>, vector<8x128xf32>
    %cst_32 = arith.constant dense<0.000000e+00> : vector<8x128xf32>
    %110 = tpu.matmul %103, %8, %cst_32 {dimension_numbers = #tpu.dot_dimension_numbers<[1], [0], [0], [1], [0, 0, 1, 1], [], []>} : vector<8x32xf32>, vector<32x128xf32>, vector<8x128xf32> -> vector<8x128xf32>
    %111 = arith.addf %109, %110 : vector<8x128xf32>
    %112 = vector.extract_strided_slice %111 {offsets = [0, 0], sizes = [8, 96], strides = [1, 1]} : vector<8x128xf32> to vector<8x96xf32>
    %113 = arith.negf %112 : vector<8x96xf32>
    %114 = math.exp %113 : vector<8x96xf32>
    %cst_33 = arith.constant 1.000000e+00 : f32
    %115 = vector.broadcast %cst_33 : f32 to vector<8x96xf32>
    %116 = arith.addf %115, %114 : vector<8x96xf32>
    %117 = arith.divf %115, %116 : vector<8x96xf32>
    %118 = vector.extract_strided_slice %117 {offsets = [0, 32], sizes = [8, 32], strides = [1, 1]} : vector<8x96xf32> to vector<8x32xf32>
    %119 = arith.mulf %118, %100 : vector<8x32xf32>
    %120 = vector.extract_strided_slice %117 {offsets = [0, 0], sizes = [8, 32], strides = [1, 1]} : vector<8x96xf32> to vector<8x32xf32>
    %121 = vector.extract_strided_slice %111 {offsets = [0, 96], sizes = [8, 32], strides = [1, 1]} : vector<8x128xf32> to vector<8x32xf32>
    %122 = math.tanh %121 : vector<8x32xf32>
    %123 = arith.mulf %120, %122 : vector<8x32xf32>
    %124 = arith.addf %119, %123 : vector<8x32xf32>
    %125 = vector.extract_strided_slice %117 {offsets = [0, 64], sizes = [8, 32], strides = [1, 1]} : vector<8x96xf32> to vector<8x32xf32>
    %126 = math.tanh %124 : vector<8x32xf32>
    %127 = arith.mulf %125, %126 : vector<8x32xf32>
    %128 = arith.index_cast %107 : i32 to index
    %c0_34 = arith.constant 0 : index
    %129 = vector.load %arg11[%128, %c0_34] : memref<128x32xf32, #tpu.memory_space<vmem>>, vector<8x32xf32>
    tpu.vector_store %arg11[%128, %c0_34], %127 {strides = array<i32>} : memref<128x32xf32, #tpu.memory_space<vmem>>, vector<8x32xf32>,
    %c5_i32 = arith.constant 5 : i32
    %c8_i32_35 = arith.constant 8 : i32
    %130 = arith.muli %c5_i32, %c8_i32_35 : i32
    %131 = tpu.assume_multiple %130, 8 : i32
    %132 = arith.index_cast %131 : i32 to index
    %c0_36 = arith.constant 0 : index
    %133 = vector.load %arg12[%132, %c0_36] : memref<128x128xf32, #tpu.memory_space<vmem>>, vector<8x128xf32>
    %cst_37 = arith.constant dense<0.000000e+00> : vector<8x128xf32>
    %134 = tpu.matmul %127, %8, %cst_37 {dimension_numbers = #tpu.dot_dimension_numbers<[1], [0], [0], [1], [0, 0, 1, 1], [], []>} : vector<8x32xf32>, vector<32x128xf32>, vector<8x128xf32> -> vector<8x128xf32>
    %135 = arith.addf %133, %134 : vector<8x128xf32>
    %136 = vector.extract_strided_slice %135 {offsets = [0, 0], sizes = [8, 96], strides = [1, 1]} : vector<8x128xf32> to vector<8x96xf32>
    %137 = arith.negf %136 : vector<8x96xf32>
    %138 = math.exp %137 : vector<8x96xf32>
    %cst_38 = arith.constant 1.000000e+00 : f32
    %139 = vector.broadcast %cst_38 : f32 to vector<8x96xf32>
    %140 = arith.addf %139, %138 : vector<8x96xf32>
    %141 = arith.divf %139, %140 : vector<8x96xf32>
    %142 = vector.extract_strided_slice %141 {offsets = [0, 32], sizes = [8, 32], strides = [1, 1]} : vector<8x96xf32> to vector<8x32xf32>
    %143 = arith.mulf %142, %124 : vector<8x32xf32>
    %144 = vector.extract_strided_slice %141 {offsets = [0, 0], sizes = [8, 32], strides = [1, 1]} : vector<8x96xf32> to vector<8x32xf32>
    %145 = vector.extract_strided_slice %135 {offsets = [0, 96], sizes = [8, 32], strides = [1, 1]} : vector<8x128xf32> to vector<8x32xf32>
    %146 = math.tanh %145 : vector<8x32xf32>
    %147 = arith.mulf %144, %146 : vector<8x32xf32>
    %148 = arith.addf %143, %147 : vector<8x32xf32>
    %149 = vector.extract_strided_slice %141 {offsets = [0, 64], sizes = [8, 32], strides = [1, 1]} : vector<8x96xf32> to vector<8x32xf32>
    %150 = math.tanh %148 : vector<8x32xf32>
    %151 = arith.mulf %149, %150 : vector<8x32xf32>
    %152 = arith.index_cast %131 : i32 to index
    %c0_39 = arith.constant 0 : index
    %153 = vector.load %arg11[%152, %c0_39] : memref<128x32xf32, #tpu.memory_space<vmem>>, vector<8x32xf32>
    tpu.vector_store %arg11[%152, %c0_39], %151 {strides = array<i32>} : memref<128x32xf32, #tpu.memory_space<vmem>>, vector<8x32xf32>,
    %c6_i32 = arith.constant 6 : i32
    %c8_i32_40 = arith.constant 8 : i32
    %154 = arith.muli %c6_i32, %c8_i32_40 : i32
    %155 = tpu.assume_multiple %154, 8 : i32
    %156 = arith.index_cast %155 : i32 to index
    %c0_41 = arith.constant 0 : index
    %157 = vector.load %arg12[%156, %c0_41] : memref<128x128xf32, #tpu.memory_space<vmem>>, vector<8x128xf32>
    %cst_42 = arith.constant dense<0.000000e+00> : vector<8x128xf32>
    %158 = tpu.matmul %151, %8, %cst_42 {dimension_numbers = #tpu.dot_dimension_numbers<[1], [0], [0], [1], [0, 0, 1, 1], [], []>} : vector<8x32xf32>, vector<32x128xf32>, vector<8x128xf32> -> vector<8x128xf32>
    %159 = arith.addf %157, %158 : vector<8x128xf32>
    %160 = vector.extract_strided_slice %159 {offsets = [0, 0], sizes = [8, 96], strides = [1, 1]} : vector<8x128xf32> to vector<8x96xf32>
    %161 = arith.negf %160 : vector<8x96xf32>
    %162 = math.exp %161 : vector<8x96xf32>
    %cst_43 = arith.constant 1.000000e+00 : f32
    %163 = vector.broadcast %cst_43 : f32 to vector<8x96xf32>
    %164 = arith.addf %163, %162 : vector<8x96xf32>
    %165 = arith.divf %163, %164 : vector<8x96xf32>
    %166 = vector.extract_strided_slice %165 {offsets = [0, 32], sizes = [8, 32], strides = [1, 1]} : vector<8x96xf32> to vector<8x32xf32>
    %167 = arith.mulf %166, %148 : vector<8x32xf32>
    %168 = vector.extract_strided_slice %165 {offsets = [0, 0], sizes = [8, 32], strides = [1, 1]} : vector<8x96xf32> to vector<8x32xf32>
    %169 = vector.extract_strided_slice %159 {offsets = [0, 96], sizes = [8, 32], strides = [1, 1]} : vector<8x128xf32> to vector<8x32xf32>
    %170 = math.tanh %169 : vector<8x32xf32>
    %171 = arith.mulf %168, %170 : vector<8x32xf32>
    %172 = arith.addf %167, %171 : vector<8x32xf32>
    %173 = vector.extract_strided_slice %165 {offsets = [0, 64], sizes = [8, 32], strides = [1, 1]} : vector<8x96xf32> to vector<8x32xf32>
    %174 = math.tanh %172 : vector<8x32xf32>
    %175 = arith.mulf %173, %174 : vector<8x32xf32>
    %176 = arith.index_cast %155 : i32 to index
    %c0_44 = arith.constant 0 : index
    %177 = vector.load %arg11[%176, %c0_44] : memref<128x32xf32, #tpu.memory_space<vmem>>, vector<8x32xf32>
    tpu.vector_store %arg11[%176, %c0_44], %175 {strides = array<i32>} : memref<128x32xf32, #tpu.memory_space<vmem>>, vector<8x32xf32>,
    %c7_i32 = arith.constant 7 : i32
    %c8_i32_45 = arith.constant 8 : i32
    %178 = arith.muli %c7_i32, %c8_i32_45 : i32
    %179 = tpu.assume_multiple %178, 8 : i32
    %180 = arith.index_cast %179 : i32 to index
    %c0_46 = arith.constant 0 : index
    %181 = vector.load %arg12[%180, %c0_46] : memref<128x128xf32, #tpu.memory_space<vmem>>, vector<8x128xf32>
    %cst_47 = arith.constant dense<0.000000e+00> : vector<8x128xf32>
    %182 = tpu.matmul %175, %8, %cst_47 {dimension_numbers = #tpu.dot_dimension_numbers<[1], [0], [0], [1], [0, 0, 1, 1], [], []>} : vector<8x32xf32>, vector<32x128xf32>, vector<8x128xf32> -> vector<8x128xf32>
    %183 = arith.addf %181, %182 : vector<8x128xf32>
    %184 = vector.extract_strided_slice %183 {offsets = [0, 0], sizes = [8, 96], strides = [1, 1]} : vector<8x128xf32> to vector<8x96xf32>
    %185 = arith.negf %184 : vector<8x96xf32>
    %186 = math.exp %185 : vector<8x96xf32>
    %cst_48 = arith.constant 1.000000e+00 : f32
    %187 = vector.broadcast %cst_48 : f32 to vector<8x96xf32>
    %188 = arith.addf %187, %186 : vector<8x96xf32>
    %189 = arith.divf %187, %188 : vector<8x96xf32>
    %190 = vector.extract_strided_slice %189 {offsets = [0, 32], sizes = [8, 32], strides = [1, 1]} : vector<8x96xf32> to vector<8x32xf32>
    %191 = arith.mulf %190, %172 : vector<8x32xf32>
    %192 = vector.extract_strided_slice %189 {offsets = [0, 0], sizes = [8, 32], strides = [1, 1]} : vector<8x96xf32> to vector<8x32xf32>
    %193 = vector.extract_strided_slice %183 {offsets = [0, 96], sizes = [8, 32], strides = [1, 1]} : vector<8x128xf32> to vector<8x32xf32>
    %194 = math.tanh %193 : vector<8x32xf32>
    %195 = arith.mulf %192, %194 : vector<8x32xf32>
    %196 = arith.addf %191, %195 : vector<8x32xf32>
    %197 = vector.extract_strided_slice %189 {offsets = [0, 64], sizes = [8, 32], strides = [1, 1]} : vector<8x96xf32> to vector<8x32xf32>
    %198 = math.tanh %196 : vector<8x32xf32>
    %199 = arith.mulf %197, %198 : vector<8x32xf32>
    %200 = arith.index_cast %179 : i32 to index
    %c0_49 = arith.constant 0 : index
    %201 = vector.load %arg11[%200, %c0_49] : memref<128x32xf32, #tpu.memory_space<vmem>>, vector<8x32xf32>
    tpu.vector_store %arg11[%200, %c0_49], %199 {strides = array<i32>} : memref<128x32xf32, #tpu.memory_space<vmem>>, vector<8x32xf32>,
    %c8_i32_50 = arith.constant 8 : i32
    %c8_i32_51 = arith.constant 8 : i32
    %202 = arith.muli %c8_i32_50, %c8_i32_51 : i32
    %203 = tpu.assume_multiple %202, 8 : i32
    %204 = arith.index_cast %203 : i32 to index
    %c0_52 = arith.constant 0 : index
    %205 = vector.load %arg12[%204, %c0_52] : memref<128x128xf32, #tpu.memory_space<vmem>>, vector<8x128xf32>
    %cst_53 = arith.constant dense<0.000000e+00> : vector<8x128xf32>
    %206 = tpu.matmul %199, %8, %cst_53 {dimension_numbers = #tpu.dot_dimension_numbers<[1], [0], [0], [1], [0, 0, 1, 1], [], []>} : vector<8x32xf32>, vector<32x128xf32>, vector<8x128xf32> -> vector<8x128xf32>
    %207 = arith.addf %205, %206 : vector<8x128xf32>
    %208 = vector.extract_strided_slice %207 {offsets = [0, 0], sizes = [8, 96], strides = [1, 1]} : vector<8x128xf32> to vector<8x96xf32>
    %209 = arith.negf %208 : vector<8x96xf32>
    %210 = math.exp %209 : vector<8x96xf32>
    %cst_54 = arith.constant 1.000000e+00 : f32
    %211 = vector.broadcast %cst_54 : f32 to vector<8x96xf32>
    %212 = arith.addf %211, %210 : vector<8x96xf32>
    %213 = arith.divf %211, %212 : vector<8x96xf32>
    %214 = vector.extract_strided_slice %213 {offsets = [0, 32], sizes = [8, 32], strides = [1, 1]} : vector<8x96xf32> to vector<8x32xf32>
    %215 = arith.mulf %214, %196 : vector<8x32xf32>
    %216 = vector.extract_strided_slice %213 {offsets = [0, 0], sizes = [8, 32], strides = [1, 1]} : vector<8x96xf32> to vector<8x32xf32>
    %217 = vector.extract_strided_slice %207 {offsets = [0, 96], sizes = [8, 32], strides = [1, 1]} : vector<8x128xf32> to vector<8x32xf32>
    %218 = math.tanh %217 : vector<8x32xf32>
    %219 = arith.mulf %216, %218 : vector<8x32xf32>
    %220 = arith.addf %215, %219 : vector<8x32xf32>
    %221 = vector.extract_strided_slice %213 {offsets = [0, 64], sizes = [8, 32], strides = [1, 1]} : vector<8x96xf32> to vector<8x32xf32>
    %222 = math.tanh %220 : vector<8x32xf32>
    %223 = arith.mulf %221, %222 : vector<8x32xf32>
    %224 = arith.index_cast %203 : i32 to index
    %c0_55 = arith.constant 0 : index
    %225 = vector.load %arg11[%224, %c0_55] : memref<128x32xf32, #tpu.memory_space<vmem>>, vector<8x32xf32>
    tpu.vector_store %arg11[%224, %c0_55], %223 {strides = array<i32>} : memref<128x32xf32, #tpu.memory_space<vmem>>, vector<8x32xf32>,
    %c9_i32 = arith.constant 9 : i32
    %c8_i32_56 = arith.constant 8 : i32
    %226 = arith.muli %c9_i32, %c8_i32_56 : i32
    %227 = tpu.assume_multiple %226, 8 : i32
    %228 = arith.index_cast %227 : i32 to index
    %c0_57 = arith.constant 0 : index
    %229 = vector.load %arg12[%228, %c0_57] : memref<128x128xf32, #tpu.memory_space<vmem>>, vector<8x128xf32>
    %cst_58 = arith.constant dense<0.000000e+00> : vector<8x128xf32>
    %230 = tpu.matmul %223, %8, %cst_58 {dimension_numbers = #tpu.dot_dimension_numbers<[1], [0], [0], [1], [0, 0, 1, 1], [], []>} : vector<8x32xf32>, vector<32x128xf32>, vector<8x128xf32> -> vector<8x128xf32>
    %231 = arith.addf %229, %230 : vector<8x128xf32>
    %232 = vector.extract_strided_slice %231 {offsets = [0, 0], sizes = [8, 96], strides = [1, 1]} : vector<8x128xf32> to vector<8x96xf32>
    %233 = arith.negf %232 : vector<8x96xf32>
    %234 = math.exp %233 : vector<8x96xf32>
    %cst_59 = arith.constant 1.000000e+00 : f32
    %235 = vector.broadcast %cst_59 : f32 to vector<8x96xf32>
    %236 = arith.addf %235, %234 : vector<8x96xf32>
    %237 = arith.divf %235, %236 : vector<8x96xf32>
    %238 = vector.extract_strided_slice %237 {offsets = [0, 32], sizes = [8, 32], strides = [1, 1]} : vector<8x96xf32> to vector<8x32xf32>
    %239 = arith.mulf %238, %220 : vector<8x32xf32>
    %240 = vector.extract_strided_slice %237 {offsets = [0, 0], sizes = [8, 32], strides = [1, 1]} : vector<8x96xf32> to vector<8x32xf32>
    %241 = vector.extract_strided_slice %231 {offsets = [0, 96], sizes = [8, 32], strides = [1, 1]} : vector<8x128xf32> to vector<8x32xf32>
    %242 = math.tanh %241 : vector<8x32xf32>
    %243 = arith.mulf %240, %242 : vector<8x32xf32>
    %244 = arith.addf %239, %243 : vector<8x32xf32>
    %245 = vector.extract_strided_slice %237 {offsets = [0, 64], sizes = [8, 32], strides = [1, 1]} : vector<8x96xf32> to vector<8x32xf32>
    %246 = math.tanh %244 : vector<8x32xf32>
    %247 = arith.mulf %245, %246 : vector<8x32xf32>
    %248 = arith.index_cast %227 : i32 to index
    %c0_60 = arith.constant 0 : index
    %249 = vector.load %arg11[%248, %c0_60] : memref<128x32xf32, #tpu.memory_space<vmem>>, vector<8x32xf32>
    tpu.vector_store %arg11[%248, %c0_60], %247 {strides = array<i32>} : memref<128x32xf32, #tpu.memory_space<vmem>>, vector<8x32xf32>,
    %c10_i32 = arith.constant 10 : i32
    %c8_i32_61 = arith.constant 8 : i32
    %250 = arith.muli %c10_i32, %c8_i32_61 : i32
    %251 = tpu.assume_multiple %250, 8 : i32
    %252 = arith.index_cast %251 : i32 to index
    %c0_62 = arith.constant 0 : index
    %253 = vector.load %arg12[%252, %c0_62] : memref<128x128xf32, #tpu.memory_space<vmem>>, vector<8x128xf32>
    %cst_63 = arith.constant dense<0.000000e+00> : vector<8x128xf32>
    %254 = tpu.matmul %247, %8, %cst_63 {dimension_numbers = #tpu.dot_dimension_numbers<[1], [0], [0], [1], [0, 0, 1, 1], [], []>} : vector<8x32xf32>, vector<32x128xf32>, vector<8x128xf32> -> vector<8x128xf32>
    %255 = arith.addf %253, %254 : vector<8x128xf32>
    %256 = vector.extract_strided_slice %255 {offsets = [0, 0], sizes = [8, 96], strides = [1, 1]} : vector<8x128xf32> to vector<8x96xf32>
    %257 = arith.negf %256 : vector<8x96xf32>
    %258 = math.exp %257 : vector<8x96xf32>
    %cst_64 = arith.constant 1.000000e+00 : f32
    %259 = vector.broadcast %cst_64 : f32 to vector<8x96xf32>
    %260 = arith.addf %259, %258 : vector<8x96xf32>
    %261 = arith.divf %259, %260 : vector<8x96xf32>
    %262 = vector.extract_strided_slice %261 {offsets = [0, 32], sizes = [8, 32], strides = [1, 1]} : vector<8x96xf32> to vector<8x32xf32>
    %263 = arith.mulf %262, %244 : vector<8x32xf32>
    %264 = vector.extract_strided_slice %261 {offsets = [0, 0], sizes = [8, 32], strides = [1, 1]} : vector<8x96xf32> to vector<8x32xf32>
    %265 = vector.extract_strided_slice %255 {offsets = [0, 96], sizes = [8, 32], strides = [1, 1]} : vector<8x128xf32> to vector<8x32xf32>
    %266 = math.tanh %265 : vector<8x32xf32>
    %267 = arith.mulf %264, %266 : vector<8x32xf32>
    %268 = arith.addf %263, %267 : vector<8x32xf32>
    %269 = vector.extract_strided_slice %261 {offsets = [0, 64], sizes = [8, 32], strides = [1, 1]} : vector<8x96xf32> to vector<8x32xf32>
    %270 = math.tanh %268 : vector<8x32xf32>
    %271 = arith.mulf %269, %270 : vector<8x32xf32>
    %272 = arith.index_cast %251 : i32 to index
    %c0_65 = arith.constant 0 : index
    %273 = vector.load %arg11[%272, %c0_65] : memref<128x32xf32, #tpu.memory_space<vmem>>, vector<8x32xf32>
    tpu.vector_store %arg11[%272, %c0_65], %271 {strides = array<i32>} : memref<128x32xf32, #tpu.memory_space<vmem>>, vector<8x32xf32>,
    %c11_i32 = arith.constant 11 : i32
    %c8_i32_66 = arith.constant 8 : i32
    %274 = arith.muli %c11_i32, %c8_i32_66 : i32
    %275 = tpu.assume_multiple %274, 8 : i32
    %276 = arith.index_cast %275 : i32 to index
    %c0_67 = arith.constant 0 : index
    %277 = vector.load %arg12[%276, %c0_67] : memref<128x128xf32, #tpu.memory_space<vmem>>, vector<8x128xf32>
    %cst_68 = arith.constant dense<0.000000e+00> : vector<8x128xf32>
    %278 = tpu.matmul %271, %8, %cst_68 {dimension_numbers = #tpu.dot_dimension_numbers<[1], [0], [0], [1], [0, 0, 1, 1], [], []>} : vector<8x32xf32>, vector<32x128xf32>, vector<8x128xf32> -> vector<8x128xf32>
    %279 = arith.addf %277, %278 : vector<8x128xf32>
    %280 = vector.extract_strided_slice %279 {offsets = [0, 0], sizes = [8, 96], strides = [1, 1]} : vector<8x128xf32> to vector<8x96xf32>
    %281 = arith.negf %280 : vector<8x96xf32>
    %282 = math.exp %281 : vector<8x96xf32>
    %cst_69 = arith.constant 1.000000e+00 : f32
    %283 = vector.broadcast %cst_69 : f32 to vector<8x96xf32>
    %284 = arith.addf %283, %282 : vector<8x96xf32>
    %285 = arith.divf %283, %284 : vector<8x96xf32>
    %286 = vector.extract_strided_slice %285 {offsets = [0, 32], sizes = [8, 32], strides = [1, 1]} : vector<8x96xf32> to vector<8x32xf32>
    %287 = arith.mulf %286, %268 : vector<8x32xf32>
    %288 = vector.extract_strided_slice %285 {offsets = [0, 0], sizes = [8, 32], strides = [1, 1]} : vector<8x96xf32> to vector<8x32xf32>
    %289 = vector.extract_strided_slice %279 {offsets = [0, 96], sizes = [8, 32], strides = [1, 1]} : vector<8x128xf32> to vector<8x32xf32>
    %290 = math.tanh %289 : vector<8x32xf32>
    %291 = arith.mulf %288, %290 : vector<8x32xf32>
    %292 = arith.addf %287, %291 : vector<8x32xf32>
    %293 = vector.extract_strided_slice %285 {offsets = [0, 64], sizes = [8, 32], strides = [1, 1]} : vector<8x96xf32> to vector<8x32xf32>
    %294 = math.tanh %292 : vector<8x32xf32>
    %295 = arith.mulf %293, %294 : vector<8x32xf32>
    %296 = arith.index_cast %275 : i32 to index
    %c0_70 = arith.constant 0 : index
    %297 = vector.load %arg11[%296, %c0_70] : memref<128x32xf32, #tpu.memory_space<vmem>>, vector<8x32xf32>
    tpu.vector_store %arg11[%296, %c0_70], %295 {strides = array<i32>} : memref<128x32xf32, #tpu.memory_space<vmem>>, vector<8x32xf32>,
    %c12_i32 = arith.constant 12 : i32
    %c8_i32_71 = arith.constant 8 : i32
    %298 = arith.muli %c12_i32, %c8_i32_71 : i32
    %299 = tpu.assume_multiple %298, 8 : i32
    %300 = arith.index_cast %299 : i32 to index
    %c0_72 = arith.constant 0 : index
    %301 = vector.load %arg12[%300, %c0_72] : memref<128x128xf32, #tpu.memory_space<vmem>>, vector<8x128xf32>
    %cst_73 = arith.constant dense<0.000000e+00> : vector<8x128xf32>
    %302 = tpu.matmul %295, %8, %cst_73 {dimension_numbers = #tpu.dot_dimension_numbers<[1], [0], [0], [1], [0, 0, 1, 1], [], []>} : vector<8x32xf32>, vector<32x128xf32>, vector<8x128xf32> -> vector<8x128xf32>
    %303 = arith.addf %301, %302 : vector<8x128xf32>
    %304 = vector.extract_strided_slice %303 {offsets = [0, 0], sizes = [8, 96], strides = [1, 1]} : vector<8x128xf32> to vector<8x96xf32>
    %305 = arith.negf %304 : vector<8x96xf32>
    %306 = math.exp %305 : vector<8x96xf32>
    %cst_74 = arith.constant 1.000000e+00 : f32
    %307 = vector.broadcast %cst_74 : f32 to vector<8x96xf32>
    %308 = arith.addf %307, %306 : vector<8x96xf32>
    %309 = arith.divf %307, %308 : vector<8x96xf32>
    %310 = vector.extract_strided_slice %309 {offsets = [0, 32], sizes = [8, 32], strides = [1, 1]} : vector<8x96xf32> to vector<8x32xf32>
    %311 = arith.mulf %310, %292 : vector<8x32xf32>
    %312 = vector.extract_strided_slice %309 {offsets = [0, 0], sizes = [8, 32], strides = [1, 1]} : vector<8x96xf32> to vector<8x32xf32>
    %313 = vector.extract_strided_slice %303 {offsets = [0, 96], sizes = [8, 32], strides = [1, 1]} : vector<8x128xf32> to vector<8x32xf32>
    %314 = math.tanh %313 : vector<8x32xf32>
    %315 = arith.mulf %312, %314 : vector<8x32xf32>
    %316 = arith.addf %311, %315 : vector<8x32xf32>
    %317 = vector.extract_strided_slice %309 {offsets = [0, 64], sizes = [8, 32], strides = [1, 1]} : vector<8x96xf32> to vector<8x32xf32>
    %318 = math.tanh %316 : vector<8x32xf32>
    %319 = arith.mulf %317, %318 : vector<8x32xf32>
    %320 = arith.index_cast %299 : i32 to index
    %c0_75 = arith.constant 0 : index
    %321 = vector.load %arg11[%320, %c0_75] : memref<128x32xf32, #tpu.memory_space<vmem>>, vector<8x32xf32>
    tpu.vector_store %arg11[%320, %c0_75], %319 {strides = array<i32>} : memref<128x32xf32, #tpu.memory_space<vmem>>, vector<8x32xf32>,
    %c13_i32 = arith.constant 13 : i32
    %c8_i32_76 = arith.constant 8 : i32
    %322 = arith.muli %c13_i32, %c8_i32_76 : i32
    %323 = tpu.assume_multiple %322, 8 : i32
    %324 = arith.index_cast %323 : i32 to index
    %c0_77 = arith.constant 0 : index
    %325 = vector.load %arg12[%324, %c0_77] : memref<128x128xf32, #tpu.memory_space<vmem>>, vector<8x128xf32>
    %cst_78 = arith.constant dense<0.000000e+00> : vector<8x128xf32>
    %326 = tpu.matmul %319, %8, %cst_78 {dimension_numbers = #tpu.dot_dimension_numbers<[1], [0], [0], [1], [0, 0, 1, 1], [], []>} : vector<8x32xf32>, vector<32x128xf32>, vector<8x128xf32> -> vector<8x128xf32>
    %327 = arith.addf %325, %326 : vector<8x128xf32>
    %328 = vector.extract_strided_slice %327 {offsets = [0, 0], sizes = [8, 96], strides = [1, 1]} : vector<8x128xf32> to vector<8x96xf32>
    %329 = arith.negf %328 : vector<8x96xf32>
    %330 = math.exp %329 : vector<8x96xf32>
    %cst_79 = arith.constant 1.000000e+00 : f32
    %331 = vector.broadcast %cst_79 : f32 to vector<8x96xf32>
    %332 = arith.addf %331, %330 : vector<8x96xf32>
    %333 = arith.divf %331, %332 : vector<8x96xf32>
    %334 = vector.extract_strided_slice %333 {offsets = [0, 32], sizes = [8, 32], strides = [1, 1]} : vector<8x96xf32> to vector<8x32xf32>
    %335 = arith.mulf %334, %316 : vector<8x32xf32>
    %336 = vector.extract_strided_slice %333 {offsets = [0, 0], sizes = [8, 32], strides = [1, 1]} : vector<8x96xf32> to vector<8x32xf32>
    %337 = vector.extract_strided_slice %327 {offsets = [0, 96], sizes = [8, 32], strides = [1, 1]} : vector<8x128xf32> to vector<8x32xf32>
    %338 = math.tanh %337 : vector<8x32xf32>
    %339 = arith.mulf %336, %338 : vector<8x32xf32>
    %340 = arith.addf %335, %339 : vector<8x32xf32>
    %341 = vector.extract_strided_slice %333 {offsets = [0, 64], sizes = [8, 32], strides = [1, 1]} : vector<8x96xf32> to vector<8x32xf32>
    %342 = math.tanh %340 : vector<8x32xf32>
    %343 = arith.mulf %341, %342 : vector<8x32xf32>
    %344 = arith.index_cast %323 : i32 to index
    %c0_80 = arith.constant 0 : index
    %345 = vector.load %arg11[%344, %c0_80] : memref<128x32xf32, #tpu.memory_space<vmem>>, vector<8x32xf32>
    tpu.vector_store %arg11[%344, %c0_80], %343 {strides = array<i32>} : memref<128x32xf32, #tpu.memory_space<vmem>>, vector<8x32xf32>,
    %c14_i32 = arith.constant 14 : i32
    %c8_i32_81 = arith.constant 8 : i32
    %346 = arith.muli %c14_i32, %c8_i32_81 : i32
    %347 = tpu.assume_multiple %346, 8 : i32
    %348 = arith.index_cast %347 : i32 to index
    %c0_82 = arith.constant 0 : index
    %349 = vector.load %arg12[%348, %c0_82] : memref<128x128xf32, #tpu.memory_space<vmem>>, vector<8x128xf32>
    %cst_83 = arith.constant dense<0.000000e+00> : vector<8x128xf32>
    %350 = tpu.matmul %343, %8, %cst_83 {dimension_numbers = #tpu.dot_dimension_numbers<[1], [0], [0], [1], [0, 0, 1, 1], [], []>} : vector<8x32xf32>, vector<32x128xf32>, vector<8x128xf32> -> vector<8x128xf32>
    %351 = arith.addf %349, %350 : vector<8x128xf32>
    %352 = vector.extract_strided_slice %351 {offsets = [0, 0], sizes = [8, 96], strides = [1, 1]} : vector<8x128xf32> to vector<8x96xf32>
    %353 = arith.negf %352 : vector<8x96xf32>
    %354 = math.exp %353 : vector<8x96xf32>
    %cst_84 = arith.constant 1.000000e+00 : f32
    %355 = vector.broadcast %cst_84 : f32 to vector<8x96xf32>
    %356 = arith.addf %355, %354 : vector<8x96xf32>
    %357 = arith.divf %355, %356 : vector<8x96xf32>
    %358 = vector.extract_strided_slice %357 {offsets = [0, 32], sizes = [8, 32], strides = [1, 1]} : vector<8x96xf32> to vector<8x32xf32>
    %359 = arith.mulf %358, %340 : vector<8x32xf32>
    %360 = vector.extract_strided_slice %357 {offsets = [0, 0], sizes = [8, 32], strides = [1, 1]} : vector<8x96xf32> to vector<8x32xf32>
    %361 = vector.extract_strided_slice %351 {offsets = [0, 96], sizes = [8, 32], strides = [1, 1]} : vector<8x128xf32> to vector<8x32xf32>
    %362 = math.tanh %361 : vector<8x32xf32>
    %363 = arith.mulf %360, %362 : vector<8x32xf32>
    %364 = arith.addf %359, %363 : vector<8x32xf32>
    %365 = vector.extract_strided_slice %357 {offsets = [0, 64], sizes = [8, 32], strides = [1, 1]} : vector<8x96xf32> to vector<8x32xf32>
    %366 = math.tanh %364 : vector<8x32xf32>
    %367 = arith.mulf %365, %366 : vector<8x32xf32>
    %368 = arith.index_cast %347 : i32 to index
    %c0_85 = arith.constant 0 : index
    %369 = vector.load %arg11[%368, %c0_85] : memref<128x32xf32, #tpu.memory_space<vmem>>, vector<8x32xf32>
    tpu.vector_store %arg11[%368, %c0_85], %367 {strides = array<i32>} : memref<128x32xf32, #tpu.memory_space<vmem>>, vector<8x32xf32>,
    %c15_i32 = arith.constant 15 : i32
    %c8_i32_86 = arith.constant 8 : i32
    %370 = arith.muli %c15_i32, %c8_i32_86 : i32
    %371 = tpu.assume_multiple %370, 8 : i32
    %372 = arith.index_cast %371 : i32 to index
    %c0_87 = arith.constant 0 : index
    %373 = vector.load %arg12[%372, %c0_87] : memref<128x128xf32, #tpu.memory_space<vmem>>, vector<8x128xf32>
    %cst_88 = arith.constant dense<0.000000e+00> : vector<8x128xf32>
    %374 = tpu.matmul %367, %8, %cst_88 {dimension_numbers = #tpu.dot_dimension_numbers<[1], [0], [0], [1], [0, 0, 1, 1], [], []>} : vector<8x32xf32>, vector<32x128xf32>, vector<8x128xf32> -> vector<8x128xf32>
    %375 = arith.addf %373, %374 : vector<8x128xf32>
    %376 = vector.extract_strided_slice %375 {offsets = [0, 0], sizes = [8, 96], strides = [1, 1]} : vector<8x128xf32> to vector<8x96xf32>
    %377 = arith.negf %376 : vector<8x96xf32>
    %378 = math.exp %377 : vector<8x96xf32>
    %cst_89 = arith.constant 1.000000e+00 : f32
    %379 = vector.broadcast %cst_89 : f32 to vector<8x96xf32>
    %380 = arith.addf %379, %378 : vector<8x96xf32>
    %381 = arith.divf %379, %380 : vector<8x96xf32>
    %382 = vector.extract_strided_slice %381 {offsets = [0, 32], sizes = [8, 32], strides = [1, 1]} : vector<8x96xf32> to vector<8x32xf32>
    %383 = arith.mulf %382, %364 : vector<8x32xf32>
    %384 = vector.extract_strided_slice %381 {offsets = [0, 0], sizes = [8, 32], strides = [1, 1]} : vector<8x96xf32> to vector<8x32xf32>
    %385 = vector.extract_strided_slice %375 {offsets = [0, 96], sizes = [8, 32], strides = [1, 1]} : vector<8x128xf32> to vector<8x32xf32>
    %386 = math.tanh %385 : vector<8x32xf32>
    %387 = arith.mulf %384, %386 : vector<8x32xf32>
    %388 = arith.addf %383, %387 : vector<8x32xf32>
    %389 = vector.extract_strided_slice %381 {offsets = [0, 64], sizes = [8, 32], strides = [1, 1]} : vector<8x96xf32> to vector<8x32xf32>
    %390 = math.tanh %388 : vector<8x32xf32>
    %391 = arith.mulf %389, %390 : vector<8x32xf32>
    %392 = arith.index_cast %371 : i32 to index
    %c0_90 = arith.constant 0 : index
    %393 = vector.load %arg11[%392, %c0_90] : memref<128x32xf32, #tpu.memory_space<vmem>>, vector<8x32xf32>
    tpu.vector_store %arg11[%392, %c0_90], %391 {strides = array<i32>} : memref<128x32xf32, #tpu.memory_space<vmem>>, vector<8x32xf32>,
    %c16_i32 = arith.constant 16 : i32
    %c0_91 = arith.constant 0 : index
    %c0_92 = arith.constant 0 : index
    %394 = vector.load %arg11[%c0_91, %c0_92] : memref<128x32xf32, #tpu.memory_space<vmem>>, vector<128x32xf32>
    %c0_93 = arith.constant 0 : index
    %c0_94 = arith.constant 0 : index
    %c0_95 = arith.constant 0 : index
    %395 = vector.load %arg5[%c0_93, %c0_94, %c0_95] : memref<2x32x128xf32, #tpu.memory_space<vmem>>, vector<1x32x128xf32>
    %396 = vector.shape_cast %395 : vector<1x32x128xf32> to vector<32x128xf32>
    %cst_96 = arith.constant dense<0.000000e+00> : vector<128x128xf32>
    %397 = tpu.matmul %394, %396, %cst_96 {dimension_numbers = #tpu.dot_dimension_numbers<[1], [0], [0], [1], [0, 0, 1, 1], [], []>} : vector<128x32xf32>, vector<32x128xf32>, vector<128x128xf32> -> vector<128x128xf32>
    %c0_97 = arith.constant 0 : index
    %c0_98 = arith.constant 0 : index
    %c0_99 = arith.constant 0 : index
    %398 = vector.load %arg7[%c0_97, %c0_98, %c0_99] : memref<2x1x128xf32, #tpu.memory_space<vmem>>, vector<1x1x128xf32>
    %399 = vector.shape_cast %398 : vector<1x1x128xf32> to vector<1x128xf32>
    %400 = vector.broadcast %399 : vector<1x128xf32> to vector<128x128xf32>
    %401 = arith.addf %397, %400 : vector<128x128xf32>
    %c0_100 = arith.constant 0 : index
    %c0_101 = arith.constant 0 : index
    %402 = vector.load %arg12[%c0_100, %c0_101] : memref<128x128xf32, #tpu.memory_space<vmem>>, vector<128x128xf32>
    tpu.vector_store %arg12[%c0_100, %c0_101], %401 {strides = array<i32>} : memref<128x128xf32, #tpu.memory_space<vmem>>, vector<128x128xf32>,
    %c0_102 = arith.constant 0 : index
    %c0_103 = arith.constant 0 : index
    %c0_104 = arith.constant 0 : index
    %403 = vector.load %arg6[%c0_102, %c0_103, %c0_104] : memref<2x32x128xf32, #tpu.memory_space<vmem>>, vector<1x32x128xf32>
    %404 = vector.shape_cast %403 : vector<1x32x128xf32> to vector<32x128xf32>
    %cst_105 = arith.constant 0.000000e+00 : f32
    %405 = vector.broadcast %cst_105 : f32 to vector<8x32xf32>
    %c0_i32_106 = arith.constant 0 : i32
    %c8_i32_107 = arith.constant 8 : i32
    %406 = arith.muli %c0_i32_106, %c8_i32_107 : i32
    %407 = tpu.assume_multiple %406, 8 : i32
    %408 = arith.index_cast %407 : i32 to index
    %c0_108 = arith.constant 0 : index
    %409 = vector.load %arg12[%408, %c0_108] : memref<128x128xf32, #tpu.memory_space<vmem>>, vector<8x128xf32>
    %cst_109 = arith.constant dense<0.000000e+00> : vector<8x128xf32>
    %410 = tpu.matmul %405, %404, %cst_109 {dimension_numbers = #tpu.dot_dimension_numbers<[1], [0], [0], [1], [0, 0, 1, 1], [], []>} : vector<8x32xf32>, vector<32x128xf32>, vector<8x128xf32> -> vector<8x128xf32>
    %411 = arith.addf %409, %410 : vector<8x128xf32>
    %412 = vector.extract_strided_slice %411 {offsets = [0, 0], sizes = [8, 96], strides = [1, 1]} : vector<8x128xf32> to vector<8x96xf32>
    %413 = arith.negf %412 : vector<8x96xf32>
    %414 = math.exp %413 : vector<8x96xf32>
    %cst_110 = arith.constant 1.000000e+00 : f32
    %415 = vector.broadcast %cst_110 : f32 to vector<8x96xf32>
    %416 = arith.addf %415, %414 : vector<8x96xf32>
    %417 = arith.divf %415, %416 : vector<8x96xf32>
    %418 = vector.extract_strided_slice %417 {offsets = [0, 32], sizes = [8, 32], strides = [1, 1]} : vector<8x96xf32> to vector<8x32xf32>
    %419 = arith.mulf %418, %405 : vector<8x32xf32>
    %420 = vector.extract_strided_slice %417 {offsets = [0, 0], sizes = [8, 32], strides = [1, 1]} : vector<8x96xf32> to vector<8x32xf32>
    %421 = vector.extract_strided_slice %411 {offsets = [0, 96], sizes = [8, 32], strides = [1, 1]} : vector<8x128xf32> to vector<8x32xf32>
    %422 = math.tanh %421 : vector<8x32xf32>
    %423 = arith.mulf %420, %422 : vector<8x32xf32>
    %424 = arith.addf %419, %423 : vector<8x32xf32>
    %425 = vector.extract_strided_slice %417 {offsets = [0, 64], sizes = [8, 32], strides = [1, 1]} : vector<8x96xf32> to vector<8x32xf32>
    %426 = math.tanh %424 : vector<8x32xf32>
    %427 = arith.mulf %425, %426 : vector<8x32xf32>
    %428 = arith.index_cast %407 : i32 to index
    %c0_111 = arith.constant 0 : index
    %429 = vector.load %arg11[%428, %c0_111] : memref<128x32xf32, #tpu.memory_space<vmem>>, vector<8x32xf32>
    tpu.vector_store %arg11[%428, %c0_111], %427 {strides = array<i32>} : memref<128x32xf32, #tpu.memory_space<vmem>>, vector<8x32xf32>,
    %c1_i32_112 = arith.constant 1 : i32
    %c8_i32_113 = arith.constant 8 : i32
    %430 = arith.muli %c1_i32_112, %c8_i32_113 : i32
    %431 = tpu.assume_multiple %430, 8 : i32
    %432 = arith.index_cast %431 : i32 to index
    %c0_114 = arith.constant 0 : index
    %433 = vector.load %arg12[%432, %c0_114] : memref<128x128xf32, #tpu.memory_space<vmem>>, vector<8x128xf32>
    %cst_115 = arith.constant dense<0.000000e+00> : vector<8x128xf32>
    %434 = tpu.matmul %427, %404, %cst_115 {dimension_numbers = #tpu.dot_dimension_numbers<[1], [0], [0], [1], [0, 0, 1, 1], [], []>} : vector<8x32xf32>, vector<32x128xf32>, vector<8x128xf32> -> vector<8x128xf32>
    %435 = arith.addf %433, %434 : vector<8x128xf32>
    %436 = vector.extract_strided_slice %435 {offsets = [0, 0], sizes = [8, 96], strides = [1, 1]} : vector<8x128xf32> to vector<8x96xf32>
    %437 = arith.negf %436 : vector<8x96xf32>
    %438 = math.exp %437 : vector<8x96xf32>
    %cst_116 = arith.constant 1.000000e+00 : f32
    %439 = vector.broadcast %cst_116 : f32 to vector<8x96xf32>
    %440 = arith.addf %439, %438 : vector<8x96xf32>
    %441 = arith.divf %439, %440 : vector<8x96xf32>
    %442 = vector.extract_strided_slice %441 {offsets = [0, 32], sizes = [8, 32], strides = [1, 1]} : vector<8x96xf32> to vector<8x32xf32>
    %443 = arith.mulf %442, %424 : vector<8x32xf32>
    %444 = vector.extract_strided_slice %441 {offsets = [0, 0], sizes = [8, 32], strides = [1, 1]} : vector<8x96xf32> to vector<8x32xf32>
    %445 = vector.extract_strided_slice %435 {offsets = [0, 96], sizes = [8, 32], strides = [1, 1]} : vector<8x128xf32> to vector<8x32xf32>
    %446 = math.tanh %445 : vector<8x32xf32>
    %447 = arith.mulf %444, %446 : vector<8x32xf32>
    %448 = arith.addf %443, %447 : vector<8x32xf32>
    %449 = vector.extract_strided_slice %441 {offsets = [0, 64], sizes = [8, 32], strides = [1, 1]} : vector<8x96xf32> to vector<8x32xf32>
    %450 = math.tanh %448 : vector<8x32xf32>
    %451 = arith.mulf %449, %450 : vector<8x32xf32>
    %452 = arith.index_cast %431 : i32 to index
    %c0_117 = arith.constant 0 : index
    %453 = vector.load %arg11[%452, %c0_117] : memref<128x32xf32, #tpu.memory_space<vmem>>, vector<8x32xf32>
    tpu.vector_store %arg11[%452, %c0_117], %451 {strides = array<i32>} : memref<128x32xf32, #tpu.memory_space<vmem>>, vector<8x32xf32>,
    %c2_i32_118 = arith.constant 2 : i32
    %c8_i32_119 = arith.constant 8 : i32
    %454 = arith.muli %c2_i32_118, %c8_i32_119 : i32
    %455 = tpu.assume_multiple %454, 8 : i32
    %456 = arith.index_cast %455 : i32 to index
    %c0_120 = arith.constant 0 : index
    %457 = vector.load %arg12[%456, %c0_120] : memref<128x128xf32, #tpu.memory_space<vmem>>, vector<8x128xf32>
    %cst_121 = arith.constant dense<0.000000e+00> : vector<8x128xf32>
    %458 = tpu.matmul %451, %404, %cst_121 {dimension_numbers = #tpu.dot_dimension_numbers<[1], [0], [0], [1], [0, 0, 1, 1], [], []>} : vector<8x32xf32>, vector<32x128xf32>, vector<8x128xf32> -> vector<8x128xf32>
    %459 = arith.addf %457, %458 : vector<8x128xf32>
    %460 = vector.extract_strided_slice %459 {offsets = [0, 0], sizes = [8, 96], strides = [1, 1]} : vector<8x128xf32> to vector<8x96xf32>
    %461 = arith.negf %460 : vector<8x96xf32>
    %462 = math.exp %461 : vector<8x96xf32>
    %cst_122 = arith.constant 1.000000e+00 : f32
    %463 = vector.broadcast %cst_122 : f32 to vector<8x96xf32>
    %464 = arith.addf %463, %462 : vector<8x96xf32>
    %465 = arith.divf %463, %464 : vector<8x96xf32>
    %466 = vector.extract_strided_slice %465 {offsets = [0, 32], sizes = [8, 32], strides = [1, 1]} : vector<8x96xf32> to vector<8x32xf32>
    %467 = arith.mulf %466, %448 : vector<8x32xf32>
    %468 = vector.extract_strided_slice %465 {offsets = [0, 0], sizes = [8, 32], strides = [1, 1]} : vector<8x96xf32> to vector<8x32xf32>
    %469 = vector.extract_strided_slice %459 {offsets = [0, 96], sizes = [8, 32], strides = [1, 1]} : vector<8x128xf32> to vector<8x32xf32>
    %470 = math.tanh %469 : vector<8x32xf32>
    %471 = arith.mulf %468, %470 : vector<8x32xf32>
    %472 = arith.addf %467, %471 : vector<8x32xf32>
    %473 = vector.extract_strided_slice %465 {offsets = [0, 64], sizes = [8, 32], strides = [1, 1]} : vector<8x96xf32> to vector<8x32xf32>
    %474 = math.tanh %472 : vector<8x32xf32>
    %475 = arith.mulf %473, %474 : vector<8x32xf32>
    %476 = arith.index_cast %455 : i32 to index
    %c0_123 = arith.constant 0 : index
    %477 = vector.load %arg11[%476, %c0_123] : memref<128x32xf32, #tpu.memory_space<vmem>>, vector<8x32xf32>
    tpu.vector_store %arg11[%476, %c0_123], %475 {strides = array<i32>} : memref<128x32xf32, #tpu.memory_space<vmem>>, vector<8x32xf32>,
    %c3_i32_124 = arith.constant 3 : i32
    %c8_i32_125 = arith.constant 8 : i32
    %478 = arith.muli %c3_i32_124, %c8_i32_125 : i32
    %479 = tpu.assume_multiple %478, 8 : i32
    %480 = arith.index_cast %479 : i32 to index
    %c0_126 = arith.constant 0 : index
    %481 = vector.load %arg12[%480, %c0_126] : memref<128x128xf32, #tpu.memory_space<vmem>>, vector<8x128xf32>
    %cst_127 = arith.constant dense<0.000000e+00> : vector<8x128xf32>
    %482 = tpu.matmul %475, %404, %cst_127 {dimension_numbers = #tpu.dot_dimension_numbers<[1], [0], [0], [1], [0, 0, 1, 1], [], []>} : vector<8x32xf32>, vector<32x128xf32>, vector<8x128xf32> -> vector<8x128xf32>
    %483 = arith.addf %481, %482 : vector<8x128xf32>
    %484 = vector.extract_strided_slice %483 {offsets = [0, 0], sizes = [8, 96], strides = [1, 1]} : vector<8x128xf32> to vector<8x96xf32>
    %485 = arith.negf %484 : vector<8x96xf32>
    %486 = math.exp %485 : vector<8x96xf32>
    %cst_128 = arith.constant 1.000000e+00 : f32
    %487 = vector.broadcast %cst_128 : f32 to vector<8x96xf32>
    %488 = arith.addf %487, %486 : vector<8x96xf32>
    %489 = arith.divf %487, %488 : vector<8x96xf32>
    %490 = vector.extract_strided_slice %489 {offsets = [0, 32], sizes = [8, 32], strides = [1, 1]} : vector<8x96xf32> to vector<8x32xf32>
    %491 = arith.mulf %490, %472 : vector<8x32xf32>
    %492 = vector.extract_strided_slice %489 {offsets = [0, 0], sizes = [8, 32], strides = [1, 1]} : vector<8x96xf32> to vector<8x32xf32>
    %493 = vector.extract_strided_slice %483 {offsets = [0, 96], sizes = [8, 32], strides = [1, 1]} : vector<8x128xf32> to vector<8x32xf32>
    %494 = math.tanh %493 : vector<8x32xf32>
    %495 = arith.mulf %492, %494 : vector<8x32xf32>
    %496 = arith.addf %491, %495 : vector<8x32xf32>
    %497 = vector.extract_strided_slice %489 {offsets = [0, 64], sizes = [8, 32], strides = [1, 1]} : vector<8x96xf32> to vector<8x32xf32>
    %498 = math.tanh %496 : vector<8x32xf32>
    %499 = arith.mulf %497, %498 : vector<8x32xf32>
    %500 = arith.index_cast %479 : i32 to index
    %c0_129 = arith.constant 0 : index
    %501 = vector.load %arg11[%500, %c0_129] : memref<128x32xf32, #tpu.memory_space<vmem>>, vector<8x32xf32>
    tpu.vector_store %arg11[%500, %c0_129], %499 {strides = array<i32>} : memref<128x32xf32, #tpu.memory_space<vmem>>, vector<8x32xf32>,
    %c4_i32_130 = arith.constant 4 : i32
    %c8_i32_131 = arith.constant 8 : i32
    %502 = arith.muli %c4_i32_130, %c8_i32_131 : i32
    %503 = tpu.assume_multiple %502, 8 : i32
    %504 = arith.index_cast %503 : i32 to index
    %c0_132 = arith.constant 0 : index
    %505 = vector.load %arg12[%504, %c0_132] : memref<128x128xf32, #tpu.memory_space<vmem>>, vector<8x128xf32>
    %cst_133 = arith.constant dense<0.000000e+00> : vector<8x128xf32>
    %506 = tpu.matmul %499, %404, %cst_133 {dimension_numbers = #tpu.dot_dimension_numbers<[1], [0], [0], [1], [0, 0, 1, 1], [], []>} : vector<8x32xf32>, vector<32x128xf32>, vector<8x128xf32> -> vector<8x128xf32>
    %507 = arith.addf %505, %506 : vector<8x128xf32>
    %508 = vector.extract_strided_slice %507 {offsets = [0, 0], sizes = [8, 96], strides = [1, 1]} : vector<8x128xf32> to vector<8x96xf32>
    %509 = arith.negf %508 : vector<8x96xf32>
    %510 = math.exp %509 : vector<8x96xf32>
    %cst_134 = arith.constant 1.000000e+00 : f32
    %511 = vector.broadcast %cst_134 : f32 to vector<8x96xf32>
    %512 = arith.addf %511, %510 : vector<8x96xf32>
    %513 = arith.divf %511, %512 : vector<8x96xf32>
    %514 = vector.extract_strided_slice %513 {offsets = [0, 32], sizes = [8, 32], strides = [1, 1]} : vector<8x96xf32> to vector<8x32xf32>
    %515 = arith.mulf %514, %496 : vector<8x32xf32>
    %516 = vector.extract_strided_slice %513 {offsets = [0, 0], sizes = [8, 32], strides = [1, 1]} : vector<8x96xf32> to vector<8x32xf32>
    %517 = vector.extract_strided_slice %507 {offsets = [0, 96], sizes = [8, 32], strides = [1, 1]} : vector<8x128xf32> to vector<8x32xf32>
    %518 = math.tanh %517 : vector<8x32xf32>
    %519 = arith.mulf %516, %518 : vector<8x32xf32>
    %520 = arith.addf %515, %519 : vector<8x32xf32>
    %521 = vector.extract_strided_slice %513 {offsets = [0, 64], sizes = [8, 32], strides = [1, 1]} : vector<8x96xf32> to vector<8x32xf32>
    %522 = math.tanh %520 : vector<8x32xf32>
    %523 = arith.mulf %521, %522 : vector<8x32xf32>
    %524 = arith.index_cast %503 : i32 to index
    %c0_135 = arith.constant 0 : index
    %525 = vector.load %arg11[%524, %c0_135] : memref<128x32xf32, #tpu.memory_space<vmem>>, vector<8x32xf32>
    tpu.vector_store %arg11[%524, %c0_135], %523 {strides = array<i32>} : memref<128x32xf32, #tpu.memory_space<vmem>>, vector<8x32xf32>,
    %c5_i32_136 = arith.constant 5 : i32
    %c8_i32_137 = arith.constant 8 : i32
    %526 = arith.muli %c5_i32_136, %c8_i32_137 : i32
    %527 = tpu.assume_multiple %526, 8 : i32
    %528 = arith.index_cast %527 : i32 to index
    %c0_138 = arith.constant 0 : index
    %529 = vector.load %arg12[%528, %c0_138] : memref<128x128xf32, #tpu.memory_space<vmem>>, vector<8x128xf32>
    %cst_139 = arith.constant dense<0.000000e+00> : vector<8x128xf32>
    %530 = tpu.matmul %523, %404, %cst_139 {dimension_numbers = #tpu.dot_dimension_numbers<[1], [0], [0], [1], [0, 0, 1, 1], [], []>} : vector<8x32xf32>, vector<32x128xf32>, vector<8x128xf32> -> vector<8x128xf32>
    %531 = arith.addf %529, %530 : vector<8x128xf32>
    %532 = vector.extract_strided_slice %531 {offsets = [0, 0], sizes = [8, 96], strides = [1, 1]} : vector<8x128xf32> to vector<8x96xf32>
    %533 = arith.negf %532 : vector<8x96xf32>
    %534 = math.exp %533 : vector<8x96xf32>
    %cst_140 = arith.constant 1.000000e+00 : f32
    %535 = vector.broadcast %cst_140 : f32 to vector<8x96xf32>
    %536 = arith.addf %535, %534 : vector<8x96xf32>
    %537 = arith.divf %535, %536 : vector<8x96xf32>
    %538 = vector.extract_strided_slice %537 {offsets = [0, 32], sizes = [8, 32], strides = [1, 1]} : vector<8x96xf32> to vector<8x32xf32>
    %539 = arith.mulf %538, %520 : vector<8x32xf32>
    %540 = vector.extract_strided_slice %537 {offsets = [0, 0], sizes = [8, 32], strides = [1, 1]} : vector<8x96xf32> to vector<8x32xf32>
    %541 = vector.extract_strided_slice %531 {offsets = [0, 96], sizes = [8, 32], strides = [1, 1]} : vector<8x128xf32> to vector<8x32xf32>
    %542 = math.tanh %541 : vector<8x32xf32>
    %543 = arith.mulf %540, %542 : vector<8x32xf32>
    %544 = arith.addf %539, %543 : vector<8x32xf32>
    %545 = vector.extract_strided_slice %537 {offsets = [0, 64], sizes = [8, 32], strides = [1, 1]} : vector<8x96xf32> to vector<8x32xf32>
    %546 = math.tanh %544 : vector<8x32xf32>
    %547 = arith.mulf %545, %546 : vector<8x32xf32>
    %548 = arith.index_cast %527 : i32 to index
    %c0_141 = arith.constant 0 : index
    %549 = vector.load %arg11[%548, %c0_141] : memref<128x32xf32, #tpu.memory_space<vmem>>, vector<8x32xf32>
    tpu.vector_store %arg11[%548, %c0_141], %547 {strides = array<i32>} : memref<128x32xf32, #tpu.memory_space<vmem>>, vector<8x32xf32>,
    %c6_i32_142 = arith.constant 6 : i32
    %c8_i32_143 = arith.constant 8 : i32
    %550 = arith.muli %c6_i32_142, %c8_i32_143 : i32
    %551 = tpu.assume_multiple %550, 8 : i32
    %552 = arith.index_cast %551 : i32 to index
    %c0_144 = arith.constant 0 : index
    %553 = vector.load %arg12[%552, %c0_144] : memref<128x128xf32, #tpu.memory_space<vmem>>, vector<8x128xf32>
    %cst_145 = arith.constant dense<0.000000e+00> : vector<8x128xf32>
    %554 = tpu.matmul %547, %404, %cst_145 {dimension_numbers = #tpu.dot_dimension_numbers<[1], [0], [0], [1], [0, 0, 1, 1], [], []>} : vector<8x32xf32>, vector<32x128xf32>, vector<8x128xf32> -> vector<8x128xf32>
    %555 = arith.addf %553, %554 : vector<8x128xf32>
    %556 = vector.extract_strided_slice %555 {offsets = [0, 0], sizes = [8, 96], strides = [1, 1]} : vector<8x128xf32> to vector<8x96xf32>
    %557 = arith.negf %556 : vector<8x96xf32>
    %558 = math.exp %557 : vector<8x96xf32>
    %cst_146 = arith.constant 1.000000e+00 : f32
    %559 = vector.broadcast %cst_146 : f32 to vector<8x96xf32>
    %560 = arith.addf %559, %558 : vector<8x96xf32>
    %561 = arith.divf %559, %560 : vector<8x96xf32>
    %562 = vector.extract_strided_slice %561 {offsets = [0, 32], sizes = [8, 32], strides = [1, 1]} : vector<8x96xf32> to vector<8x32xf32>
    %563 = arith.mulf %562, %544 : vector<8x32xf32>
    %564 = vector.extract_strided_slice %561 {offsets = [0, 0], sizes = [8, 32], strides = [1, 1]} : vector<8x96xf32> to vector<8x32xf32>
    %565 = vector.extract_strided_slice %555 {offsets = [0, 96], sizes = [8, 32], strides = [1, 1]} : vector<8x128xf32> to vector<8x32xf32>
    %566 = math.tanh %565 : vector<8x32xf32>
    %567 = arith.mulf %564, %566 : vector<8x32xf32>
    %568 = arith.addf %563, %567 : vector<8x32xf32>
    %569 = vector.extract_strided_slice %561 {offsets = [0, 64], sizes = [8, 32], strides = [1, 1]} : vector<8x96xf32> to vector<8x32xf32>
    %570 = math.tanh %568 : vector<8x32xf32>
    %571 = arith.mulf %569, %570 : vector<8x32xf32>
    %572 = arith.index_cast %551 : i32 to index
    %c0_147 = arith.constant 0 : index
    %573 = vector.load %arg11[%572, %c0_147] : memref<128x32xf32, #tpu.memory_space<vmem>>, vector<8x32xf32>
    tpu.vector_store %arg11[%572, %c0_147], %571 {strides = array<i32>} : memref<128x32xf32, #tpu.memory_space<vmem>>, vector<8x32xf32>,
    %c7_i32_148 = arith.constant 7 : i32
    %c8_i32_149 = arith.constant 8 : i32
    %574 = arith.muli %c7_i32_148, %c8_i32_149 : i32
    %575 = tpu.assume_multiple %574, 8 : i32
    %576 = arith.index_cast %575 : i32 to index
    %c0_150 = arith.constant 0 : index
    %577 = vector.load %arg12[%576, %c0_150] : memref<128x128xf32, #tpu.memory_space<vmem>>, vector<8x128xf32>
    %cst_151 = arith.constant dense<0.000000e+00> : vector<8x128xf32>
    %578 = tpu.matmul %571, %404, %cst_151 {dimension_numbers = #tpu.dot_dimension_numbers<[1], [0], [0], [1], [0, 0, 1, 1], [], []>} : vector<8x32xf32>, vector<32x128xf32>, vector<8x128xf32> -> vector<8x128xf32>
    %579 = arith.addf %577, %578 : vector<8x128xf32>
    %580 = vector.extract_strided_slice %579 {offsets = [0, 0], sizes = [8, 96], strides = [1, 1]} : vector<8x128xf32> to vector<8x96xf32>
    %581 = arith.negf %580 : vector<8x96xf32>
    %582 = math.exp %581 : vector<8x96xf32>
    %cst_152 = arith.constant 1.000000e+00 : f32
    %583 = vector.broadcast %cst_152 : f32 to vector<8x96xf32>
    %584 = arith.addf %583, %582 : vector<8x96xf32>
    %585 = arith.divf %583, %584 : vector<8x96xf32>
    %586 = vector.extract_strided_slice %585 {offsets = [0, 32], sizes = [8, 32], strides = [1, 1]} : vector<8x96xf32> to vector<8x32xf32>
    %587 = arith.mulf %586, %568 : vector<8x32xf32>
    %588 = vector.extract_strided_slice %585 {offsets = [0, 0], sizes = [8, 32], strides = [1, 1]} : vector<8x96xf32> to vector<8x32xf32>
    %589 = vector.extract_strided_slice %579 {offsets = [0, 96], sizes = [8, 32], strides = [1, 1]} : vector<8x128xf32> to vector<8x32xf32>
    %590 = math.tanh %589 : vector<8x32xf32>
    %591 = arith.mulf %588, %590 : vector<8x32xf32>
    %592 = arith.addf %587, %591 : vector<8x32xf32>
    %593 = vector.extract_strided_slice %585 {offsets = [0, 64], sizes = [8, 32], strides = [1, 1]} : vector<8x96xf32> to vector<8x32xf32>
    %594 = math.tanh %592 : vector<8x32xf32>
    %595 = arith.mulf %593, %594 : vector<8x32xf32>
    %596 = arith.index_cast %575 : i32 to index
    %c0_153 = arith.constant 0 : index
    %597 = vector.load %arg11[%596, %c0_153] : memref<128x32xf32, #tpu.memory_space<vmem>>, vector<8x32xf32>
    tpu.vector_store %arg11[%596, %c0_153], %595 {strides = array<i32>} : memref<128x32xf32, #tpu.memory_space<vmem>>, vector<8x32xf32>,
    %c8_i32_154 = arith.constant 8 : i32
    %c8_i32_155 = arith.constant 8 : i32
    %598 = arith.muli %c8_i32_154, %c8_i32_155 : i32
    %599 = tpu.assume_multiple %598, 8 : i32
    %600 = arith.index_cast %599 : i32 to index
    %c0_156 = arith.constant 0 : index
    %601 = vector.load %arg12[%600, %c0_156] : memref<128x128xf32, #tpu.memory_space<vmem>>, vector<8x128xf32>
    %cst_157 = arith.constant dense<0.000000e+00> : vector<8x128xf32>
    %602 = tpu.matmul %595, %404, %cst_157 {dimension_numbers = #tpu.dot_dimension_numbers<[1], [0], [0], [1], [0, 0, 1, 1], [], []>} : vector<8x32xf32>, vector<32x128xf32>, vector<8x128xf32> -> vector<8x128xf32>
    %603 = arith.addf %601, %602 : vector<8x128xf32>
    %604 = vector.extract_strided_slice %603 {offsets = [0, 0], sizes = [8, 96], strides = [1, 1]} : vector<8x128xf32> to vector<8x96xf32>
    %605 = arith.negf %604 : vector<8x96xf32>
    %606 = math.exp %605 : vector<8x96xf32>
    %cst_158 = arith.constant 1.000000e+00 : f32
    %607 = vector.broadcast %cst_158 : f32 to vector<8x96xf32>
    %608 = arith.addf %607, %606 : vector<8x96xf32>
    %609 = arith.divf %607, %608 : vector<8x96xf32>
    %610 = vector.extract_strided_slice %609 {offsets = [0, 32], sizes = [8, 32], strides = [1, 1]} : vector<8x96xf32> to vector<8x32xf32>
    %611 = arith.mulf %610, %592 : vector<8x32xf32>
    %612 = vector.extract_strided_slice %609 {offsets = [0, 0], sizes = [8, 32], strides = [1, 1]} : vector<8x96xf32> to vector<8x32xf32>
    %613 = vector.extract_strided_slice %603 {offsets = [0, 96], sizes = [8, 32], strides = [1, 1]} : vector<8x128xf32> to vector<8x32xf32>
    %614 = math.tanh %613 : vector<8x32xf32>
    %615 = arith.mulf %612, %614 : vector<8x32xf32>
    %616 = arith.addf %611, %615 : vector<8x32xf32>
    %617 = vector.extract_strided_slice %609 {offsets = [0, 64], sizes = [8, 32], strides = [1, 1]} : vector<8x96xf32> to vector<8x32xf32>
    %618 = math.tanh %616 : vector<8x32xf32>
    %619 = arith.mulf %617, %618 : vector<8x32xf32>
    %620 = arith.index_cast %599 : i32 to index
    %c0_159 = arith.constant 0 : index
    %621 = vector.load %arg11[%620, %c0_159] : memref<128x32xf32, #tpu.memory_space<vmem>>, vector<8x32xf32>
    tpu.vector_store %arg11[%620, %c0_159], %619 {strides = array<i32>} : memref<128x32xf32, #tpu.memory_space<vmem>>, vector<8x32xf32>,
    %c9_i32_160 = arith.constant 9 : i32
    %c8_i32_161 = arith.constant 8 : i32
    %622 = arith.muli %c9_i32_160, %c8_i32_161 : i32
    %623 = tpu.assume_multiple %622, 8 : i32
    %624 = arith.index_cast %623 : i32 to index
    %c0_162 = arith.constant 0 : index
    %625 = vector.load %arg12[%624, %c0_162] : memref<128x128xf32, #tpu.memory_space<vmem>>, vector<8x128xf32>
    %cst_163 = arith.constant dense<0.000000e+00> : vector<8x128xf32>
    %626 = tpu.matmul %619, %404, %cst_163 {dimension_numbers = #tpu.dot_dimension_numbers<[1], [0], [0], [1], [0, 0, 1, 1], [], []>} : vector<8x32xf32>, vector<32x128xf32>, vector<8x128xf32> -> vector<8x128xf32>
    %627 = arith.addf %625, %626 : vector<8x128xf32>
    %628 = vector.extract_strided_slice %627 {offsets = [0, 0], sizes = [8, 96], strides = [1, 1]} : vector<8x128xf32> to vector<8x96xf32>
    %629 = arith.negf %628 : vector<8x96xf32>
    %630 = math.exp %629 : vector<8x96xf32>
    %cst_164 = arith.constant 1.000000e+00 : f32
    %631 = vector.broadcast %cst_164 : f32 to vector<8x96xf32>
    %632 = arith.addf %631, %630 : vector<8x96xf32>
    %633 = arith.divf %631, %632 : vector<8x96xf32>
    %634 = vector.extract_strided_slice %633 {offsets = [0, 32], sizes = [8, 32], strides = [1, 1]} : vector<8x96xf32> to vector<8x32xf32>
    %635 = arith.mulf %634, %616 : vector<8x32xf32>
    %636 = vector.extract_strided_slice %633 {offsets = [0, 0], sizes = [8, 32], strides = [1, 1]} : vector<8x96xf32> to vector<8x32xf32>
    %637 = vector.extract_strided_slice %627 {offsets = [0, 96], sizes = [8, 32], strides = [1, 1]} : vector<8x128xf32> to vector<8x32xf32>
    %638 = math.tanh %637 : vector<8x32xf32>
    %639 = arith.mulf %636, %638 : vector<8x32xf32>
    %640 = arith.addf %635, %639 : vector<8x32xf32>
    %641 = vector.extract_strided_slice %633 {offsets = [0, 64], sizes = [8, 32], strides = [1, 1]} : vector<8x96xf32> to vector<8x32xf32>
    %642 = math.tanh %640 : vector<8x32xf32>
    %643 = arith.mulf %641, %642 : vector<8x32xf32>
    %644 = arith.index_cast %623 : i32 to index
    %c0_165 = arith.constant 0 : index
    %645 = vector.load %arg11[%644, %c0_165] : memref<128x32xf32, #tpu.memory_space<vmem>>, vector<8x32xf32>
    tpu.vector_store %arg11[%644, %c0_165], %643 {strides = array<i32>} : memref<128x32xf32, #tpu.memory_space<vmem>>, vector<8x32xf32>,
    %c10_i32_166 = arith.constant 10 : i32
    %c8_i32_167 = arith.constant 8 : i32
    %646 = arith.muli %c10_i32_166, %c8_i32_167 : i32
    %647 = tpu.assume_multiple %646, 8 : i32
    %648 = arith.index_cast %647 : i32 to index
    %c0_168 = arith.constant 0 : index
    %649 = vector.load %arg12[%648, %c0_168] : memref<128x128xf32, #tpu.memory_space<vmem>>, vector<8x128xf32>
    %cst_169 = arith.constant dense<0.000000e+00> : vector<8x128xf32>
    %650 = tpu.matmul %643, %404, %cst_169 {dimension_numbers = #tpu.dot_dimension_numbers<[1], [0], [0], [1], [0, 0, 1, 1], [], []>} : vector<8x32xf32>, vector<32x128xf32>, vector<8x128xf32> -> vector<8x128xf32>
    %651 = arith.addf %649, %650 : vector<8x128xf32>
    %652 = vector.extract_strided_slice %651 {offsets = [0, 0], sizes = [8, 96], strides = [1, 1]} : vector<8x128xf32> to vector<8x96xf32>
    %653 = arith.negf %652 : vector<8x96xf32>
    %654 = math.exp %653 : vector<8x96xf32>
    %cst_170 = arith.constant 1.000000e+00 : f32
    %655 = vector.broadcast %cst_170 : f32 to vector<8x96xf32>
    %656 = arith.addf %655, %654 : vector<8x96xf32>
    %657 = arith.divf %655, %656 : vector<8x96xf32>
    %658 = vector.extract_strided_slice %657 {offsets = [0, 32], sizes = [8, 32], strides = [1, 1]} : vector<8x96xf32> to vector<8x32xf32>
    %659 = arith.mulf %658, %640 : vector<8x32xf32>
    %660 = vector.extract_strided_slice %657 {offsets = [0, 0], sizes = [8, 32], strides = [1, 1]} : vector<8x96xf32> to vector<8x32xf32>
    %661 = vector.extract_strided_slice %651 {offsets = [0, 96], sizes = [8, 32], strides = [1, 1]} : vector<8x128xf32> to vector<8x32xf32>
    %662 = math.tanh %661 : vector<8x32xf32>
    %663 = arith.mulf %660, %662 : vector<8x32xf32>
    %664 = arith.addf %659, %663 : vector<8x32xf32>
    %665 = vector.extract_strided_slice %657 {offsets = [0, 64], sizes = [8, 32], strides = [1, 1]} : vector<8x96xf32> to vector<8x32xf32>
    %666 = math.tanh %664 : vector<8x32xf32>
    %667 = arith.mulf %665, %666 : vector<8x32xf32>
    %668 = arith.index_cast %647 : i32 to index
    %c0_171 = arith.constant 0 : index
    %669 = vector.load %arg11[%668, %c0_171] : memref<128x32xf32, #tpu.memory_space<vmem>>, vector<8x32xf32>
    tpu.vector_store %arg11[%668, %c0_171], %667 {strides = array<i32>} : memref<128x32xf32, #tpu.memory_space<vmem>>, vector<8x32xf32>,
    %c11_i32_172 = arith.constant 11 : i32
    %c8_i32_173 = arith.constant 8 : i32
    %670 = arith.muli %c11_i32_172, %c8_i32_173 : i32
    %671 = tpu.assume_multiple %670, 8 : i32
    %672 = arith.index_cast %671 : i32 to index
    %c0_174 = arith.constant 0 : index
    %673 = vector.load %arg12[%672, %c0_174] : memref<128x128xf32, #tpu.memory_space<vmem>>, vector<8x128xf32>
    %cst_175 = arith.constant dense<0.000000e+00> : vector<8x128xf32>
    %674 = tpu.matmul %667, %404, %cst_175 {dimension_numbers = #tpu.dot_dimension_numbers<[1], [0], [0], [1], [0, 0, 1, 1], [], []>} : vector<8x32xf32>, vector<32x128xf32>, vector<8x128xf32> -> vector<8x128xf32>
    %675 = arith.addf %673, %674 : vector<8x128xf32>
    %676 = vector.extract_strided_slice %675 {offsets = [0, 0], sizes = [8, 96], strides = [1, 1]} : vector<8x128xf32> to vector<8x96xf32>
    %677 = arith.negf %676 : vector<8x96xf32>
    %678 = math.exp %677 : vector<8x96xf32>
    %cst_176 = arith.constant 1.000000e+00 : f32
    %679 = vector.broadcast %cst_176 : f32 to vector<8x96xf32>
    %680 = arith.addf %679, %678 : vector<8x96xf32>
    %681 = arith.divf %679, %680 : vector<8x96xf32>
    %682 = vector.extract_strided_slice %681 {offsets = [0, 32], sizes = [8, 32], strides = [1, 1]} : vector<8x96xf32> to vector<8x32xf32>
    %683 = arith.mulf %682, %664 : vector<8x32xf32>
    %684 = vector.extract_strided_slice %681 {offsets = [0, 0], sizes = [8, 32], strides = [1, 1]} : vector<8x96xf32> to vector<8x32xf32>
    %685 = vector.extract_strided_slice %675 {offsets = [0, 96], sizes = [8, 32], strides = [1, 1]} : vector<8x128xf32> to vector<8x32xf32>
    %686 = math.tanh %685 : vector<8x32xf32>
    %687 = arith.mulf %684, %686 : vector<8x32xf32>
    %688 = arith.addf %683, %687 : vector<8x32xf32>
    %689 = vector.extract_strided_slice %681 {offsets = [0, 64], sizes = [8, 32], strides = [1, 1]} : vector<8x96xf32> to vector<8x32xf32>
    %690 = math.tanh %688 : vector<8x32xf32>
    %691 = arith.mulf %689, %690 : vector<8x32xf32>
    %692 = arith.index_cast %671 : i32 to index
    %c0_177 = arith.constant 0 : index
    %693 = vector.load %arg11[%692, %c0_177] : memref<128x32xf32, #tpu.memory_space<vmem>>, vector<8x32xf32>
    tpu.vector_store %arg11[%692, %c0_177], %691 {strides = array<i32>} : memref<128x32xf32, #tpu.memory_space<vmem>>, vector<8x32xf32>,
    %c12_i32_178 = arith.constant 12 : i32
    %c8_i32_179 = arith.constant 8 : i32
    %694 = arith.muli %c12_i32_178, %c8_i32_179 : i32
    %695 = tpu.assume_multiple %694, 8 : i32
    %696 = arith.index_cast %695 : i32 to index
    %c0_180 = arith.constant 0 : index
    %697 = vector.load %arg12[%696, %c0_180] : memref<128x128xf32, #tpu.memory_space<vmem>>, vector<8x128xf32>
    %cst_181 = arith.constant dense<0.000000e+00> : vector<8x128xf32>
    %698 = tpu.matmul %691, %404, %cst_181 {dimension_numbers = #tpu.dot_dimension_numbers<[1], [0], [0], [1], [0, 0, 1, 1], [], []>} : vector<8x32xf32>, vector<32x128xf32>, vector<8x128xf32> -> vector<8x128xf32>
    %699 = arith.addf %697, %698 : vector<8x128xf32>
    %700 = vector.extract_strided_slice %699 {offsets = [0, 0], sizes = [8, 96], strides = [1, 1]} : vector<8x128xf32> to vector<8x96xf32>
    %701 = arith.negf %700 : vector<8x96xf32>
    %702 = math.exp %701 : vector<8x96xf32>
    %cst_182 = arith.constant 1.000000e+00 : f32
    %703 = vector.broadcast %cst_182 : f32 to vector<8x96xf32>
    %704 = arith.addf %703, %702 : vector<8x96xf32>
    %705 = arith.divf %703, %704 : vector<8x96xf32>
    %706 = vector.extract_strided_slice %705 {offsets = [0, 32], sizes = [8, 32], strides = [1, 1]} : vector<8x96xf32> to vector<8x32xf32>
    %707 = arith.mulf %706, %688 : vector<8x32xf32>
    %708 = vector.extract_strided_slice %705 {offsets = [0, 0], sizes = [8, 32], strides = [1, 1]} : vector<8x96xf32> to vector<8x32xf32>
    %709 = vector.extract_strided_slice %699 {offsets = [0, 96], sizes = [8, 32], strides = [1, 1]} : vector<8x128xf32> to vector<8x32xf32>
    %710 = math.tanh %709 : vector<8x32xf32>
    %711 = arith.mulf %708, %710 : vector<8x32xf32>
    %712 = arith.addf %707, %711 : vector<8x32xf32>
    %713 = vector.extract_strided_slice %705 {offsets = [0, 64], sizes = [8, 32], strides = [1, 1]} : vector<8x96xf32> to vector<8x32xf32>
    %714 = math.tanh %712 : vector<8x32xf32>
    %715 = arith.mulf %713, %714 : vector<8x32xf32>
    %716 = arith.index_cast %695 : i32 to index
    %c0_183 = arith.constant 0 : index
    %717 = vector.load %arg11[%716, %c0_183] : memref<128x32xf32, #tpu.memory_space<vmem>>, vector<8x32xf32>
    tpu.vector_store %arg11[%716, %c0_183], %715 {strides = array<i32>} : memref<128x32xf32, #tpu.memory_space<vmem>>, vector<8x32xf32>,
    %c13_i32_184 = arith.constant 13 : i32
    %c8_i32_185 = arith.constant 8 : i32
    %718 = arith.muli %c13_i32_184, %c8_i32_185 : i32
    %719 = tpu.assume_multiple %718, 8 : i32
    %720 = arith.index_cast %719 : i32 to index
    %c0_186 = arith.constant 0 : index
    %721 = vector.load %arg12[%720, %c0_186] : memref<128x128xf32, #tpu.memory_space<vmem>>, vector<8x128xf32>
    %cst_187 = arith.constant dense<0.000000e+00> : vector<8x128xf32>
    %722 = tpu.matmul %715, %404, %cst_187 {dimension_numbers = #tpu.dot_dimension_numbers<[1], [0], [0], [1], [0, 0, 1, 1], [], []>} : vector<8x32xf32>, vector<32x128xf32>, vector<8x128xf32> -> vector<8x128xf32>
    %723 = arith.addf %721, %722 : vector<8x128xf32>
    %724 = vector.extract_strided_slice %723 {offsets = [0, 0], sizes = [8, 96], strides = [1, 1]} : vector<8x128xf32> to vector<8x96xf32>
    %725 = arith.negf %724 : vector<8x96xf32>
    %726 = math.exp %725 : vector<8x96xf32>
    %cst_188 = arith.constant 1.000000e+00 : f32
    %727 = vector.broadcast %cst_188 : f32 to vector<8x96xf32>
    %728 = arith.addf %727, %726 : vector<8x96xf32>
    %729 = arith.divf %727, %728 : vector<8x96xf32>
    %730 = vector.extract_strided_slice %729 {offsets = [0, 32], sizes = [8, 32], strides = [1, 1]} : vector<8x96xf32> to vector<8x32xf32>
    %731 = arith.mulf %730, %712 : vector<8x32xf32>
    %732 = vector.extract_strided_slice %729 {offsets = [0, 0], sizes = [8, 32], strides = [1, 1]} : vector<8x96xf32> to vector<8x32xf32>
    %733 = vector.extract_strided_slice %723 {offsets = [0, 96], sizes = [8, 32], strides = [1, 1]} : vector<8x128xf32> to vector<8x32xf32>
    %734 = math.tanh %733 : vector<8x32xf32>
    %735 = arith.mulf %732, %734 : vector<8x32xf32>
    %736 = arith.addf %731, %735 : vector<8x32xf32>
    %737 = vector.extract_strided_slice %729 {offsets = [0, 64], sizes = [8, 32], strides = [1, 1]} : vector<8x96xf32> to vector<8x32xf32>
    %738 = math.tanh %736 : vector<8x32xf32>
    %739 = arith.mulf %737, %738 : vector<8x32xf32>
    %740 = arith.index_cast %719 : i32 to index
    %c0_189 = arith.constant 0 : index
    %741 = vector.load %arg11[%740, %c0_189] : memref<128x32xf32, #tpu.memory_space<vmem>>, vector<8x32xf32>
    tpu.vector_store %arg11[%740, %c0_189], %739 {strides = array<i32>} : memref<128x32xf32, #tpu.memory_space<vmem>>, vector<8x32xf32>,
    %c14_i32_190 = arith.constant 14 : i32
    %c8_i32_191 = arith.constant 8 : i32
    %742 = arith.muli %c14_i32_190, %c8_i32_191 : i32
    %743 = tpu.assume_multiple %742, 8 : i32
    %744 = arith.index_cast %743 : i32 to index
    %c0_192 = arith.constant 0 : index
    %745 = vector.load %arg12[%744, %c0_192] : memref<128x128xf32, #tpu.memory_space<vmem>>, vector<8x128xf32>
    %cst_193 = arith.constant dense<0.000000e+00> : vector<8x128xf32>
    %746 = tpu.matmul %739, %404, %cst_193 {dimension_numbers = #tpu.dot_dimension_numbers<[1], [0], [0], [1], [0, 0, 1, 1], [], []>} : vector<8x32xf32>, vector<32x128xf32>, vector<8x128xf32> -> vector<8x128xf32>
    %747 = arith.addf %745, %746 : vector<8x128xf32>
    %748 = vector.extract_strided_slice %747 {offsets = [0, 0], sizes = [8, 96], strides = [1, 1]} : vector<8x128xf32> to vector<8x96xf32>
    %749 = arith.negf %748 : vector<8x96xf32>
    %750 = math.exp %749 : vector<8x96xf32>
    %cst_194 = arith.constant 1.000000e+00 : f32
    %751 = vector.broadcast %cst_194 : f32 to vector<8x96xf32>
    %752 = arith.addf %751, %750 : vector<8x96xf32>
    %753 = arith.divf %751, %752 : vector<8x96xf32>
    %754 = vector.extract_strided_slice %753 {offsets = [0, 32], sizes = [8, 32], strides = [1, 1]} : vector<8x96xf32> to vector<8x32xf32>
    %755 = arith.mulf %754, %736 : vector<8x32xf32>
    %756 = vector.extract_strided_slice %753 {offsets = [0, 0], sizes = [8, 32], strides = [1, 1]} : vector<8x96xf32> to vector<8x32xf32>
    %757 = vector.extract_strided_slice %747 {offsets = [0, 96], sizes = [8, 32], strides = [1, 1]} : vector<8x128xf32> to vector<8x32xf32>
    %758 = math.tanh %757 : vector<8x32xf32>
    %759 = arith.mulf %756, %758 : vector<8x32xf32>
    %760 = arith.addf %755, %759 : vector<8x32xf32>
    %761 = vector.extract_strided_slice %753 {offsets = [0, 64], sizes = [8, 32], strides = [1, 1]} : vector<8x96xf32> to vector<8x32xf32>
    %762 = math.tanh %760 : vector<8x32xf32>
    %763 = arith.mulf %761, %762 : vector<8x32xf32>
    %764 = arith.index_cast %743 : i32 to index
    %c0_195 = arith.constant 0 : index
    %765 = vector.load %arg11[%764, %c0_195] : memref<128x32xf32, #tpu.memory_space<vmem>>, vector<8x32xf32>
    tpu.vector_store %arg11[%764, %c0_195], %763 {strides = array<i32>} : memref<128x32xf32, #tpu.memory_space<vmem>>, vector<8x32xf32>,
    %c15_i32_196 = arith.constant 15 : i32
    %c8_i32_197 = arith.constant 8 : i32
    %766 = arith.muli %c15_i32_196, %c8_i32_197 : i32
    %767 = tpu.assume_multiple %766, 8 : i32
    %768 = arith.index_cast %767 : i32 to index
    %c0_198 = arith.constant 0 : index
    %769 = vector.load %arg12[%768, %c0_198] : memref<128x128xf32, #tpu.memory_space<vmem>>, vector<8x128xf32>
    %cst_199 = arith.constant dense<0.000000e+00> : vector<8x128xf32>
    %770 = tpu.matmul %763, %404, %cst_199 {dimension_numbers = #tpu.dot_dimension_numbers<[1], [0], [0], [1], [0, 0, 1, 1], [], []>} : vector<8x32xf32>, vector<32x128xf32>, vector<8x128xf32> -> vector<8x128xf32>
    %771 = arith.addf %769, %770 : vector<8x128xf32>
    %772 = vector.extract_strided_slice %771 {offsets = [0, 0], sizes = [8, 96], strides = [1, 1]} : vector<8x128xf32> to vector<8x96xf32>
    %773 = arith.negf %772 : vector<8x96xf32>
    %774 = math.exp %773 : vector<8x96xf32>
    %cst_200 = arith.constant 1.000000e+00 : f32
    %775 = vector.broadcast %cst_200 : f32 to vector<8x96xf32>
    %776 = arith.addf %775, %774 : vector<8x96xf32>
    %777 = arith.divf %775, %776 : vector<8x96xf32>
    %778 = vector.extract_strided_slice %777 {offsets = [0, 32], sizes = [8, 32], strides = [1, 1]} : vector<8x96xf32> to vector<8x32xf32>
    %779 = arith.mulf %778, %760 : vector<8x32xf32>
    %780 = vector.extract_strided_slice %777 {offsets = [0, 0], sizes = [8, 32], strides = [1, 1]} : vector<8x96xf32> to vector<8x32xf32>
    %781 = vector.extract_strided_slice %771 {offsets = [0, 96], sizes = [8, 32], strides = [1, 1]} : vector<8x128xf32> to vector<8x32xf32>
    %782 = math.tanh %781 : vector<8x32xf32>
    %783 = arith.mulf %780, %782 : vector<8x32xf32>
    %784 = arith.addf %779, %783 : vector<8x32xf32>
    %785 = vector.extract_strided_slice %777 {offsets = [0, 64], sizes = [8, 32], strides = [1, 1]} : vector<8x96xf32> to vector<8x32xf32>
    %786 = math.tanh %784 : vector<8x32xf32>
    %787 = arith.mulf %785, %786 : vector<8x32xf32>
    %788 = arith.index_cast %767 : i32 to index
    %c0_201 = arith.constant 0 : index
    %789 = vector.load %arg11[%788, %c0_201] : memref<128x32xf32, #tpu.memory_space<vmem>>, vector<8x32xf32>
    tpu.vector_store %arg11[%788, %c0_201], %787 {strides = array<i32>} : memref<128x32xf32, #tpu.memory_space<vmem>>, vector<8x32xf32>,
    %c16_i32_202 = arith.constant 16 : i32
    %c0_203 = arith.constant 0 : index
    %c0_204 = arith.constant 0 : index
    %790 = vector.load %arg11[%c0_203, %c0_204] : memref<128x32xf32, #tpu.memory_space<vmem>>, vector<128x32xf32>
    %c1 = arith.constant 1 : index
    %c0_205 = arith.constant 0 : index
    %c0_206 = arith.constant 0 : index
    %791 = vector.load %arg5[%c1, %c0_205, %c0_206] : memref<2x32x128xf32, #tpu.memory_space<vmem>>, vector<1x32x128xf32>
    %792 = vector.shape_cast %791 : vector<1x32x128xf32> to vector<32x128xf32>
    %cst_207 = arith.constant dense<0.000000e+00> : vector<128x128xf32>
    %793 = tpu.matmul %790, %792, %cst_207 {dimension_numbers = #tpu.dot_dimension_numbers<[1], [0], [0], [1], [0, 0, 1, 1], [], []>} : vector<128x32xf32>, vector<32x128xf32>, vector<128x128xf32> -> vector<128x128xf32>
    %c1_208 = arith.constant 1 : index
    %c0_209 = arith.constant 0 : index
    %c0_210 = arith.constant 0 : index
    %794 = vector.load %arg7[%c1_208, %c0_209, %c0_210] : memref<2x1x128xf32, #tpu.memory_space<vmem>>, vector<1x1x128xf32>
    %795 = vector.shape_cast %794 : vector<1x1x128xf32> to vector<1x128xf32>
    %796 = vector.broadcast %795 : vector<1x128xf32> to vector<128x128xf32>
    %797 = arith.addf %793, %796 : vector<128x128xf32>
    %c0_211 = arith.constant 0 : index
    %c0_212 = arith.constant 0 : index
    %798 = vector.load %arg12[%c0_211, %c0_212] : memref<128x128xf32, #tpu.memory_space<vmem>>, vector<128x128xf32>
    tpu.vector_store %arg12[%c0_211, %c0_212], %797 {strides = array<i32>} : memref<128x128xf32, #tpu.memory_space<vmem>>, vector<128x128xf32>,
    %c1_213 = arith.constant 1 : index
    %c0_214 = arith.constant 0 : index
    %c0_215 = arith.constant 0 : index
    %799 = vector.load %arg6[%c1_213, %c0_214, %c0_215] : memref<2x32x128xf32, #tpu.memory_space<vmem>>, vector<1x32x128xf32>
    %800 = vector.shape_cast %799 : vector<1x32x128xf32> to vector<32x128xf32>
    %cst_216 = arith.constant 0.000000e+00 : f32
    %801 = vector.broadcast %cst_216 : f32 to vector<8x32xf32>
    %c0_i32_217 = arith.constant 0 : i32
    %c8_i32_218 = arith.constant 8 : i32
    %802 = arith.muli %c0_i32_217, %c8_i32_218 : i32
    %803 = tpu.assume_multiple %802, 8 : i32
    %804 = arith.index_cast %803 : i32 to index
    %c0_219 = arith.constant 0 : index
    %805 = vector.load %arg12[%804, %c0_219] : memref<128x128xf32, #tpu.memory_space<vmem>>, vector<8x128xf32>
    %cst_220 = arith.constant dense<0.000000e+00> : vector<8x128xf32>
    %806 = tpu.matmul %801, %800, %cst_220 {dimension_numbers = #tpu.dot_dimension_numbers<[1], [0], [0], [1], [0, 0, 1, 1], [], []>} : vector<8x32xf32>, vector<32x128xf32>, vector<8x128xf32> -> vector<8x128xf32>
    %807 = arith.addf %805, %806 : vector<8x128xf32>
    %808 = vector.extract_strided_slice %807 {offsets = [0, 0], sizes = [8, 96], strides = [1, 1]} : vector<8x128xf32> to vector<8x96xf32>
    %809 = arith.negf %808 : vector<8x96xf32>
    %810 = math.exp %809 : vector<8x96xf32>
    %cst_221 = arith.constant 1.000000e+00 : f32
    %811 = vector.broadcast %cst_221 : f32 to vector<8x96xf32>
    %812 = arith.addf %811, %810 : vector<8x96xf32>
    %813 = arith.divf %811, %812 : vector<8x96xf32>
    %814 = vector.extract_strided_slice %813 {offsets = [0, 32], sizes = [8, 32], strides = [1, 1]} : vector<8x96xf32> to vector<8x32xf32>
    %815 = arith.mulf %814, %801 : vector<8x32xf32>
    %816 = vector.extract_strided_slice %813 {offsets = [0, 0], sizes = [8, 32], strides = [1, 1]} : vector<8x96xf32> to vector<8x32xf32>
    %817 = vector.extract_strided_slice %807 {offsets = [0, 96], sizes = [8, 32], strides = [1, 1]} : vector<8x128xf32> to vector<8x32xf32>
    %818 = math.tanh %817 : vector<8x32xf32>
    %819 = arith.mulf %816, %818 : vector<8x32xf32>
    %820 = arith.addf %815, %819 : vector<8x32xf32>
    %821 = vector.extract_strided_slice %813 {offsets = [0, 64], sizes = [8, 32], strides = [1, 1]} : vector<8x96xf32> to vector<8x32xf32>
    %822 = math.tanh %820 : vector<8x32xf32>
    %823 = arith.mulf %821, %822 : vector<8x32xf32>
    %824 = arith.addf %801, %823 : vector<8x32xf32>
    %c1_i32_222 = arith.constant 1 : i32
    %c8_i32_223 = arith.constant 8 : i32
    %825 = arith.muli %c1_i32_222, %c8_i32_223 : i32
    %826 = tpu.assume_multiple %825, 8 : i32
    %827 = arith.index_cast %826 : i32 to index
    %c0_224 = arith.constant 0 : index
    %828 = vector.load %arg12[%827, %c0_224] : memref<128x128xf32, #tpu.memory_space<vmem>>, vector<8x128xf32>
    %cst_225 = arith.constant dense<0.000000e+00> : vector<8x128xf32>
    %829 = tpu.matmul %823, %800, %cst_225 {dimension_numbers = #tpu.dot_dimension_numbers<[1], [0], [0], [1], [0, 0, 1, 1], [], []>} : vector<8x32xf32>, vector<32x128xf32>, vector<8x128xf32> -> vector<8x128xf32>
    %830 = arith.addf %828, %829 : vector<8x128xf32>
    %831 = vector.extract_strided_slice %830 {offsets = [0, 0], sizes = [8, 96], strides = [1, 1]} : vector<8x128xf32> to vector<8x96xf32>
    %832 = arith.negf %831 : vector<8x96xf32>
    %833 = math.exp %832 : vector<8x96xf32>
    %cst_226 = arith.constant 1.000000e+00 : f32
    %834 = vector.broadcast %cst_226 : f32 to vector<8x96xf32>
    %835 = arith.addf %834, %833 : vector<8x96xf32>
    %836 = arith.divf %834, %835 : vector<8x96xf32>
    %837 = vector.extract_strided_slice %836 {offsets = [0, 32], sizes = [8, 32], strides = [1, 1]} : vector<8x96xf32> to vector<8x32xf32>
    %838 = arith.mulf %837, %820 : vector<8x32xf32>
    %839 = vector.extract_strided_slice %836 {offsets = [0, 0], sizes = [8, 32], strides = [1, 1]} : vector<8x96xf32> to vector<8x32xf32>
    %840 = vector.extract_strided_slice %830 {offsets = [0, 96], sizes = [8, 32], strides = [1, 1]} : vector<8x128xf32> to vector<8x32xf32>
    %841 = math.tanh %840 : vector<8x32xf32>
    %842 = arith.mulf %839, %841 : vector<8x32xf32>
    %843 = arith.addf %838, %842 : vector<8x32xf32>
    %844 = vector.extract_strided_slice %836 {offsets = [0, 64], sizes = [8, 32], strides = [1, 1]} : vector<8x96xf32> to vector<8x32xf32>
    %845 = math.tanh %843 : vector<8x32xf32>
    %846 = arith.mulf %844, %845 : vector<8x32xf32>
    %847 = arith.addf %824, %846 : vector<8x32xf32>
    %c2_i32_227 = arith.constant 2 : i32
    %c8_i32_228 = arith.constant 8 : i32
    %848 = arith.muli %c2_i32_227, %c8_i32_228 : i32
    %849 = tpu.assume_multiple %848, 8 : i32
    %850 = arith.index_cast %849 : i32 to index
    %c0_229 = arith.constant 0 : index
    %851 = vector.load %arg12[%850, %c0_229] : memref<128x128xf32, #tpu.memory_space<vmem>>, vector<8x128xf32>
    %cst_230 = arith.constant dense<0.000000e+00> : vector<8x128xf32>
    %852 = tpu.matmul %846, %800, %cst_230 {dimension_numbers = #tpu.dot_dimension_numbers<[1], [0], [0], [1], [0, 0, 1, 1], [], []>} : vector<8x32xf32>, vector<32x128xf32>, vector<8x128xf32> -> vector<8x128xf32>
    %853 = arith.addf %851, %852 : vector<8x128xf32>
    %854 = vector.extract_strided_slice %853 {offsets = [0, 0], sizes = [8, 96], strides = [1, 1]} : vector<8x128xf32> to vector<8x96xf32>
    %855 = arith.negf %854 : vector<8x96xf32>
    %856 = math.exp %855 : vector<8x96xf32>
    %cst_231 = arith.constant 1.000000e+00 : f32
    %857 = vector.broadcast %cst_231 : f32 to vector<8x96xf32>
    %858 = arith.addf %857, %856 : vector<8x96xf32>
    %859 = arith.divf %857, %858 : vector<8x96xf32>
    %860 = vector.extract_strided_slice %859 {offsets = [0, 32], sizes = [8, 32], strides = [1, 1]} : vector<8x96xf32> to vector<8x32xf32>
    %861 = arith.mulf %860, %843 : vector<8x32xf32>
    %862 = vector.extract_strided_slice %859 {offsets = [0, 0], sizes = [8, 32], strides = [1, 1]} : vector<8x96xf32> to vector<8x32xf32>
    %863 = vector.extract_strided_slice %853 {offsets = [0, 96], sizes = [8, 32], strides = [1, 1]} : vector<8x128xf32> to vector<8x32xf32>
    %864 = math.tanh %863 : vector<8x32xf32>
    %865 = arith.mulf %862, %864 : vector<8x32xf32>
    %866 = arith.addf %861, %865 : vector<8x32xf32>
    %867 = vector.extract_strided_slice %859 {offsets = [0, 64], sizes = [8, 32], strides = [1, 1]} : vector<8x96xf32> to vector<8x32xf32>
    %868 = math.tanh %866 : vector<8x32xf32>
    %869 = arith.mulf %867, %868 : vector<8x32xf32>
    %870 = arith.addf %847, %869 : vector<8x32xf32>
    %c3_i32_232 = arith.constant 3 : i32
    %c8_i32_233 = arith.constant 8 : i32
    %871 = arith.muli %c3_i32_232, %c8_i32_233 : i32
    %872 = tpu.assume_multiple %871, 8 : i32
    %873 = arith.index_cast %872 : i32 to index
    %c0_234 = arith.constant 0 : index
    %874 = vector.load %arg12[%873, %c0_234] : memref<128x128xf32, #tpu.memory_space<vmem>>, vector<8x128xf32>
    %cst_235 = arith.constant dense<0.000000e+00> : vector<8x128xf32>
    %875 = tpu.matmul %869, %800, %cst_235 {dimension_numbers = #tpu.dot_dimension_numbers<[1], [0], [0], [1], [0, 0, 1, 1], [], []>} : vector<8x32xf32>, vector<32x128xf32>, vector<8x128xf32> -> vector<8x128xf32>
    %876 = arith.addf %874, %875 : vector<8x128xf32>
    %877 = vector.extract_strided_slice %876 {offsets = [0, 0], sizes = [8, 96], strides = [1, 1]} : vector<8x128xf32> to vector<8x96xf32>
    %878 = arith.negf %877 : vector<8x96xf32>
    %879 = math.exp %878 : vector<8x96xf32>
    %cst_236 = arith.constant 1.000000e+00 : f32
    %880 = vector.broadcast %cst_236 : f32 to vector<8x96xf32>
    %881 = arith.addf %880, %879 : vector<8x96xf32>
    %882 = arith.divf %880, %881 : vector<8x96xf32>
    %883 = vector.extract_strided_slice %882 {offsets = [0, 32], sizes = [8, 32], strides = [1, 1]} : vector<8x96xf32> to vector<8x32xf32>
    %884 = arith.mulf %883, %866 : vector<8x32xf32>
    %885 = vector.extract_strided_slice %882 {offsets = [0, 0], sizes = [8, 32], strides = [1, 1]} : vector<8x96xf32> to vector<8x32xf32>
    %886 = vector.extract_strided_slice %876 {offsets = [0, 96], sizes = [8, 32], strides = [1, 1]} : vector<8x128xf32> to vector<8x32xf32>
    %887 = math.tanh %886 : vector<8x32xf32>
    %888 = arith.mulf %885, %887 : vector<8x32xf32>
    %889 = arith.addf %884, %888 : vector<8x32xf32>
    %890 = vector.extract_strided_slice %882 {offsets = [0, 64], sizes = [8, 32], strides = [1, 1]} : vector<8x96xf32> to vector<8x32xf32>
    %891 = math.tanh %889 : vector<8x32xf32>
    %892 = arith.mulf %890, %891 : vector<8x32xf32>
    %893 = arith.addf %870, %892 : vector<8x32xf32>
    %c4_i32_237 = arith.constant 4 : i32
    %c8_i32_238 = arith.constant 8 : i32
    %894 = arith.muli %c4_i32_237, %c8_i32_238 : i32
    %895 = tpu.assume_multiple %894, 8 : i32
    %896 = arith.index_cast %895 : i32 to index
    %c0_239 = arith.constant 0 : index
    %897 = vector.load %arg12[%896, %c0_239] : memref<128x128xf32, #tpu.memory_space<vmem>>, vector<8x128xf32>
    %cst_240 = arith.constant dense<0.000000e+00> : vector<8x128xf32>
    %898 = tpu.matmul %892, %800, %cst_240 {dimension_numbers = #tpu.dot_dimension_numbers<[1], [0], [0], [1], [0, 0, 1, 1], [], []>} : vector<8x32xf32>, vector<32x128xf32>, vector<8x128xf32> -> vector<8x128xf32>
    %899 = arith.addf %897, %898 : vector<8x128xf32>
    %900 = vector.extract_strided_slice %899 {offsets = [0, 0], sizes = [8, 96], strides = [1, 1]} : vector<8x128xf32> to vector<8x96xf32>
    %901 = arith.negf %900 : vector<8x96xf32>
    %902 = math.exp %901 : vector<8x96xf32>
    %cst_241 = arith.constant 1.000000e+00 : f32
    %903 = vector.broadcast %cst_241 : f32 to vector<8x96xf32>
    %904 = arith.addf %903, %902 : vector<8x96xf32>
    %905 = arith.divf %903, %904 : vector<8x96xf32>
    %906 = vector.extract_strided_slice %905 {offsets = [0, 32], sizes = [8, 32], strides = [1, 1]} : vector<8x96xf32> to vector<8x32xf32>
    %907 = arith.mulf %906, %889 : vector<8x32xf32>
    %908 = vector.extract_strided_slice %905 {offsets = [0, 0], sizes = [8, 32], strides = [1, 1]} : vector<8x96xf32> to vector<8x32xf32>
    %909 = vector.extract_strided_slice %899 {offsets = [0, 96], sizes = [8, 32], strides = [1, 1]} : vector<8x128xf32> to vector<8x32xf32>
    %910 = math.tanh %909 : vector<8x32xf32>
    %911 = arith.mulf %908, %910 : vector<8x32xf32>
    %912 = arith.addf %907, %911 : vector<8x32xf32>
    %913 = vector.extract_strided_slice %905 {offsets = [0, 64], sizes = [8, 32], strides = [1, 1]} : vector<8x96xf32> to vector<8x32xf32>
    %914 = math.tanh %912 : vector<8x32xf32>
    %915 = arith.mulf %913, %914 : vector<8x32xf32>
    %916 = arith.addf %893, %915 : vector<8x32xf32>
    %c5_i32_242 = arith.constant 5 : i32
    %c8_i32_243 = arith.constant 8 : i32
    %917 = arith.muli %c5_i32_242, %c8_i32_243 : i32
    %918 = tpu.assume_multiple %917, 8 : i32
    %919 = arith.index_cast %918 : i32 to index
    %c0_244 = arith.constant 0 : index
    %920 = vector.load %arg12[%919, %c0_244] : memref<128x128xf32, #tpu.memory_space<vmem>>, vector<8x128xf32>
    %cst_245 = arith.constant dense<0.000000e+00> : vector<8x128xf32>
    %921 = tpu.matmul %915, %800, %cst_245 {dimension_numbers = #tpu.dot_dimension_numbers<[1], [0], [0], [1], [0, 0, 1, 1], [], []>} : vector<8x32xf32>, vector<32x128xf32>, vector<8x128xf32> -> vector<8x128xf32>
    %922 = arith.addf %920, %921 : vector<8x128xf32>
    %923 = vector.extract_strided_slice %922 {offsets = [0, 0], sizes = [8, 96], strides = [1, 1]} : vector<8x128xf32> to vector<8x96xf32>
    %924 = arith.negf %923 : vector<8x96xf32>
    %925 = math.exp %924 : vector<8x96xf32>
    %cst_246 = arith.constant 1.000000e+00 : f32
    %926 = vector.broadcast %cst_246 : f32 to vector<8x96xf32>
    %927 = arith.addf %926, %925 : vector<8x96xf32>
    %928 = arith.divf %926, %927 : vector<8x96xf32>
    %929 = vector.extract_strided_slice %928 {offsets = [0, 32], sizes = [8, 32], strides = [1, 1]} : vector<8x96xf32> to vector<8x32xf32>
    %930 = arith.mulf %929, %912 : vector<8x32xf32>
    %931 = vector.extract_strided_slice %928 {offsets = [0, 0], sizes = [8, 32], strides = [1, 1]} : vector<8x96xf32> to vector<8x32xf32>
    %932 = vector.extract_strided_slice %922 {offsets = [0, 96], sizes = [8, 32], strides = [1, 1]} : vector<8x128xf32> to vector<8x32xf32>
    %933 = math.tanh %932 : vector<8x32xf32>
    %934 = arith.mulf %931, %933 : vector<8x32xf32>
    %935 = arith.addf %930, %934 : vector<8x32xf32>
    %936 = vector.extract_strided_slice %928 {offsets = [0, 64], sizes = [8, 32], strides = [1, 1]} : vector<8x96xf32> to vector<8x32xf32>
    %937 = math.tanh %935 : vector<8x32xf32>
    %938 = arith.mulf %936, %937 : vector<8x32xf32>
    %939 = arith.addf %916, %938 : vector<8x32xf32>
    %c6_i32_247 = arith.constant 6 : i32
    %c8_i32_248 = arith.constant 8 : i32
    %940 = arith.muli %c6_i32_247, %c8_i32_248 : i32
    %941 = tpu.assume_multiple %940, 8 : i32
    %942 = arith.index_cast %941 : i32 to index
    %c0_249 = arith.constant 0 : index
    %943 = vector.load %arg12[%942, %c0_249] : memref<128x128xf32, #tpu.memory_space<vmem>>, vector<8x128xf32>
    %cst_250 = arith.constant dense<0.000000e+00> : vector<8x128xf32>
    %944 = tpu.matmul %938, %800, %cst_250 {dimension_numbers = #tpu.dot_dimension_numbers<[1], [0], [0], [1], [0, 0, 1, 1], [], []>} : vector<8x32xf32>, vector<32x128xf32>, vector<8x128xf32> -> vector<8x128xf32>
    %945 = arith.addf %943, %944 : vector<8x128xf32>
    %946 = vector.extract_strided_slice %945 {offsets = [0, 0], sizes = [8, 96], strides = [1, 1]} : vector<8x128xf32> to vector<8x96xf32>
    %947 = arith.negf %946 : vector<8x96xf32>
    %948 = math.exp %947 : vector<8x96xf32>
    %cst_251 = arith.constant 1.000000e+00 : f32
    %949 = vector.broadcast %cst_251 : f32 to vector<8x96xf32>
    %950 = arith.addf %949, %948 : vector<8x96xf32>
    %951 = arith.divf %949, %950 : vector<8x96xf32>
    %952 = vector.extract_strided_slice %951 {offsets = [0, 32], sizes = [8, 32], strides = [1, 1]} : vector<8x96xf32> to vector<8x32xf32>
    %953 = arith.mulf %952, %935 : vector<8x32xf32>
    %954 = vector.extract_strided_slice %951 {offsets = [0, 0], sizes = [8, 32], strides = [1, 1]} : vector<8x96xf32> to vector<8x32xf32>
    %955 = vector.extract_strided_slice %945 {offsets = [0, 96], sizes = [8, 32], strides = [1, 1]} : vector<8x128xf32> to vector<8x32xf32>
    %956 = math.tanh %955 : vector<8x32xf32>
    %957 = arith.mulf %954, %956 : vector<8x32xf32>
    %958 = arith.addf %953, %957 : vector<8x32xf32>
    %959 = vector.extract_strided_slice %951 {offsets = [0, 64], sizes = [8, 32], strides = [1, 1]} : vector<8x96xf32> to vector<8x32xf32>
    %960 = math.tanh %958 : vector<8x32xf32>
    %961 = arith.mulf %959, %960 : vector<8x32xf32>
    %962 = arith.addf %939, %961 : vector<8x32xf32>
    %c7_i32_252 = arith.constant 7 : i32
    %c8_i32_253 = arith.constant 8 : i32
    %963 = arith.muli %c7_i32_252, %c8_i32_253 : i32
    %964 = tpu.assume_multiple %963, 8 : i32
    %965 = arith.index_cast %964 : i32 to index
    %c0_254 = arith.constant 0 : index
    %966 = vector.load %arg12[%965, %c0_254] : memref<128x128xf32, #tpu.memory_space<vmem>>, vector<8x128xf32>
    %cst_255 = arith.constant dense<0.000000e+00> : vector<8x128xf32>
    %967 = tpu.matmul %961, %800, %cst_255 {dimension_numbers = #tpu.dot_dimension_numbers<[1], [0], [0], [1], [0, 0, 1, 1], [], []>} : vector<8x32xf32>, vector<32x128xf32>, vector<8x128xf32> -> vector<8x128xf32>
    %968 = arith.addf %966, %967 : vector<8x128xf32>
    %969 = vector.extract_strided_slice %968 {offsets = [0, 0], sizes = [8, 96], strides = [1, 1]} : vector<8x128xf32> to vector<8x96xf32>
    %970 = arith.negf %969 : vector<8x96xf32>
    %971 = math.exp %970 : vector<8x96xf32>
    %cst_256 = arith.constant 1.000000e+00 : f32
    %972 = vector.broadcast %cst_256 : f32 to vector<8x96xf32>
    %973 = arith.addf %972, %971 : vector<8x96xf32>
    %974 = arith.divf %972, %973 : vector<8x96xf32>
    %975 = vector.extract_strided_slice %974 {offsets = [0, 32], sizes = [8, 32], strides = [1, 1]} : vector<8x96xf32> to vector<8x32xf32>
    %976 = arith.mulf %975, %958 : vector<8x32xf32>
    %977 = vector.extract_strided_slice %974 {offsets = [0, 0], sizes = [8, 32], strides = [1, 1]} : vector<8x96xf32> to vector<8x32xf32>
    %978 = vector.extract_strided_slice %968 {offsets = [0, 96], sizes = [8, 32], strides = [1, 1]} : vector<8x128xf32> to vector<8x32xf32>
    %979 = math.tanh %978 : vector<8x32xf32>
    %980 = arith.mulf %977, %979 : vector<8x32xf32>
    %981 = arith.addf %976, %980 : vector<8x32xf32>
    %982 = vector.extract_strided_slice %974 {offsets = [0, 64], sizes = [8, 32], strides = [1, 1]} : vector<8x96xf32> to vector<8x32xf32>
    %983 = math.tanh %981 : vector<8x32xf32>
    %984 = arith.mulf %982, %983 : vector<8x32xf32>
    %985 = arith.addf %962, %984 : vector<8x32xf32>
    %c8_i32_257 = arith.constant 8 : i32
    %c8_i32_258 = arith.constant 8 : i32
    %986 = arith.muli %c8_i32_257, %c8_i32_258 : i32
    %987 = tpu.assume_multiple %986, 8 : i32
    %988 = arith.index_cast %987 : i32 to index
    %c0_259 = arith.constant 0 : index
    %989 = vector.load %arg12[%988, %c0_259] : memref<128x128xf32, #tpu.memory_space<vmem>>, vector<8x128xf32>
    %cst_260 = arith.constant dense<0.000000e+00> : vector<8x128xf32>
    %990 = tpu.matmul %984, %800, %cst_260 {dimension_numbers = #tpu.dot_dimension_numbers<[1], [0], [0], [1], [0, 0, 1, 1], [], []>} : vector<8x32xf32>, vector<32x128xf32>, vector<8x128xf32> -> vector<8x128xf32>
    %991 = arith.addf %989, %990 : vector<8x128xf32>
    %992 = vector.extract_strided_slice %991 {offsets = [0, 0], sizes = [8, 96], strides = [1, 1]} : vector<8x128xf32> to vector<8x96xf32>
    %993 = arith.negf %992 : vector<8x96xf32>
    %994 = math.exp %993 : vector<8x96xf32>
    %cst_261 = arith.constant 1.000000e+00 : f32
    %995 = vector.broadcast %cst_261 : f32 to vector<8x96xf32>
    %996 = arith.addf %995, %994 : vector<8x96xf32>
    %997 = arith.divf %995, %996 : vector<8x96xf32>
    %998 = vector.extract_strided_slice %997 {offsets = [0, 32], sizes = [8, 32], strides = [1, 1]} : vector<8x96xf32> to vector<8x32xf32>
    %999 = arith.mulf %998, %981 : vector<8x32xf32>
    %1000 = vector.extract_strided_slice %997 {offsets = [0, 0], sizes = [8, 32], strides = [1, 1]} : vector<8x96xf32> to vector<8x32xf32>
    %1001 = vector.extract_strided_slice %991 {offsets = [0, 96], sizes = [8, 32], strides = [1, 1]} : vector<8x128xf32> to vector<8x32xf32>
    %1002 = math.tanh %1001 : vector<8x32xf32>
    %1003 = arith.mulf %1000, %1002 : vector<8x32xf32>
    %1004 = arith.addf %999, %1003 : vector<8x32xf32>
    %1005 = vector.extract_strided_slice %997 {offsets = [0, 64], sizes = [8, 32], strides = [1, 1]} : vector<8x96xf32> to vector<8x32xf32>
    %1006 = math.tanh %1004 : vector<8x32xf32>
    %1007 = arith.mulf %1005, %1006 : vector<8x32xf32>
    %1008 = arith.addf %985, %1007 : vector<8x32xf32>
    %c9_i32_262 = arith.constant 9 : i32
    %c8_i32_263 = arith.constant 8 : i32
    %1009 = arith.muli %c9_i32_262, %c8_i32_263 : i32
    %1010 = tpu.assume_multiple %1009, 8 : i32
    %1011 = arith.index_cast %1010 : i32 to index
    %c0_264 = arith.constant 0 : index
    %1012 = vector.load %arg12[%1011, %c0_264] : memref<128x128xf32, #tpu.memory_space<vmem>>, vector<8x128xf32>
    %cst_265 = arith.constant dense<0.000000e+00> : vector<8x128xf32>
    %1013 = tpu.matmul %1007, %800, %cst_265 {dimension_numbers = #tpu.dot_dimension_numbers<[1], [0], [0], [1], [0, 0, 1, 1], [], []>} : vector<8x32xf32>, vector<32x128xf32>, vector<8x128xf32> -> vector<8x128xf32>
    %1014 = arith.addf %1012, %1013 : vector<8x128xf32>
    %1015 = vector.extract_strided_slice %1014 {offsets = [0, 0], sizes = [8, 96], strides = [1, 1]} : vector<8x128xf32> to vector<8x96xf32>
    %1016 = arith.negf %1015 : vector<8x96xf32>
    %1017 = math.exp %1016 : vector<8x96xf32>
    %cst_266 = arith.constant 1.000000e+00 : f32
    %1018 = vector.broadcast %cst_266 : f32 to vector<8x96xf32>
    %1019 = arith.addf %1018, %1017 : vector<8x96xf32>
    %1020 = arith.divf %1018, %1019 : vector<8x96xf32>
    %1021 = vector.extract_strided_slice %1020 {offsets = [0, 32], sizes = [8, 32], strides = [1, 1]} : vector<8x96xf32> to vector<8x32xf32>
    %1022 = arith.mulf %1021, %1004 : vector<8x32xf32>
    %1023 = vector.extract_strided_slice %1020 {offsets = [0, 0], sizes = [8, 32], strides = [1, 1]} : vector<8x96xf32> to vector<8x32xf32>
    %1024 = vector.extract_strided_slice %1014 {offsets = [0, 96], sizes = [8, 32], strides = [1, 1]} : vector<8x128xf32> to vector<8x32xf32>
    %1025 = math.tanh %1024 : vector<8x32xf32>
    %1026 = arith.mulf %1023, %1025 : vector<8x32xf32>
    %1027 = arith.addf %1022, %1026 : vector<8x32xf32>
    %1028 = vector.extract_strided_slice %1020 {offsets = [0, 64], sizes = [8, 32], strides = [1, 1]} : vector<8x96xf32> to vector<8x32xf32>
    %1029 = math.tanh %1027 : vector<8x32xf32>
    %1030 = arith.mulf %1028, %1029 : vector<8x32xf32>
    %1031 = arith.addf %1008, %1030 : vector<8x32xf32>
    %c10_i32_267 = arith.constant 10 : i32
    %c8_i32_268 = arith.constant 8 : i32
    %1032 = arith.muli %c10_i32_267, %c8_i32_268 : i32
    %1033 = tpu.assume_multiple %1032, 8 : i32
    %1034 = arith.index_cast %1033 : i32 to index
    %c0_269 = arith.constant 0 : index
    %1035 = vector.load %arg12[%1034, %c0_269] : memref<128x128xf32, #tpu.memory_space<vmem>>, vector<8x128xf32>
    %cst_270 = arith.constant dense<0.000000e+00> : vector<8x128xf32>
    %1036 = tpu.matmul %1030, %800, %cst_270 {dimension_numbers = #tpu.dot_dimension_numbers<[1], [0], [0], [1], [0, 0, 1, 1], [], []>} : vector<8x32xf32>, vector<32x128xf32>, vector<8x128xf32> -> vector<8x128xf32>
    %1037 = arith.addf %1035, %1036 : vector<8x128xf32>
    %1038 = vector.extract_strided_slice %1037 {offsets = [0, 0], sizes = [8, 96], strides = [1, 1]} : vector<8x128xf32> to vector<8x96xf32>
    %1039 = arith.negf %1038 : vector<8x96xf32>
    %1040 = math.exp %1039 : vector<8x96xf32>
    %cst_271 = arith.constant 1.000000e+00 : f32
    %1041 = vector.broadcast %cst_271 : f32 to vector<8x96xf32>
    %1042 = arith.addf %1041, %1040 : vector<8x96xf32>
    %1043 = arith.divf %1041, %1042 : vector<8x96xf32>
    %1044 = vector.extract_strided_slice %1043 {offsets = [0, 32], sizes = [8, 32], strides = [1, 1]} : vector<8x96xf32> to vector<8x32xf32>
    %1045 = arith.mulf %1044, %1027 : vector<8x32xf32>
    %1046 = vector.extract_strided_slice %1043 {offsets = [0, 0], sizes = [8, 32], strides = [1, 1]} : vector<8x96xf32> to vector<8x32xf32>
    %1047 = vector.extract_strided_slice %1037 {offsets = [0, 96], sizes = [8, 32], strides = [1, 1]} : vector<8x128xf32> to vector<8x32xf32>
    %1048 = math.tanh %1047 : vector<8x32xf32>
    %1049 = arith.mulf %1046, %1048 : vector<8x32xf32>
    %1050 = arith.addf %1045, %1049 : vector<8x32xf32>
    %1051 = vector.extract_strided_slice %1043 {offsets = [0, 64], sizes = [8, 32], strides = [1, 1]} : vector<8x96xf32> to vector<8x32xf32>
    %1052 = math.tanh %1050 : vector<8x32xf32>
    %1053 = arith.mulf %1051, %1052 : vector<8x32xf32>
    %1054 = arith.addf %1031, %1053 : vector<8x32xf32>
    %c11_i32_272 = arith.constant 11 : i32
    %c8_i32_273 = arith.constant 8 : i32
    %1055 = arith.muli %c11_i32_272, %c8_i32_273 : i32
    %1056 = tpu.assume_multiple %1055, 8 : i32
    %1057 = arith.index_cast %1056 : i32 to index
    %c0_274 = arith.constant 0 : index
    %1058 = vector.load %arg12[%1057, %c0_274] : memref<128x128xf32, #tpu.memory_space<vmem>>, vector<8x128xf32>
    %cst_275 = arith.constant dense<0.000000e+00> : vector<8x128xf32>
    %1059 = tpu.matmul %1053, %800, %cst_275 {dimension_numbers = #tpu.dot_dimension_numbers<[1], [0], [0], [1], [0, 0, 1, 1], [], []>} : vector<8x32xf32>, vector<32x128xf32>, vector<8x128xf32> -> vector<8x128xf32>
    %1060 = arith.addf %1058, %1059 : vector<8x128xf32>
    %1061 = vector.extract_strided_slice %1060 {offsets = [0, 0], sizes = [8, 96], strides = [1, 1]} : vector<8x128xf32> to vector<8x96xf32>
    %1062 = arith.negf %1061 : vector<8x96xf32>
    %1063 = math.exp %1062 : vector<8x96xf32>
    %cst_276 = arith.constant 1.000000e+00 : f32
    %1064 = vector.broadcast %cst_276 : f32 to vector<8x96xf32>
    %1065 = arith.addf %1064, %1063 : vector<8x96xf32>
    %1066 = arith.divf %1064, %1065 : vector<8x96xf32>
    %1067 = vector.extract_strided_slice %1066 {offsets = [0, 32], sizes = [8, 32], strides = [1, 1]} : vector<8x96xf32> to vector<8x32xf32>
    %1068 = arith.mulf %1067, %1050 : vector<8x32xf32>
    %1069 = vector.extract_strided_slice %1066 {offsets = [0, 0], sizes = [8, 32], strides = [1, 1]} : vector<8x96xf32> to vector<8x32xf32>
    %1070 = vector.extract_strided_slice %1060 {offsets = [0, 96], sizes = [8, 32], strides = [1, 1]} : vector<8x128xf32> to vector<8x32xf32>
    %1071 = math.tanh %1070 : vector<8x32xf32>
    %1072 = arith.mulf %1069, %1071 : vector<8x32xf32>
    %1073 = arith.addf %1068, %1072 : vector<8x32xf32>
    %1074 = vector.extract_strided_slice %1066 {offsets = [0, 64], sizes = [8, 32], strides = [1, 1]} : vector<8x96xf32> to vector<8x32xf32>
    %1075 = math.tanh %1073 : vector<8x32xf32>
    %1076 = arith.mulf %1074, %1075 : vector<8x32xf32>
    %1077 = arith.addf %1054, %1076 : vector<8x32xf32>
    %c12_i32_277 = arith.constant 12 : i32
    %c8_i32_278 = arith.constant 8 : i32
    %1078 = arith.muli %c12_i32_277, %c8_i32_278 : i32
    %1079 = tpu.assume_multiple %1078, 8 : i32
    %1080 = arith.index_cast %1079 : i32 to index
    %c0_279 = arith.constant 0 : index
    %1081 = vector.load %arg12[%1080, %c0_279] : memref<128x128xf32, #tpu.memory_space<vmem>>, vector<8x128xf32>
    %cst_280 = arith.constant dense<0.000000e+00> : vector<8x128xf32>
    %1082 = tpu.matmul %1076, %800, %cst_280 {dimension_numbers = #tpu.dot_dimension_numbers<[1], [0], [0], [1], [0, 0, 1, 1], [], []>} : vector<8x32xf32>, vector<32x128xf32>, vector<8x128xf32> -> vector<8x128xf32>
    %1083 = arith.addf %1081, %1082 : vector<8x128xf32>
    %1084 = vector.extract_strided_slice %1083 {offsets = [0, 0], sizes = [8, 96], strides = [1, 1]} : vector<8x128xf32> to vector<8x96xf32>
    %1085 = arith.negf %1084 : vector<8x96xf32>
    %1086 = math.exp %1085 : vector<8x96xf32>
    %cst_281 = arith.constant 1.000000e+00 : f32
    %1087 = vector.broadcast %cst_281 : f32 to vector<8x96xf32>
    %1088 = arith.addf %1087, %1086 : vector<8x96xf32>
    %1089 = arith.divf %1087, %1088 : vector<8x96xf32>
    %1090 = vector.extract_strided_slice %1089 {offsets = [0, 32], sizes = [8, 32], strides = [1, 1]} : vector<8x96xf32> to vector<8x32xf32>
    %1091 = arith.mulf %1090, %1073 : vector<8x32xf32>
    %1092 = vector.extract_strided_slice %1089 {offsets = [0, 0], sizes = [8, 32], strides = [1, 1]} : vector<8x96xf32> to vector<8x32xf32>
    %1093 = vector.extract_strided_slice %1083 {offsets = [0, 96], sizes = [8, 32], strides = [1, 1]} : vector<8x128xf32> to vector<8x32xf32>
    %1094 = math.tanh %1093 : vector<8x32xf32>
    %1095 = arith.mulf %1092, %1094 : vector<8x32xf32>
    %1096 = arith.addf %1091, %1095 : vector<8x32xf32>
    %1097 = vector.extract_strided_slice %1089 {offsets = [0, 64], sizes = [8, 32], strides = [1, 1]} : vector<8x96xf32> to vector<8x32xf32>
    %1098 = math.tanh %1096 : vector<8x32xf32>
    %1099 = arith.mulf %1097, %1098 : vector<8x32xf32>
    %1100 = arith.addf %1077, %1099 : vector<8x32xf32>
    %c13_i32_282 = arith.constant 13 : i32
    %c8_i32_283 = arith.constant 8 : i32
    %1101 = arith.muli %c13_i32_282, %c8_i32_283 : i32
    %1102 = tpu.assume_multiple %1101, 8 : i32
    %1103 = arith.index_cast %1102 : i32 to index
    %c0_284 = arith.constant 0 : index
    %1104 = vector.load %arg12[%1103, %c0_284] : memref<128x128xf32, #tpu.memory_space<vmem>>, vector<8x128xf32>
    %cst_285 = arith.constant dense<0.000000e+00> : vector<8x128xf32>
    %1105 = tpu.matmul %1099, %800, %cst_285 {dimension_numbers = #tpu.dot_dimension_numbers<[1], [0], [0], [1], [0, 0, 1, 1], [], []>} : vector<8x32xf32>, vector<32x128xf32>, vector<8x128xf32> -> vector<8x128xf32>
    %1106 = arith.addf %1104, %1105 : vector<8x128xf32>
    %1107 = vector.extract_strided_slice %1106 {offsets = [0, 0], sizes = [8, 96], strides = [1, 1]} : vector<8x128xf32> to vector<8x96xf32>
    %1108 = arith.negf %1107 : vector<8x96xf32>
    %1109 = math.exp %1108 : vector<8x96xf32>
    %cst_286 = arith.constant 1.000000e+00 : f32
    %1110 = vector.broadcast %cst_286 : f32 to vector<8x96xf32>
    %1111 = arith.addf %1110, %1109 : vector<8x96xf32>
    %1112 = arith.divf %1110, %1111 : vector<8x96xf32>
    %1113 = vector.extract_strided_slice %1112 {offsets = [0, 32], sizes = [8, 32], strides = [1, 1]} : vector<8x96xf32> to vector<8x32xf32>
    %1114 = arith.mulf %1113, %1096 : vector<8x32xf32>
    %1115 = vector.extract_strided_slice %1112 {offsets = [0, 0], sizes = [8, 32], strides = [1, 1]} : vector<8x96xf32> to vector<8x32xf32>
    %1116 = vector.extract_strided_slice %1106 {offsets = [0, 96], sizes = [8, 32], strides = [1, 1]} : vector<8x128xf32> to vector<8x32xf32>
    %1117 = math.tanh %1116 : vector<8x32xf32>
    %1118 = arith.mulf %1115, %1117 : vector<8x32xf32>
    %1119 = arith.addf %1114, %1118 : vector<8x32xf32>
    %1120 = vector.extract_strided_slice %1112 {offsets = [0, 64], sizes = [8, 32], strides = [1, 1]} : vector<8x96xf32> to vector<8x32xf32>
    %1121 = math.tanh %1119 : vector<8x32xf32>
    %1122 = arith.mulf %1120, %1121 : vector<8x32xf32>
    %1123 = arith.addf %1100, %1122 : vector<8x32xf32>
    %c14_i32_287 = arith.constant 14 : i32
    %c8_i32_288 = arith.constant 8 : i32
    %1124 = arith.muli %c14_i32_287, %c8_i32_288 : i32
    %1125 = tpu.assume_multiple %1124, 8 : i32
    %1126 = arith.index_cast %1125 : i32 to index
    %c0_289 = arith.constant 0 : index
    %1127 = vector.load %arg12[%1126, %c0_289] : memref<128x128xf32, #tpu.memory_space<vmem>>, vector<8x128xf32>
    %cst_290 = arith.constant dense<0.000000e+00> : vector<8x128xf32>
    %1128 = tpu.matmul %1122, %800, %cst_290 {dimension_numbers = #tpu.dot_dimension_numbers<[1], [0], [0], [1], [0, 0, 1, 1], [], []>} : vector<8x32xf32>, vector<32x128xf32>, vector<8x128xf32> -> vector<8x128xf32>
    %1129 = arith.addf %1127, %1128 : vector<8x128xf32>
    %1130 = vector.extract_strided_slice %1129 {offsets = [0, 0], sizes = [8, 96], strides = [1, 1]} : vector<8x128xf32> to vector<8x96xf32>
    %1131 = arith.negf %1130 : vector<8x96xf32>
    %1132 = math.exp %1131 : vector<8x96xf32>
    %cst_291 = arith.constant 1.000000e+00 : f32
    %1133 = vector.broadcast %cst_291 : f32 to vector<8x96xf32>
    %1134 = arith.addf %1133, %1132 : vector<8x96xf32>
    %1135 = arith.divf %1133, %1134 : vector<8x96xf32>
    %1136 = vector.extract_strided_slice %1135 {offsets = [0, 32], sizes = [8, 32], strides = [1, 1]} : vector<8x96xf32> to vector<8x32xf32>
    %1137 = arith.mulf %1136, %1119 : vector<8x32xf32>
    %1138 = vector.extract_strided_slice %1135 {offsets = [0, 0], sizes = [8, 32], strides = [1, 1]} : vector<8x96xf32> to vector<8x32xf32>
    %1139 = vector.extract_strided_slice %1129 {offsets = [0, 96], sizes = [8, 32], strides = [1, 1]} : vector<8x128xf32> to vector<8x32xf32>
    %1140 = math.tanh %1139 : vector<8x32xf32>
    %1141 = arith.mulf %1138, %1140 : vector<8x32xf32>
    %1142 = arith.addf %1137, %1141 : vector<8x32xf32>
    %1143 = vector.extract_strided_slice %1135 {offsets = [0, 64], sizes = [8, 32], strides = [1, 1]} : vector<8x96xf32> to vector<8x32xf32>
    %1144 = math.tanh %1142 : vector<8x32xf32>
    %1145 = arith.mulf %1143, %1144 : vector<8x32xf32>
    %1146 = arith.addf %1123, %1145 : vector<8x32xf32>
    %c15_i32_292 = arith.constant 15 : i32
    %c8_i32_293 = arith.constant 8 : i32
    %1147 = arith.muli %c15_i32_292, %c8_i32_293 : i32
    %1148 = tpu.assume_multiple %1147, 8 : i32
    %1149 = arith.index_cast %1148 : i32 to index
    %c0_294 = arith.constant 0 : index
    %1150 = vector.load %arg12[%1149, %c0_294] : memref<128x128xf32, #tpu.memory_space<vmem>>, vector<8x128xf32>
    %cst_295 = arith.constant dense<0.000000e+00> : vector<8x128xf32>
    %1151 = tpu.matmul %1145, %800, %cst_295 {dimension_numbers = #tpu.dot_dimension_numbers<[1], [0], [0], [1], [0, 0, 1, 1], [], []>} : vector<8x32xf32>, vector<32x128xf32>, vector<8x128xf32> -> vector<8x128xf32>
    %1152 = arith.addf %1150, %1151 : vector<8x128xf32>
    %1153 = vector.extract_strided_slice %1152 {offsets = [0, 0], sizes = [8, 96], strides = [1, 1]} : vector<8x128xf32> to vector<8x96xf32>
    %1154 = arith.negf %1153 : vector<8x96xf32>
    %1155 = math.exp %1154 : vector<8x96xf32>
    %cst_296 = arith.constant 1.000000e+00 : f32
    %1156 = vector.broadcast %cst_296 : f32 to vector<8x96xf32>
    %1157 = arith.addf %1156, %1155 : vector<8x96xf32>
    %1158 = arith.divf %1156, %1157 : vector<8x96xf32>
    %1159 = vector.extract_strided_slice %1158 {offsets = [0, 32], sizes = [8, 32], strides = [1, 1]} : vector<8x96xf32> to vector<8x32xf32>
    %1160 = arith.mulf %1159, %1142 : vector<8x32xf32>
    %1161 = vector.extract_strided_slice %1158 {offsets = [0, 0], sizes = [8, 32], strides = [1, 1]} : vector<8x96xf32> to vector<8x32xf32>
    %1162 = vector.extract_strided_slice %1152 {offsets = [0, 96], sizes = [8, 32], strides = [1, 1]} : vector<8x128xf32> to vector<8x32xf32>
    %1163 = math.tanh %1162 : vector<8x32xf32>
    %1164 = arith.mulf %1161, %1163 : vector<8x32xf32>
    %1165 = arith.addf %1160, %1164 : vector<8x32xf32>
    %1166 = vector.extract_strided_slice %1158 {offsets = [0, 64], sizes = [8, 32], strides = [1, 1]} : vector<8x96xf32> to vector<8x32xf32>
    %1167 = math.tanh %1165 : vector<8x32xf32>
    %1168 = arith.mulf %1166, %1167 : vector<8x32xf32>
    %1169 = arith.addf %1146, %1168 : vector<8x32xf32>
    %c16_i32_297 = arith.constant 16 : i32
    %cst_298 = arith.constant 6.250000e-02 : f32
    %1170 = vector.broadcast %cst_298 : f32 to vector<8x32xf32>
    %1171 = arith.mulf %1169, %1170 : vector<8x32xf32>
    %c0_299 = arith.constant 0 : index
    %c0_300 = arith.constant 0 : index
    %1172 = vector.load %arg8[%c0_299, %c0_300] : memref<32x32xf32, #tpu.memory_space<vmem>>, vector<32x32xf32>
    %cst_301 = arith.constant dense<0.000000e+00> : vector<8x32xf32>
    %1173 = tpu.matmul %1171, %1172, %cst_301 {dimension_numbers = #tpu.dot_dimension_numbers<[1], [0], [0], [1], [0, 0, 1, 1], [], []>} : vector<8x32xf32>, vector<32x32xf32>, vector<8x32xf32> -> vector<8x32xf32>
    %c0_302 = arith.constant 0 : index
    %c0_303 = arith.constant 0 : index
    %1174 = vector.load %arg9[%c0_302, %c0_303] : memref<1x32xf32, #tpu.memory_space<vmem>>, vector<1x32xf32>
    %1175 = vector.broadcast %1174 : vector<1x32xf32> to vector<8x32xf32>
    %1176 = arith.addf %1173, %1175 : vector<8x32xf32>
    %1177 = tpu.iota {dimensions = array<i32: 0>} : vector<8x1xi32>
    %c2_i32_304 = arith.constant 2 : i32
    %1178 = vector.broadcast %c2_i32_304 : i32 to vector<8x1xi32>
    %1179 = arith.cmpi slt, %1177, %1178 : vector<8x1xi32>
    %cst_305 = arith.constant 0.000000e+00 : f32
    %1180 = vector.shape_cast %1179 : vector<8x1xi1> to vector<8x1xi1>
    %1181 = vector.broadcast %1180 : vector<8x1xi1> to vector<8x32xi1>
    %1182 = vector.broadcast %cst_305 : f32 to vector<8x32xf32>
    %1183 = arith.select %1181, %1176, %1182 : vector<8x32xi1>, vector<8x32xf32>
    %cst_306 = arith.constant dense<0.000000e+00> : vector<32xf32>
    %1184 = vector.multi_reduction <add>, %1183, %cst_306 [0] : vector<8x32xf32> to vector<32xf32>
    %1185 = vector.shape_cast %1184 : vector<32xf32> to vector<1x32xf32>
    %cst_307 = arith.constant 5.000000e-01 : f32
    %1186 = vector.broadcast %cst_307 : f32 to vector<1x32xf32>
    %1187 = arith.mulf %1185, %1186 : vector<1x32xf32>
    %1188 = arith.mulf %1187, %1187 : vector<1x32xf32>
    %cst_308 = arith.constant dense<0.000000e+00> : vector<1xf32>
    %1189 = vector.multi_reduction <add>, %1188, %cst_308 [1] : vector<1x32xf32> to vector<1xf32>
    %1190 = vector.shape_cast %1189 : vector<1xf32> to vector<1x1xf32>
    %cst_309 = arith.constant 1.000000e-24 : f32
    %1191 = vector.broadcast %cst_309 : f32 to vector<1x1xf32>
    %1192 = arith.maximumf %1190, %1191 : vector<1x1xf32>
    %1193 = math.rsqrt %1192 : vector<1x1xf32>
    %1194 = vector.broadcast %1193 : vector<1x1xf32> to vector<1x32xf32>
    %1195 = arith.mulf %1187, %1194 : vector<1x32xf32>
    %1196 = vector.shape_cast %1195 : vector<1x32xf32> to vector<1x1x32xf32>
    %1197 = vector.shape_cast %1196 : vector<1x1x32xf32> to vector<1x1x32xf32>
    %1198 = vector.broadcast %1197 : vector<1x1x32xf32> to vector<1x8x32xf32>
    %c0_310 = arith.constant 0 : index
    %c0_311 = arith.constant 0 : index
    %c0_312 = arith.constant 0 : index
    %1199 = vector.load %arg10[%c0_310, %c0_311, %c0_312] : memref<1x8x32xf32, #tpu.memory_space<vmem>>, vector<1x8x32xf32>
    tpu.vector_store %arg10[%c0_310, %c0_311, %c0_312], %1198 {strides = array<i32>} : memref<1x8x32xf32, #tpu.memory_space<vmem>>, vector<1x8x32xf32>,
    return
  }
  func.func @transform_0(%arg0: i32) -> (i32, i32, i32) {
    %c0_i32 = arith.constant 0 : i32
    %c0_i32_0 = arith.constant 0 : i32
    %c0_i32_1 = arith.constant 0 : i32
    return %arg0, %c0_i32, %c0_i32_0 : i32, i32, i32
  }
  func.func @transform_1(%arg0: i32) -> (i32, i32) {
    %c0_i32 = arith.constant 0 : i32
    %c0_i32_0 = arith.constant 0 : i32
    %c0_i32_1 = arith.constant 0 : i32
    return %c0_i32, %c0_i32_0 : i32, i32
  }
  func.func @transform_2(%arg0: i32) -> (i32, i32) {
    %c0_i32 = arith.constant 0 : i32
    %c0_i32_0 = arith.constant 0 : i32
    %c0_i32_1 = arith.constant 0 : i32
    return %c0_i32, %c0_i32_0 : i32, i32
  }
  func.func @transform_3(%arg0: i32) -> (i32, i32) {
    %c0_i32 = arith.constant 0 : i32
    %c0_i32_0 = arith.constant 0 : i32
    %c0_i32_1 = arith.constant 0 : i32
    return %c0_i32, %c0_i32_0 : i32, i32
  }
  func.func @transform_4(%arg0: i32) -> (i32, i32, i32) {
    %c0_i32 = arith.constant 0 : i32
    %c0_i32_0 = arith.constant 0 : i32
    %c0_i32_1 = arith.constant 0 : i32
    %c0_i32_2 = arith.constant 0 : i32
    return %c0_i32, %c0_i32_0, %c0_i32_1 : i32, i32, i32
  }
  func.func @transform_5(%arg0: i32) -> (i32, i32, i32) {
    %c0_i32 = arith.constant 0 : i32
    %c0_i32_0 = arith.constant 0 : i32
    %c0_i32_1 = arith.constant 0 : i32
    %c0_i32_2 = arith.constant 0 : i32
    return %c0_i32, %c0_i32_0, %c0_i32_1 : i32, i32, i32
  }
  func.func @transform_6(%arg0: i32) -> (i32, i32, i32) {
    %c0_i32 = arith.constant 0 : i32
    %c0_i32_0 = arith.constant 0 : i32
    %c0_i32_1 = arith.constant 0 : i32
    %c0_i32_2 = arith.constant 0 : i32
    return %c0_i32, %c0_i32_0, %c0_i32_1 : i32, i32, i32
  }
  func.func @transform_7(%arg0: i32) -> (i32, i32) {
    %c0_i32 = arith.constant 0 : i32
    %c0_i32_0 = arith.constant 0 : i32
    %c0_i32_1 = arith.constant 0 : i32
    return %c0_i32, %c0_i32_0 : i32, i32
  }
  func.func @transform_8(%arg0: i32) -> (i32, i32) {
    %c0_i32 = arith.constant 0 : i32
    %c0_i32_0 = arith.constant 0 : i32
    %c0_i32_1 = arith.constant 0 : i32
    return %c0_i32, %c0_i32_0 : i32, i32
  }
  func.func @transform_9(%arg0: i32) -> (i32, i32, i32) {
    %c0_i32 = arith.constant 0 : i32
    %c0_i32_0 = arith.constant 0 : i32
    %c0_i32_1 = arith.constant 0 : i32
    return %arg0, %c0_i32, %c0_i32_0 : i32, i32, i32
  }
}

</mosaic_0001>

<bundles_post_ra>
// kernel: tpu_custom_call.1
= control target key start
LH: loop header
LB: loop body
LE: loop exit
PB: predicated region body
PF: predicated region fallthrough
CT: control target
= control target key end

     0   :  { %14 = vsyncpa [#allocation5], 0  ;;  %s9077_s0 = inlined_call_operand.vmem [shape: f32[2,128,16], index: 0, kind: input, shape index: {}]   ;;  %s9078_s1 = inlined_call_operand.vmem [shape: f32[16,128], index: 1, kind: input, shape index: {}]   ;;  %s9079_s2 = inlined_call_operand.vmem [shape: f32[32,128], index: 2, kind: input, shape index: {}]   ;;  %s9080_s3 = inlined_call_operand.vmem [shape: f32[1,128], index: 3, kind: input, shape index: {}]   ;;  %s9081_s4 = inlined_call_operand.vmem [shape: f32[2,32,128], index: 4, kind: input, shape index: {}]   ;;  %s9082_s5 = inlined_call_operand.vmem [shape: f32[2,32,128], index: 5, kind: input, shape index: {}]   ;;  %s9083_s6 = inlined_call_operand.vmem [shape: f32[2,1,128], index: 6, kind: input, shape index: {}]   ;;  %s9084_s7 = inlined_call_operand.vmem [shape: f32[32,32], index: 7, kind: input, shape index: {}]   ;;  %s9085_s8 = inlined_call_operand.vmem [shape: f32[1,32], index: 8, kind: input, shape index: {}]   ;;  %s9086_s9 = inlined_call_operand.hbm [shape: f32[2,8,32], index: 9, kind: output, shape index: {}]  }
   0x1   :  { %16 = vsyncpa [#allocation5 + $0x1], 0  ;;  %s7850_s30 = smov 0   ;;  %s7852_s10 = smov 0  }
   0x2   :  { %s7854_s11 = smov 0   ;;  %s7856_s12 = smov 0  }
   0x3 LB: > { %s7871_s13 = sadd.s32 4294967295, %s7793_s12   ;;  %s6188_s14 = sadd.s32 4294967294, %s7793_s12   ;;  %s7793_s12 = sphi %s7856_s12, %s9092_s12   ;;  %s7789_s11 = sphi %s7854_s11, %s9091_s11   ;;  %s7785_s10 = sphi %s7852_s10, %s9090_s10   ;;  %s7781_s30 = sphi %s7850_s30, %s9089_s30  }
   0x4   : > { %s7875_s15 = sadd.s32 1, %s7793_s12   ;;  %s223_s16 = sadd.s32 1, %s7789_s11 }
   0x5   : > { %s220_s17 = ssub.s32 %s7793_s12, %s7875_s15  ;;  %p233_p0 = scmp.ne.s32.totalorder %s7789_s11, %s7785_s10 }
   0x6   : > { %p221_p1 = scmp.eq.s32.totalorder %s220_s17, 0  ;;  %p234_p2 = scmp.eq.s32.totalorder %s7871_s13, 1 }
   0x7   : > { %p239_p3 = scmp.ne.s32.totalorder %s7785_s10, %s7781_s30  ;;  %p240_p4 = scmp.eq.s32.totalorder %s6188_s14, 1 }
   0x8   : > { %s7886_s18 = scalar_select %p221_p1, %s7789_s11, %s223_s16  }
   0x9   : > { %p7888_p5 = por %p234_p2, %p233_p0  ;;  %p7892_p6 = por %p240_p4, %p239_p3 }
   0xa   : > { %p6191_p7 = scmp.ge.s32.totalorder %s7793_s12, 1  ;;  %p290_p8 = scmp.lt.s32.totalorder %s7793_s12, 3 }
   0xc   : > { %p291_p9 = pnand %p6191_p7, %p290_p8 }
   0xd   : > { %p326_p10 = scmp.lt.s32.totalorder (!%p291_p9), %s7871_s13, 1  ;;  %s7797_s28 = smov (!%p291_p9), 32  }
   0xe   : > { %294 = sbr.rel (%p291_p9) target bundleno = 32128 (0x7d80), region = 56  ;;  %s6351_s24 = sshll.u32 (!%p291_p9), %s7871_s13, 7 }
   0xf   : > { %s6127_s16 = scalar_lea.hbm (!%p291_p9), %s9086_s9, %s6351_s24  ;;  %s7799_s22 = smov (!%p291_p9), [#allocation4]  }
  0x13   : > { %v7901_v0 = vld [vmem:[%s9079_s2 + $0x18] sm:$0xff]  ;;  %v348_v1 = vld [vmem:[%s9078_s1 + $0x8] sm:$0xff]  ;;  %v7795_v2 = vmov 0.0   ;;  %v7911_v3 = vld [vmem:[%s9079_s2 + $0x10] sm:$0xff]  ;;  %s327_s29 = scalar_select %p326_p10, %s7871_s13, 1  ;;  %vm356_vm0 = vcmask 130048  }
  0x14   : > { %6686 = vmatprep.subr.mxu1 %v7795_v2  ;;  %6658 = vmatprep.subr.mxu0 %v348_v1  ;;  %v347_v4 = vld [vmem:[%s9078_s1] sm:$0xff]  ;;  %v7922_v5 = vld [vmem:[%s9079_s2 + $0x8] sm:$0xff]  ;;  %vm7796_vm1 = vmmov 0   ;;  %vm571_vm2 = vcmask 261120  }
  0x15   : > { %6687 = vmatpush3.msra.mxu1 %v7901_v0  ;;  %6659 = vmatpush3.msra.mxu0 %v348_v1  ;;  %s6354_s17 = sshll.u32 %s327_s29, 7  ;;  %v7934_v6 = vld [vmem:[%s9079_s2] sm:$0xff]  ;;  %s7798_s29 = smov 64  }
  0x16   : > { %6688 = vmatprep.subr.mxu1 %v7795_v2  ;;  %6660 = vmatprep.subr.mxu0 %v347_v4  ;;  %s7929_s23 = scalar_lea.vmem %s9077_s0, %s6354_s17  ;;  %v7969_v11 = vld [vmem:[%s9080_s3] ss:$0 sm:$0xff] }
  0x17   : > { %6689 = vmatpush3.msra.mxu1 %v7911_v3  ;;  %6661 = vmatpush3.msra.mxu0 %v347_v4  ;;  %v331_v7 = vld [vmem:[%s7929_s23] sm:$0xff]  ;;  %v332_v8 = vld [vmem:[%s7929_s23 + $0x8] sm:$0xff]  ;;  %v333_v44 = vld [vmem:[%s7929_s23 + $0x10] sm:$0xff] }
  0x18   : > { %6690 = vmatprep.subr.mxu1 %v7795_v2  ;;  %6694 = vmatprep.mubr.msk.f32.mxu1 %vm7796_vm1, %v7795_v2  ;;  %v334_v45 = vld [vmem:[%s7929_s23 + $0x18] sm:$0xff] }
  0x19   : > { %6691 = vmatpush3.msra.mxu1 %v7922_v5  ;;  %6730 = vmatprep.subr.mxu0 %v7795_v2 }
  0x1a   : > { %6662 = vmatprep.mubr.msk.f32.mxu0 %vm356_vm0, %v331_v7  ;;  %6692 = vmatprep.subr.mxu1 %v7795_v2 }
  0x1b   : > { %6663 = vmatmul.mubr.msk.f32.vlgmr.msra.gmra.mxu0 %vm356_vm0, %v332_v8  ;;  %6693 = vmatpush3.msra.mxu1 %v7934_v6 }
  0x1c   : > { %6695 = vmatmul.mubr.f32.vlgmr.msra.gmra.mxu1 %v7795_v2  ;;  %6697 = vmatprep.subr.mxu1 %v7795_v2 }
  0x1d   : > { %6698 = vmatpush3.msra.mxu1 %v7901_v0  ;;  %6705 = vmatprep.mubr.msk.f32.mxu1 %vm7796_vm1, %v7795_v2 }
  0x1e   : > { %6699 = vmatprep.subr.mxu1 %v7795_v2  ;;  %6731 = vmatpush3.msra.mxu0 %v7901_v0 }
  0x1f   : > { %6700 = vmatpush3.msra.mxu1 %v7911_v3  ;;  %6732 = vmatprep.subr.mxu0 %v7795_v2 }
  0x20   : > { %6701 = vmatprep.subr.mxu1 %v7795_v2  ;;  %6733 = vmatpush3.msra.mxu0 %v7911_v3 }
  0x21   : > { %6702 = vmatpush3.msra.mxu1 %v7922_v5  ;;  %6734 = vmatprep.subr.mxu0 %v7795_v2 }
  0x22   : > { %6703 = vmatprep.subr.mxu1 %v7795_v2  ;;  %6735 = vmatpush3.msra.mxu0 %v7922_v5 }
  0x23   : > { %6704 = vmatpush3.msra.mxu1 %v7934_v6  ;;  %6736 = vmatprep.subr.mxu0 %v7795_v2 }
  0x24   : > { %6708 = vmatprep.subr.mxu1 %v7795_v2  ;;  %6737 = vmatpush3.msra.mxu0 %v7934_v6 }
  0x25   : > { %6752 = vmatprep.subr.mxu0 %v7795_v2  ;;  %6665 = vmatprep.mubr.msk.f32.mxu0 %vm356_vm0, %v333_v44 }
  0x26   : > { %6666 = vmatmul.mubr.msk.f32.gmra.mxu0 %vm356_vm0, %v334_v45 }
  0xdb   : > { %v6664_v9 = vpop.f32.mrf.mxu0 }
  0xdc   : > { %v641_v10 = vpop.f32.mrf.mxu1  ;;  %v477_v30 = vadd.f32 %v6664_v9, %v7969_v11 }
  0xdd   : > { %v471_v12 = vpop.f32.mrf.mxu0 }
  0xde   : > { %v472_v13 = vadd.f32 %v7969_v11, %v471_v12  ;;  %v6696_v14 = vpop.f32.mrf.mxu1 }
  0xe0   : > { %v645_v15 = vadd.f32 %v641_v10, %v472_v13 }
  0xe2   : > { %7332 = vtanh.f32 %v645_v15  ;;  %v6212_v17 = vmul.f32 -1.442695, %v645_v15 }
  0xe4   : > { %7334 = vpow2.f32 %v6212_v17 }
  0xe6   : > { %v6667_v50 = vpop.f32.mrf.mxu0 }
  0xe7   : > { %v487_v12 = vadd.f32 %v6667_v50, %v7969_v11 }
  0xe8   : > { %v481_v51 = vpop.f32.mrf.mxu0 }
  0xe9   : > { %v482_v52 = vadd.f32 %v7969_v11, %v481_v51 }
  0xef   : > { %v7333_v16 = vpop.eup %7332 }
  0xf0   : > { %655 = vrot.lane.b32.xlu0 %v7333_v16, %s7797_s28 }
  0xf1   : > { %v7335_v18 = vpop.eup %7334 }
  0xf2   : > { %v649_v19 = vadd.f32 1.0, %v7335_v18 }
  0xf4   : > { %7336 = vrcp.f32 %v649_v19 }
 0x101   : > { %v7337_v20 = vpop.eup %7336 }
 0x102   : > { %v652_v23 = vmul.f32 0.0, %v7337_v20 }
 0x162   : > { %v656_v21 = vpop.permute.xlu0 %655 }
 0x163   : > { %v658_v22 = vmul.f32 %v7337_v20, %v656_v21 }
 0x165   : > { %660 = vrot.lane.b32.xlu0 %v658_v22, %s7797_s28 }
 0x1d7   : > { %v661_v24 = vpop.permute.xlu0 %660 }
 0x1d8   : > { %v663_v25 = vadd.f32 %v661_v24, %v652_v23 }
 0x1da   : > { %7338 = vtanh.f32 %v663_v25 }
 0x1e7   : > { %v7339_v26 = vpop.eup %7338 }
 0x1e8   : > { %666 = vrot.lane.b32.xlu1 %v7339_v26, %s7797_s28  ;;  %v335_v26 = vld [vmem:[%s7929_s23 + $0x20] sm:$0xff] }
 0x1e9   : > { %6668 = vmatprep.mubr.msk.f32.mxu0 %vm356_vm0, %v335_v26 }
 0x25a   : > { %v667_v27 = vpop.permute.xlu1 %666 }
 0x25b   : > { %v669_v28 = vmul.f32 %v7337_v20, %v667_v27  ;;  %v336_v27 = vld [vmem:[%s7929_s23 + $0x28] sm:$0xff] }
 0x25c   : > { %6669 = vmatmul.mubr.msk.f32.gmra.mxu0 %vm356_vm0, %v336_v27 }
 0x25d   : > { %671 = vrot.lane.b32.xlu1 %v669_v28, %s7798_s29  ;;  %v337_v28 = vld [vmem:[%s7929_s23 + $0x30] sm:$0xff] }
 0x25e   : > { %6671 = vmatprep.mubr.msk.f32.mxu0 %vm356_vm0, %v337_v28 }
 0x2cf   : > { %v672_v29 = vpop.permute.xlu1 %671 }
 0x2d0   : > { %674 = vst.msk [vmem:[#allocation2] sm:$0xff] %vm571_vm2, %v672_v29  ;;  %6706 = vmatmul.mubr.msk.f32.vlgmr.msra.gmra.mxu1 %vm571_vm2, %v672_v29  ;;  %v338_v29 = vld [vmem:[%s7929_s23 + $0x38] sm:$0xff] }
 0x2d1   : > { %6709 = vmatpush3.msra.mxu1 %v7901_v0  ;;  %6716 = vmatprep.mubr.msk.f32.mxu1 %vm7796_vm1, %v7795_v2 }
 0x2d2   : > { %6710 = vmatprep.subr.mxu1 %v7795_v2  ;;  %6672 = vmatmul.mubr.msk.f32.gmra.mxu0 %vm356_vm0, %v338_v29 }
 0x2d3   : > { %6711 = vmatpush3.msra.mxu1 %v7911_v3 }
 0x2d4   : > { %6712 = vmatprep.subr.mxu1 %v7795_v2 }
 0x2d5   : > { %6713 = vmatpush3.msra.mxu1 %v7922_v5 }
 0x2d6   : > { %6714 = vmatprep.subr.mxu1 %v7795_v2 }
 0x2d7   : > { %6715 = vmatpush3.msra.mxu1 %v7934_v6 }
 0x2d8   : > { %6719 = vmatprep.subr.mxu1 %v7795_v2 }
 0x390   : > { %v745_v31 = vpop.f32.mrf.mxu1 }
 0x391   : > { %v749_v32 = vadd.f32 %v745_v31, %v477_v30  ;;  %v339_v30 = vld [vmem:[%s7929_s23 + $0x40] sm:$0xff]  ;;  %v340_v31 = vld [vmem:[%s7929_s23 + $0x48] sm:$0xff] }
 0x392   : > { %v6707_v33 = vpop.f32.mrf.mxu1  ;;  %6674 = vmatprep.mubr.msk.f32.mxu0 %vm356_vm0, %v339_v30 }
 0x393   : > { %7340 = vtanh.f32 %v749_v32  ;;  %v6214_v35 = vmul.f32 -1.442695, %v749_v32  ;;  %v341_v32 = vld [vmem:[%s7929_s23 + $0x50] sm:$0xff]  ;;  %6675 = vmatmul.mubr.msk.f32.gmra.mxu0 %vm356_vm0, %v340_v31 }
 0x394   : > { %6677 = vmatprep.mubr.msk.f32.mxu0 %vm356_vm0, %v341_v32 }
 0x395   : > { %7342 = vpow2.f32 %v6214_v35  ;;  %v343_v35 = vld [vmem:[%s7929_s23 + $0x60] sm:$0xff] }
 0x3a0   : > { %v7341_v34 = vpop.eup %7340 }
 0x3a1   : > { %759 = vrot.lane.b32.xlu0 %v7341_v34, %s7797_s28  ;;  %v342_v34 = vld [vmem:[%s7929_s23 + $0x58] sm:$0xff] }
 0x3a2   : > { %v7343_v36 = vpop.eup %7342  ;;  %6678 = vmatmul.mubr.msk.f32.gmra.mxu0 %vm356_vm0, %v342_v34 }
 0x3a3   : > { %v753_v37 = vadd.f32 1.0, %v7343_v36  ;;  %6680 = vmatprep.mubr.msk.f32.mxu0 %vm356_vm0, %v343_v35  ;;  %v344_v36 = vld [vmem:[%s7929_s23 + $0x68] sm:$0xff] }
 0x3a5   : > { %7344 = vrcp.f32 %v753_v37  ;;  %v345_v37 = vld [vmem:[%s7929_s23 + $0x70] sm:$0xff] }
 0x3a6   : > { %6681 = vmatmul.mubr.msk.f32.gmra.mxu0 %vm356_vm0, %v344_v36 }
 0x3a7   : > { %6683 = vmatprep.mubr.msk.f32.mxu0 %vm356_vm0, %v345_v37 }
 0x3b2   : > { %v7345_v38 = vpop.eup %7344 }
 0x3b3   : > { %v756_v41 = vmul.f32 %v7345_v38, %v663_v25 }
 0x413   : > { %v760_v39 = vpop.permute.xlu0 %759 }
 0x414   : > { %v762_v40 = vmul.f32 %v7345_v38, %v760_v39 }
 0x416   : > { %764 = vrot.lane.b32.xlu1 %v762_v40, %s7797_s28 }
 0x488   : > { %v765_v42 = vpop.permute.xlu1 %764 }
 0x489   : > { %v767_v43 = vadd.f32 %v765_v42, %v756_v41  ;;  %v6670_v42 = vpop.f32.mrf.mxu0 }
 0x48b   : > { %7346 = vtanh.f32 %v767_v43 }
 0x498   : > { %v7347_v46 = vpop.eup %7346 }
 0x499   : > { %770 = vrot.lane.b32.xlu0 %v7347_v46, %s7797_s28 }
 0x50b   : > { %v771_v47 = vpop.permute.xlu0 %770 }
 0x50c   : > { %v773_v48 = vmul.f32 %v7345_v38, %v771_v47  ;;  %v346_v38 = vld [vmem:[%s7929_s23 + $0x78] sm:$0xff]  ;;  %s7737_s23 = sshll.u32 %s7799_s22, 4  ;;  %s7738_s23 = int_to_ptr.vmem [resolvable:$false] %s7737_s23 }
 0x50d   : > { %6684 = vmatmul.mubr.msk.f32.gmra.mxu0 %vm356_vm0, %v346_v38  ;;  %s7739_s13 = scalar_lea.vmem %s7738_s23, 256 }
 0x50e   : > { %775 = vrot.lane.b32.xlu1 %v773_v48, %s7798_s29  ;;  %6738 = vmatprep.mubr.msk.f32.mxu0 %vm7796_vm1, %v7795_v2 }
 0x580   : > { %v776_v49 = vpop.permute.xlu1 %775 }
 0x581   : > { %779 = vst.msk [vmem:[#allocation2 + $0x8] sm:$0xff] %vm571_vm2, %v776_v49  ;;  %6717 = vmatmul.mubr.msk.f32.vlgmr.msra.gmra.mxu1 %vm571_vm2, %v776_v49 }
 0x582   : > { %6720 = vmatpush3.msra.mxu1 %v7901_v0  ;;  %6727 = vmatprep.mubr.msk.f32.mxu1 %vm7796_vm1, %v7795_v2 }
 0x583   : > { %6721 = vmatprep.subr.mxu1 %v7795_v2 }
 0x584   : > { %6722 = vmatpush3.msra.mxu1 %v7911_v3 }
 0x585   : > { %6723 = vmatprep.subr.mxu1 %v7795_v2 }
 0x586   : > { %6724 = vmatpush3.msra.mxu1 %v7922_v5 }
 0x587   : > { %6725 = vmatprep.subr.mxu1 %v7795_v2 }
 0x588   : > { %6726 = vmatpush3.msra.mxu1 %v7934_v6 }
 0x589   : > { %6741 = vmatprep.subr.mxu1 %v7795_v2 }
 0x641   : > { %v850_v53 = vpop.f32.mrf.mxu1 }
 0x642   : > { %v854_v54 = vadd.f32 %v850_v53, %v482_v52 }
 0x643   : > { %v6718_v55 = vpop.f32.mrf.mxu1 }
 0x644   : > { %7348 = vtanh.f32 %v854_v54  ;;  %v6216_v57 = vmul.f32 -1.442695, %v854_v54 }
 0x646   : > { %7350 = vpow2.f32 %v6216_v57 }
 0x651   : > { %v7349_v56 = vpop.eup %7348 }
 0x652   : > { %864 = vrot.lane.b32.xlu0 %v7349_v56, %s7797_s28 }
 0x653   : > { %v7351_v58 = vpop.eup %7350 }
 0x654   : > { %v858_v59 = vadd.f32 1.0, %v7351_v58 }
 0x656   : > { %7352 = vrcp.f32 %v858_v59 }
 0x663   : > { %v7353_v60 = vpop.eup %7352 }
 0x664   : > { %v861_v63 = vmul.f32 %v7353_v60, %v767_v43  ;;  %v491_v43 = vpop.f32.mrf.mxu0 }
 0x665   : > { %v492_v54 = vadd.f32 %v7969_v11, %v491_v43 }
 0x666   : > { %v8072_v44 = vpop.f32.mrf.mxu0 }
 0x668   : > { %v8074_v45 = vpop.f32.mrf.mxu0 }
 0x669   : > { %v502_v32 = vadd.f32 %v7969_v11, %v8074_v45 }
 0x66a   : > { %v8076_v46 = vpop.f32.mrf.mxu0 }
 0x66c   : > { %v8078_v47 = vpop.f32.mrf.mxu0 }
 0x66e   : > { %v8080_v48 = vpop.f32.mrf.mxu0 }
 0x670   : > { %v8082_v49 = vpop.f32.mrf.mxu0 }
 0x672   : > { %v8084_v50 = vpop.f32.mrf.mxu0 }
 0x674   : > { %v8086_v51 = vpop.f32.mrf.mxu0 }
 0x676   : > { %v8088_v52 = vpop.f32.mrf.mxu0 }
 0x678   : > { %v8090_v53 = vpop.f32.mrf.mxu0 }
 0x6c4   : > { %v865_v61 = vpop.permute.xlu0 %864 }
 0x6c5   : > { %v867_v62 = vmul.f32 %v7353_v60, %v865_v61 }
 0x6c7   : > { %869 = vrot.lane.b32.xlu1 %v867_v62, %s7797_s28 }
 0x739   : > { %v870_v1 = vpop.permute.xlu1 %869 }
 0x73a   : > { %v872_v4 = vadd.f32 %v870_v1, %v861_v63 }
 0x73c   : > { %7354 = vtanh.f32 %v872_v4 }
 0x749   : > { %v7355_v7 = vpop.eup %7354 }
 0x74a   : > { %875 = vrot.lane.b32.xlu0 %v7355_v7, %s7797_s28 }
 0x7bc   : > { %v876_v8 = vpop.permute.xlu0 %875 }
 0x7bd   : > { %v878_v9 = vmul.f32 %v7353_v60, %v876_v8 }
 0x7bf   : > { %880 = vrot.lane.b32.xlu1 %v878_v9, %s7798_s29 }
 0x831   : > { %v881_v10 = vpop.permute.xlu1 %880 }
 0x832   : > { %884 = vst.msk [vmem:[#allocation2 + $0x10] sm:$0xff] %vm571_vm2, %v881_v10  ;;  %6728 = vmatmul.mubr.msk.f32.vlgmr.msra.gmra.mxu1 %vm571_vm2, %v881_v10 }
 0x833   : > { %6742 = vmatpush3.msra.mxu1 %v7901_v0  ;;  %6749 = vmatprep.mubr.msk.f32.mxu1 %vm7796_vm1, %v7795_v2 }
 0x834   : > { %6743 = vmatprep.subr.mxu1 %v7795_v2 }
 0x835   : > { %6744 = vmatpush3.msra.mxu1 %v7911_v3 }
 0x836   : > { %6745 = vmatprep.subr.mxu1 %v7795_v2 }
 0x837   : > { %6746 = vmatpush3.msra.mxu1 %v7922_v5 }
 0x838   : > { %6747 = vmatprep.subr.mxu1 %v7795_v2 }
 0x839   : > { %6748 = vmatpush3.msra.mxu1 %v7934_v6 }
 0x83a   : > { %6763 = vmatprep.subr.mxu1 %v7795_v2 }
 0x8f2   : > { %v955_v13 = vpop.f32.mrf.mxu1 }
 0x8f3   : > { %v959_v14 = vadd.f32 %v955_v13, %v487_v12 }
 0x8f4   : > { %v6729_v15 = vpop.f32.mrf.mxu1 }
 0x8f5   : > { %7356 = vtanh.f32 %v959_v14  ;;  %v6218_v17 = vmul.f32 -1.442695, %v959_v14  ;;  %v497_v14 = vadd.f32 %v6670_v42, %v7969_v11 }
 0x8f7   : > { %7358 = vpow2.f32 %v6218_v17 }
 0x902   : > { %v7357_v16 = vpop.eup %7356 }
 0x903   : > { %969 = vrot.lane.b32.xlu0 %v7357_v16, %s7797_s28 }
 0x904   : > { %v7359_v18 = vpop.eup %7358 }
 0x905   : > { %v963_v19 = vadd.f32 1.0, %v7359_v18 }
 0x907   : > { %7360 = vrcp.f32 %v963_v19 }
 0x914   : > { %v7361_v20 = vpop.eup %7360 }
 0x915   : > { %v966_v23 = vmul.f32 %v7361_v20, %v872_v4 }
 0x975   : > { %v970_v21 = vpop.permute.xlu0 %969 }
 0x976   : > { %v972_v22 = vmul.f32 %v7361_v20, %v970_v21 }
 0x978   : > { %974 = vrot.lane.b32.xlu1 %v972_v22, %s7797_s28 }
 0x9ea   : > { %v975_v24 = vpop.permute.xlu1 %974 }
 0x9eb   : > { %v8029_v25 = vadd.f32 %v975_v24, %v966_v23 }
 0x9ed   : > { %7362 = vtanh.f32 %v8029_v25 }
 0x9fa   : > { %v7363_v33 = vpop.eup %7362 }
 0x9fb   : > { %980 = vrot.lane.b32.xlu0 %v7363_v33, %s7797_s28 }
 0xa6d   : > { %v981_v39 = vpop.permute.xlu0 %980 }
 0xa6e   : > { %v983_v40 = vmul.f32 %v7361_v20, %v981_v39 }
 0xa70   : > { %985 = vrot.lane.b32.xlu1 %v983_v40, %s7798_s29 }
 0xae2   : > { %v986_v41 = vpop.permute.xlu1 %985 }
 0xae3   : > { %989 = vst.msk [vmem:[#allocation2 + $0x18] sm:$0xff] %vm571_vm2, %v986_v41  ;;  %6739 = vmatmul.mubr.msk.f32.vlgmr.msra.gmra.mxu0 %vm571_vm2, %v986_v41 }
 0xae4   : > { %6753 = vmatpush3.msra.mxu0 %v7901_v0  ;;  %6760 = vmatprep.mubr.msk.f32.mxu0 %vm7796_vm1, %v7795_v2 }
 0xae5   : > { %6754 = vmatprep.subr.mxu0 %v7795_v2 }
 0xae6   : > { %6755 = vmatpush3.msra.mxu0 %v7911_v3 }
 0xae7   : > { %6756 = vmatprep.subr.mxu0 %v7795_v2 }
 0xae8   : > { %6757 = vmatpush3.msra.mxu0 %v7922_v5 }
 0xae9   : > { %6758 = vmatprep.subr.mxu0 %v7795_v2 }
 0xaea   : > { %6759 = vmatpush3.msra.mxu0 %v7934_v6 }
 0xaeb   : > { %6774 = vmatprep.subr.mxu0 %v7795_v2 }
 0xba3   : > { %v1060_v55 = vpop.f32.mrf.mxu0 }
 0xba4   : > { %v1064_v56 = vadd.f32 %v1060_v55, %v492_v54 }
 0xba5   : > { %v6740_v57 = vpop.f32.mrf.mxu0 }
 0xba6   : > { %7364 = vtanh.f32 %v1064_v56  ;;  %v6220_v59 = vmul.f32 -1.442695, %v1064_v56 }
 0xba8   : > { %7366 = vpow2.f32 %v6220_v59  ;;  %v507_v59 = vadd.f32 %v8072_v44, %v7969_v11 }
 0xbb3   : > { %v7365_v58 = vpop.eup %7364 }
 0xbb4   : > { %1074 = vrot.lane.b32.xlu0 %v7365_v58, %s7797_s28 }
 0xbb5   : > { %v7367_v60 = vpop.eup %7366 }
 0xbb6   : > { %v1068_v61 = vadd.f32 1.0, %v7367_v60 }
 0xbb8   : > { %7368 = vrcp.f32 %v1068_v61 }
 0xbc5   : > { %v7369_v62 = vpop.eup %7368 }
 0xbc6   : > { %v1071_v4 = vmul.f32 %v7369_v62, %v8029_v25 }
 0xc26   : > { %v1075_v63 = vpop.permute.xlu0 %1074 }
 0xc27   : > { %v1077_v1 = vmul.f32 %v7369_v62, %v1075_v63 }
 0xc29   : > { %1079 = vrot.lane.b32.xlu1 %v1077_v1, %s7797_s28 }
 0xc9b   : > { %v1080_v7 = vpop.permute.xlu1 %1079 }
 0xc9c   : > { %v1082_v8 = vadd.f32 %v1080_v7, %v1071_v4 }
 0xc9e   : > { %7370 = vtanh.f32 %v1082_v8 }
 0xcab   : > { %v7371_v9 = vpop.eup %7370 }
 0xcac   : > { %1085 = vrot.lane.b32.xlu0 %v7371_v9, %s7797_s28 }
 0xd1e   : > { %v1086_v10 = vpop.permute.xlu0 %1085 }
 0xd1f   : > { %v1088_v12 = vmul.f32 %v7369_v62, %v1086_v10 }
 0xd21   : > { %1090 = vrot.lane.b32.xlu1 %v1088_v12, %s7798_s29 }
 0xd93   : > { %v1091_v13 = vpop.permute.xlu1 %1090 }
 0xd94   : > { %1094 = vst.msk [vmem:[#allocation2 + $0x20] sm:$0xff] %vm571_vm2, %v1091_v13  ;;  %6750 = vmatmul.mubr.msk.f32.vlgmr.msra.gmra.mxu1 %vm571_vm2, %v1091_v13 }
 0xd95   : > { %6764 = vmatpush3.msra.mxu1 %v7901_v0  ;;  %6771 = vmatprep.mubr.msk.f32.mxu1 %vm7796_vm1, %v7795_v2 }
 0xd96   : > { %6765 = vmatprep.subr.mxu1 %v7795_v2 }
 0xd97   : > { %6766 = vmatpush3.msra.mxu1 %v7911_v3 }
 0xd98   : > { %6767 = vmatprep.subr.mxu1 %v7795_v2 }
 0xd99   : > { %6768 = vmatpush3.msra.mxu1 %v7922_v5 }
 0xd9a   : > { %6769 = vmatprep.subr.mxu1 %v7795_v2 }
 0xd9b   : > { %6770 = vmatpush3.msra.mxu1 %v7934_v6 }
 0xd9c   : > { %6785 = vmatprep.subr.mxu1 %v7795_v2 }
 0xe54   : > { %v1165_v15 = vpop.f32.mrf.mxu1 }
 0xe55   : > { %v1169_v16 = vadd.f32 %v1165_v15, %v497_v14 }
 0xe56   : > { %v6751_v17 = vpop.f32.mrf.mxu1 }
 0xe57   : > { %7372 = vtanh.f32 %v1169_v16  ;;  %v6222_v19 = vmul.f32 -1.442695, %v1169_v16 }
 0xe59   : > { %7374 = vpow2.f32 %v6222_v19 }
 0xe64   : > { %v7373_v18 = vpop.eup %7372 }
 0xe65   : > { %1179 = vrot.lane.b32.xlu0 %v7373_v18, %s7797_s28  ;;  %v512_v18 = vadd.f32 %v7969_v11, %v8078_v47 }
 0xe66   : > { %v7375_v20 = vpop.eup %7374 }
 0xe67   : > { %v1173_v21 = vadd.f32 1.0, %v7375_v20 }
 0xe69   : > { %7376 = vrcp.f32 %v1173_v21 }
 0xe76   : > { %v7377_v22 = vpop.eup %7376 }
 0xe77   : > { %v1176_v25 = vmul.f32 %v7377_v22, %v1082_v8 }
 0xed7   : > { %v1180_v23 = vpop.permute.xlu0 %1179 }
 0xed8   : > { %v1182_v24 = vmul.f32 %v7377_v22, %v1180_v23 }
 0xeda   : > { %1184 = vrot.lane.b32.xlu1 %v1182_v24, %s7797_s28 }
 0xf4c   : > { %v1185_v26 = vpop.permute.xlu1 %1184 }
 0xf4d   : > { %v1187_v27 = vadd.f32 %v1185_v26, %v1176_v25 }
 0xf4f   : > { %7378 = vtanh.f32 %v1187_v27 }
 0xf5c   : > { %v7379_v28 = vpop.eup %7378 }
 0xf5d   : > { %1190 = vrot.lane.b32.xlu0 %v7379_v28, %s7797_s28 }
 0xfcf   : > { %v1191_v29 = vpop.permute.xlu0 %1190 }
 0xfd0   : > { %v1193_v30 = vmul.f32 %v7377_v22, %v1191_v29 }
 0xfd2   : > { %1195 = vrot.lane.b32.xlu1 %v1193_v30, %s7798_s29 }
0x1044   : > { %v1196_v31 = vpop.permute.xlu1 %1195 }
0x1045   : > { %1199 = vst.msk [vmem:[#allocation2 + $0x28] sm:$0xff] %vm571_vm2, %v1196_v31  ;;  %6761 = vmatmul.mubr.msk.f32.vlgmr.msra.gmra.mxu0 %vm571_vm2, %v1196_v31 }
0x1046   : > { %6775 = vmatpush3.msra.mxu0 %v7901_v0  ;;  %6782 = vmatprep.mubr.msk.f32.mxu0 %vm7796_vm1, %v7795_v2 }
0x1047   : > { %6776 = vmatprep.subr.mxu0 %v7795_v2 }
0x1048   : > { %6777 = vmatpush3.msra.mxu0 %v7911_v3 }
0x1049   : > { %6778 = vmatprep.subr.mxu0 %v7795_v2 }
0x104a   : > { %6779 = vmatpush3.msra.mxu0 %v7922_v5 }
0x104b   : > { %6780 = vmatprep.subr.mxu0 %v7795_v2 }
0x104c   : > { %6781 = vmatpush3.msra.mxu0 %v7934_v6 }
0x104d   : > { %6796 = vmatprep.subr.mxu0 %v7795_v2 }
0x1105   : > { %v1270_v33 = vpop.f32.mrf.mxu0 }
0x1106   : > { %v1274_v34 = vadd.f32 %v1270_v33, %v502_v32 }
0x1107   : > { %v6762_v35 = vpop.f32.mrf.mxu0 }
0x1108   : > { %7380 = vtanh.f32 %v1274_v34  ;;  %v6224_v37 = vmul.f32 -1.442695, %v1274_v34  ;;  %v517_v35 = vadd.f32 %v8076_v46, %v7969_v11 }
0x110a   : > { %7382 = vpow2.f32 %v6224_v37 }
0x1115   : > { %v7381_v36 = vpop.eup %7380 }
0x1116   : > { %1284 = vrot.lane.b32.xlu0 %v7381_v36, %s7797_s28 }
0x1117   : > { %v7383_v38 = vpop.eup %7382 }
0x1118   : > { %v1278_v39 = vadd.f32 1.0, %v7383_v38 }
0x111a   : > { %7384 = vrcp.f32 %v1278_v39 }
0x1127   : > { %v7385_v40 = vpop.eup %7384 }
0x1128   : > { %v1281_v43 = vmul.f32 %v7385_v40, %v1187_v27 }
0x1188   : > { %v1285_v41 = vpop.permute.xlu0 %1284 }
0x1189   : > { %v1287_v42 = vmul.f32 %v7385_v40, %v1285_v41 }
0x118b   : > { %1289 = vrot.lane.b32.xlu1 %v1287_v42, %s7797_s28 }
0x11fd   : > { %v1290_v54 = vpop.permute.xlu1 %1289 }
0x11fe   : > { %v1292_v45 = vadd.f32 %v1290_v54, %v1281_v43 }
0x1200   : > { %7386 = vtanh.f32 %v1292_v45 }
0x120d   : > { %v7387_v55 = vpop.eup %7386 }
0x120e   : > { %1295 = vrot.lane.b32.xlu0 %v7387_v55, %s7797_s28 }
0x1280   : > { %v1296_v56 = vpop.permute.xlu0 %1295 }
0x1281   : > { %v1298_v57 = vmul.f32 %v7385_v40, %v1296_v56 }
0x1283   : > { %1300 = vrot.lane.b32.xlu1 %v1298_v57, %s7798_s29 }
0x12f5   : > { %v1301_v58 = vpop.permute.xlu1 %1300 }
0x12f6   : > { %1304 = vst.msk [vmem:[#allocation2 + $0x30] sm:$0xff] %vm571_vm2, %v1301_v58  ;;  %6772 = vmatmul.mubr.msk.f32.vlgmr.msra.gmra.mxu1 %vm571_vm2, %v1301_v58 }
0x12f7   : > { %6786 = vmatpush3.msra.mxu1 %v7901_v0  ;;  %6793 = vmatprep.mubr.msk.f32.mxu1 %vm7796_vm1, %v7795_v2 }
0x12f8   : > { %6787 = vmatprep.subr.mxu1 %v7795_v2 }
0x12f9   : > { %6788 = vmatpush3.msra.mxu1 %v7911_v3 }
0x12fa   : > { %6789 = vmatprep.subr.mxu1 %v7795_v2 }
0x12fb   : > { %6790 = vmatpush3.msra.mxu1 %v7922_v5 }
0x12fc   : > { %6791 = vmatprep.subr.mxu1 %v7795_v2 }
0x12fd   : > { %6792 = vmatpush3.msra.mxu1 %v7934_v6 }
0x12fe   : > { %6807 = vmatprep.subr.mxu1 %v7795_v2 }
0x13b6   : > { %v1375_v60 = vpop.f32.mrf.mxu1 }
0x13b7   : > { %v1379_v61 = vadd.f32 %v1375_v60, %v507_v59 }
0x13b8   : > { %v6773_v62 = vpop.f32.mrf.mxu1 }
0x13b9   : > { %7388 = vtanh.f32 %v1379_v61  ;;  %v6226_v1 = vmul.f32 -1.442695, %v1379_v61  ;;  %v522_v61 = vadd.f32 %v7969_v11, %v8082_v49 }
0x13bb   : > { %7390 = vpow2.f32 %v6226_v1 }
0x13c6   : > { %v7389_v63 = vpop.eup %7388 }
0x13c7   : > { %1389 = vrot.lane.b32.xlu0 %v7389_v63, %s7797_s28 }
0x13c8   : > { %v7391_v4 = vpop.eup %7390 }
0x13c9   : > { %v1383_v7 = vadd.f32 1.0, %v7391_v4 }
0x13cb   : > { %7392 = vrcp.f32 %v1383_v7 }
0x13d8   : > { %v7393_v8 = vpop.eup %7392 }
0x13d9   : > { %v1386_v12 = vmul.f32 %v7393_v8, %v1292_v45 }
0x1439   : > { %v1390_v9 = vpop.permute.xlu0 %1389 }
0x143a   : > { %v1392_v10 = vmul.f32 %v7393_v8, %v1390_v9 }
0x143c   : > { %1394 = vrot.lane.b32.xlu1 %v1392_v10, %s7797_s28 }
0x14ae   : > { %v1395_v13 = vpop.permute.xlu1 %1394 }
0x14af   : > { %v1397_v44 = vadd.f32 %v1395_v13, %v1386_v12 }
0x14b1   : > { %7394 = vtanh.f32 %v1397_v44 }
0x14be   : > { %v7395_v14 = vpop.eup %7394 }
0x14bf   : > { %1400 = vrot.lane.b32.xlu0 %v7395_v14, %s7797_s28 }
0x1531   : > { %v1401_v15 = vpop.permute.xlu0 %1400 }
0x1532   : > { %v1403_v16 = vmul.f32 %v7393_v8, %v1401_v15 }
0x1534   : > { %1405 = vrot.lane.b32.xlu1 %v1403_v16, %s7798_s29 }
0x15a6   : > { %v1406_v17 = vpop.permute.xlu1 %1405 }
0x15a7   : > { %1409 = vst.msk [vmem:[#allocation2 + $0x38] sm:$0xff] %vm571_vm2, %v1406_v17  ;;  %6783 = vmatmul.mubr.msk.f32.vlgmr.msra.gmra.mxu0 %vm571_vm2, %v1406_v17 }
0x15a8   : > { %6797 = vmatpush3.msra.mxu0 %v7901_v0  ;;  %6804 = vmatprep.mubr.msk.f32.mxu0 %vm7796_vm1, %v7795_v2 }
0x15a9   : > { %6798 = vmatprep.subr.mxu0 %v7795_v2 }
0x15aa   : > { %6799 = vmatpush3.msra.mxu0 %v7911_v3 }
0x15ab   : > { %6800 = vmatprep.subr.mxu0 %v7795_v2 }
0x15ac   : > { %6801 = vmatpush3.msra.mxu0 %v7922_v5 }
0x15ad   : > { %6802 = vmatprep.subr.mxu0 %v7795_v2 }
0x15ae   : > { %6803 = vmatpush3.msra.mxu0 %v7934_v6 }
0x15af   : > { %6818 = vmatprep.subr.mxu0 %v7795_v2 }
0x1667   : > { %v1480_v19 = vpop.f32.mrf.mxu0 }
0x1668   : > { %v1484_v20 = vadd.f32 %v1480_v19, %v512_v18 }
0x1669   : > { %v6784_v21 = vpop.f32.mrf.mxu0 }
0x166a   : > { %7396 = vtanh.f32 %v1484_v20  ;;  %v6228_v23 = vmul.f32 -1.442695, %v1484_v20 }
0x166c   : > { %7398 = vpow2.f32 %v6228_v23 }
0x1677   : > { %v7397_v22 = vpop.eup %7396 }
0x1678   : > { %1494 = vrot.lane.b32.xlu0 %v7397_v22, %s7797_s28 }
0x1679   : > { %v7399_v24 = vpop.eup %7398 }
0x167a   : > { %v1488_v25 = vadd.f32 1.0, %v7399_v24 }
0x167c   : > { %7400 = vrcp.f32 %v1488_v25 }
0x1689   : > { %v7401_v26 = vpop.eup %7400 }
0x168a   : > { %v1491_v29 = vmul.f32 %v7401_v26, %v1397_v44 }
0x16ea   : > { %v1495_v27 = vpop.permute.xlu0 %1494 }
0x16eb   : > { %v1497_v28 = vmul.f32 %v7401_v26, %v1495_v27 }
0x16ed   : > { %1499 = vrot.lane.b32.xlu1 %v1497_v28, %s7797_s28 }
0x175f   : > { %v1500_v30 = vpop.permute.xlu1 %1499 }
0x1760   : > { %v1502_v47 = vadd.f32 %v1500_v30, %v1491_v29 }
0x1762   : > { %7402 = vtanh.f32 %v1502_v47 }
0x176f   : > { %v7403_v31 = vpop.eup %7402 }
0x1770   : > { %1505 = vrot.lane.b32.xlu0 %v7403_v31, %s7797_s28  ;;  %v7718_v31 = vld [vmem:[%s9079_s2 + $0x18] sm:$0xff] }
0x17e2   : > { %v1506_v32 = vpop.permute.xlu0 %1505 }
0x17e3   : > { %v1508_v33 = vmul.f32 %v7401_v26, %v1506_v32  ;;  %v7719_v32 = vld [vmem:[%s9079_s2 + $0x10] sm:$0xff] }
0x17e5   : > { %1510 = vrot.lane.b32.xlu1 %v1508_v33, %s7798_s29  ;;  %v7720_v33 = vld [vmem:[%s9079_s2 + $0x8] sm:$0xff] }
0x1857   : > { %v1511_v34 = vpop.permute.xlu1 %1510 }
0x1858   : > { %1514 = vst.msk [vmem:[#allocation2 + $0x40] sm:$0xff] %vm571_vm2, %v1511_v34  ;;  %6794 = vmatmul.mubr.msk.f32.vlgmr.msra.gmra.mxu1 %vm571_vm2, %v1511_v34  ;;  %v7721_v34 = vld [vmem:[%s9079_s2] sm:$0xff] }
0x1859   : > { %6808 = vmatpush3.msra.mxu1 %v7901_v0  ;;  %6815 = vmatprep.mubr.msk.f32.mxu1 %vm7796_vm1, %v7795_v2 }
0x185a   : > { %6809 = vmatprep.subr.mxu1 %v7795_v2 }
0x185b   : > { %6810 = vmatpush3.msra.mxu1 %v7911_v3 }
0x185c   : > { %6811 = vmatprep.subr.mxu1 %v7795_v2 }
0x185d   : > { %6812 = vmatpush3.msra.mxu1 %v7922_v5 }
0x185e   : > { %6813 = vmatprep.subr.mxu1 %v7795_v2 }
0x185f   : > { %6814 = vmatpush3.msra.mxu1 %v7934_v6 }
0x1860   : > { %6829 = vmatprep.subr.mxu1 %v7795_v2 }
0x1918   : > { %v1585_v36 = vpop.f32.mrf.mxu1 }
0x1919   : > { %v1589_v37 = vadd.f32 %v1585_v36, %v517_v35  ;;  %v532_v35 = vadd.f32 %v7969_v11, %v8086_v51 }
0x191a   : > { %v6795_v38 = vpop.f32.mrf.mxu1 }
0x191b   : > { %7404 = vtanh.f32 %v1589_v37  ;;  %v6230_v40 = vmul.f32 -1.442695, %v1589_v37 }
0x191d   : > { %7406 = vpow2.f32 %v6230_v40 }
0x1928   : > { %v7405_v39 = vpop.eup %7404 }
0x1929   : > { %1599 = vrot.lane.b32.xlu0 %v7405_v39, %s7797_s28 }
0x192a   : > { %v7407_v41 = vpop.eup %7406 }
0x192b   : > { %v1593_v42 = vadd.f32 1.0, %v7407_v41 }
0x192d   : > { %7408 = vrcp.f32 %v1593_v42 }
0x193a   : > { %v7409_v43 = vpop.eup %7408 }
0x193b   : > { %v1596_v55 = vmul.f32 %v7409_v43, %v1502_v47 }
0x199b   : > { %v1600_v54 = vpop.permute.xlu0 %1599 }
0x199c   : > { %v1602_v45 = vmul.f32 %v7409_v43, %v1600_v54 }
0x199e   : > { %1604 = vrot.lane.b32.xlu1 %v1602_v45, %s7797_s28 }
0x1a10   : > { %v1605_v56 = vpop.permute.xlu1 %1604 }
0x1a11   : > { %v1607_v46 = vadd.f32 %v1605_v56, %v1596_v55 }
0x1a13   : > { %7410 = vtanh.f32 %v1607_v46 }
0x1a20   : > { %v7411_v57 = vpop.eup %7410 }
0x1a21   : > { %1610 = vrot.lane.b32.xlu0 %v7411_v57, %s7797_s28 }
0x1a93   : > { %v1611_v58 = vpop.permute.xlu0 %1610 }
0x1a94   : > { %v1613_v59 = vmul.f32 %v7409_v43, %v1611_v58 }
0x1a96   : > { %1615 = vrot.lane.b32.xlu1 %v1613_v59, %s7798_s29  ;;  %v8259_v59 = vld [vmem:[%s9080_s3] ss:$0 sm:$0xff] }
0x1b08   : > { %v1616_v60 = vpop.permute.xlu1 %1615 }
0x1b09   : > { %1619 = vst.msk [vmem:[#allocation2 + $0x48] sm:$0xff] %vm571_vm2, %v1616_v60  ;;  %6805 = vmatmul.mubr.msk.f32.vlgmr.msra.gmra.mxu0 %vm571_vm2, %v1616_v60  ;;  %v537_v60 = vadd.f32 %v8259_v59, %v8084_v50 }
0x1b0a   : > { %6819 = vmatpush3.msra.mxu0 %v7901_v0  ;;  %6826 = vmatprep.mubr.msk.f32.mxu0 %vm7796_vm1, %v7795_v2 }
0x1b0b   : > { %6820 = vmatprep.subr.mxu0 %v7795_v2 }
0x1b0c   : > { %6821 = vmatpush3.msra.mxu0 %v7911_v3 }
0x1b0d   : > { %6822 = vmatprep.subr.mxu0 %v7795_v2 }
0x1b0e   : > { %6823 = vmatpush3.msra.mxu0 %v7922_v5 }
0x1b0f   : > { %6824 = vmatprep.subr.mxu0 %v7795_v2 }
0x1b10   : > { %6825 = vmatpush3.msra.mxu0 %v7934_v6 }
0x1b11   : > { %6840 = vmatprep.subr.mxu0 %v7795_v2 }
0x1bc9   : > { %v1690_v62 = vpop.f32.mrf.mxu0 }
0x1bca   : > { %v1694_v63 = vadd.f32 %v1690_v62, %v522_v61 }
0x1bcb   : > { %v6806_v1 = vpop.f32.mrf.mxu0 }
0x1bcc   : > { %7412 = vtanh.f32 %v1694_v63  ;;  %v6232_v7 = vmul.f32 -1.442695, %v1694_v63 }
0x1bce   : > { %7414 = vpow2.f32 %v6232_v7 }
0x1bd9   : > { %v7413_v4 = vpop.eup %7412 }
0x1bda   : > { %1704 = vrot.lane.b32.xlu0 %v7413_v4, %s7797_s28 }
0x1bdb   : > { %v7415_v8 = vpop.eup %7414 }
0x1bdc   : > { %v1698_v9 = vadd.f32 1.0, %v7415_v8 }
0x1bde   : > { %7416 = vrcp.f32 %v1698_v9 }
0x1beb   : > { %v7417_v10 = vpop.eup %7416 }
0x1bec   : > { %v1701_v44 = vmul.f32 %v7417_v10, %v1607_v46 }
0x1c4c   : > { %v1705_v12 = vpop.permute.xlu0 %1704 }
0x1c4d   : > { %v1707_v13 = vmul.f32 %v7417_v10, %v1705_v12 }
0x1c4f   : > { %1709 = vrot.lane.b32.xlu1 %v1707_v13, %s7797_s28 }
0x1cc1   : > { %v1710_v14 = vpop.permute.xlu1 %1709 }
0x1cc2   : > { %v1712_v49 = vadd.f32 %v1710_v14, %v1701_v44  ;;  %v2269_v14 = vld [vmem:[%s9081_s4 + $0x18] sm:$0xff] }
0x1cc4   : > { %7418 = vtanh.f32 %v1712_v49 }
0x1cd1   : > { %v7419_v15 = vpop.eup %7418 }
0x1cd2   : > { %1715 = vrot.lane.b32.xlu0 %v7419_v15, %s7797_s28 }
0x1d44   : > { %v1716_v16 = vpop.permute.xlu0 %1715 }
0x1d45   : > { %v1718_v17 = vmul.f32 %v7417_v10, %v1716_v16 }
0x1d47   : > { %1720 = vrot.lane.b32.xlu1 %v1718_v17, %s7798_s29 }
0x1db9   : > { %v1721_v18 = vpop.permute.xlu1 %1720 }
0x1dba   : > { %1724 = vst.msk [vmem:[#allocation2 + $0x50] sm:$0xff] %vm571_vm2, %v1721_v18  ;;  %6816 = vmatmul.mubr.msk.f32.vlgmr.msra.gmra.mxu1 %vm571_vm2, %v1721_v18  ;;  %v2268_v18 = vld [vmem:[%s9081_s4 + $0x10] sm:$0xff] }
0x1dbb   : > { %6830 = vmatpush3.msra.mxu1 %v7901_v0  ;;  %6837 = vmatprep.mubr.msk.f32.mxu1 %vm7796_vm1, %v7795_v2  ;;  %v527_v0 = vadd.f32 %v8080_v48, %v7969_v11 }
0x1dbc   : > { %6831 = vmatprep.subr.mxu1 %v7795_v2 }
0x1dbd   : > { %6832 = vmatpush3.msra.mxu1 %v7911_v3 }
0x1dbe   : > { %6833 = vmatprep.subr.mxu1 %v7795_v2 }
0x1dbf   : > { %6834 = vmatpush3.msra.mxu1 %v7922_v5 }
0x1dc0   : > { %6835 = vmatprep.subr.mxu1 %v7795_v2 }
0x1dc1   : > { %6836 = vmatpush3.msra.mxu1 %v7934_v6 }
0x1dc2   : > { %6851 = vmatprep.subr.mxu1 %v7795_v2 }
0x1e7a   : > { %v1795_v19 = vpop.f32.mrf.mxu1 }
0x1e7b   : > { %v1799_v20 = vadd.f32 %v1795_v19, %v527_v0  ;;  %v2250_v0 = vld [vmem:[#allocation2] sm:$0xff]  ;;  %v2267_v19 = vld [vmem:[%s9081_s4 + $0x8] sm:$0xff] }
0x1e7c   : > { %v6817_v21 = vpop.f32.mrf.mxu1 }
0x1e7d   : > { %7420 = vtanh.f32 %v1799_v20  ;;  %v6234_v3 = vmul.f32 -1.442695, %v1799_v20  ;;  %v2266_v20 = vld [vmem:[%s9081_s4] sm:$0xff]  ;;  %v2251_v21 = vld [vmem:[#allocation2 + $0x8] sm:$0xff] }
0x1e7f   : > { %7422 = vpow2.f32 %v6234_v3  ;;  %v2253_v3 = vld [vmem:[#allocation2 + $0x18] sm:$0xff] }
0x1e8a   : > { %v7421_v22 = vpop.eup %7420 }
0x1e8b   : > { %1809 = vrot.lane.b32.xlu0 %v7421_v22, %s7797_s28  ;;  %v2252_v22 = vld [vmem:[#allocation2 + $0x10] sm:$0xff] }
0x1e8c   : > { %v7423_v23 = vpop.eup %7422 }
0x1e8d   : > { %v1803_v5 = vadd.f32 1.0, %v7423_v23  ;;  %v2254_v23 = vld [vmem:[#allocation2 + $0x20] sm:$0xff] }
0x1e8f   : > { %7424 = vrcp.f32 %v1803_v5  ;;  %v2255_v5 = vld [vmem:[#allocation2 + $0x28] sm:$0xff] }
0x1e9c   : > { %v7425_v24 = vpop.eup %7424 }
0x1e9d   : > { %v1806_v26 = vmul.f32 %v7425_v24, %v1712_v49 }
0x1efd   : > { %v1810_v25 = vpop.permute.xlu0 %1809 }
0x1efe   : > { %v1812_v6 = vmul.f32 %v7425_v24, %v1810_v25  ;;  %v2257_v25 = vld [vmem:[#allocation2 + $0x38] sm:$0xff] }
0x1f00   : > { %1814 = vrot.lane.b32.xlu1 %v1812_v6, %s7797_s28  ;;  %v2258_v6 = vld [vmem:[#allocation2 + $0x40] sm:$0xff] }
0x1f72   : > { %v1815_v27 = vpop.permute.xlu1 %1814 }
0x1f73   : > { %v1817_v48 = vadd.f32 %v1815_v27, %v1806_v26  ;;  %v2259_v26 = vld [vmem:[#allocation2 + $0x48] sm:$0xff]  ;;  %v2260_v27 = vld [vmem:[#allocation2 + $0x50] sm:$0xff] }
0x1f75   : > { %7426 = vtanh.f32 %v1817_v48 }
0x1f82   : > { %v7427_v28 = vpop.eup %7426 }
0x1f83   : > { %1820 = vrot.lane.b32.xlu0 %v7427_v28, %s7797_s28 }
0x1ff5   : > { %v1821_v29 = vpop.permute.xlu0 %1820 }
0x1ff6   : > { %v1823_v30 = vmul.f32 %v7425_v24, %v1821_v29  ;;  %v2256_v24 = vld [vmem:[#allocation2 + $0x30] sm:$0xff] }
0x1ff8   : > { %1825 = vrot.lane.b32.xlu1 %v1823_v30, %s7798_s29  ;;  %v542_v30 = vadd.f32 %v8259_v59, %v8090_v53 }
0x206a   : > { %v1826_v47 = vpop.permute.xlu1 %1825 }
0x206b   : > { %1829 = vst.msk [vmem:[#allocation2 + $0x58] sm:$0xff] %vm571_vm2, %v1826_v47  ;;  %6827 = vmatmul.mubr.msk.f32.vlgmr.msra.gmra.mxu0 %vm571_vm2, %v1826_v47 }
0x206c   : > { %6841 = vmatpush3.msra.mxu0 %v7718_v31  ;;  %6848 = vmatprep.mubr.msk.f32.mxu0 %vm7796_vm1, %v7795_v2 }
0x206d   : > { %6842 = vmatprep.subr.mxu0 %v7795_v2 }
0x206e   : > { %6843 = vmatpush3.msra.mxu0 %v7719_v32 }
0x206f   : > { %6844 = vmatprep.subr.mxu0 %v7795_v2 }
0x2070   : > { %6845 = vmatpush3.msra.mxu0 %v7720_v33 }
0x2071   : > { %6846 = vmatprep.subr.mxu0 %v7795_v2 }
0x2072   : > { %6847 = vmatpush3.msra.mxu0 %v7721_v34 }
0x2073   : > { %6862 = vmatprep.subr.mxu0 %v2269_v14 }
0x212b   : > { %v1900_v36 = vpop.f32.mrf.mxu0 }
0x212c   : > { %v1904_v37 = vadd.f32 %v1900_v36, %v532_v35 }
0x212d   : > { %v6828_v38 = vpop.f32.mrf.mxu0 }
0x212e   : > { %7428 = vtanh.f32 %v1904_v37  ;;  %v6236_v40 = vmul.f32 -1.442695, %v1904_v37 }
0x2130   : > { %7430 = vpow2.f32 %v6236_v40 }
0x213b   : > { %v7429_v39 = vpop.eup %7428 }
0x213c   : > { %1914 = vrot.lane.b32.xlu0 %v7429_v39, %s7797_s28 }
0x213d   : > { %v7431_v41 = vpop.eup %7430 }
0x213e   : > { %v1908_v42 = vadd.f32 1.0, %v7431_v41 }
0x2140   : > { %7432 = vrcp.f32 %v1908_v42 }
0x214d   : > { %v7433_v43 = vpop.eup %7432 }
0x214e   : > { %v1911_v55 = vmul.f32 %v7433_v43, %v1817_v48  ;;  %v2261_v48 = vld [vmem:[#allocation2 + $0x58] sm:$0xff] }
0x21ae   : > { %v1915_v54 = vpop.permute.xlu0 %1914 }
0x21af   : > { %v1917_v45 = vmul.f32 %v7433_v43, %v1915_v54  ;;  %v8317_v54 = vld [vmem:[%s9082_s5 + $0x10] sm:$0xff] }
0x21b1   : > { %1919 = vrot.lane.b32.xlu1 %v1917_v45, %s7797_s28  ;;  %v8324_v45 = vld [vmem:[%s9082_s5 + $0x8] sm:$0xff] }
0x2223   : > { %v1920_v56 = vpop.permute.xlu1 %1919 }
0x2224   : > { %v1922_v11 = vadd.f32 %v1920_v56, %v1911_v55  ;;  %v8331_v55 = vld [vmem:[%s9082_s5] sm:$0xff] }
0x2226   : > { %7434 = vtanh.f32 %v1922_v11 }
0x2233   : > { %v7435_v51 = vpop.eup %7434 }
0x2234   : > { %1925 = vrot.lane.b32.xlu0 %v7435_v51, %s7797_s28 }
0x22a6   : > { %v1926_v46 = vpop.permute.xlu0 %1925 }
0x22a7   : > { %v1928_v57 = vmul.f32 %v7433_v43, %v1926_v46  ;;  %v8311_v43 = vld [vmem:[%s9082_s5 + $0x18] sm:$0xff] }
0x22a9   : > { %1930 = vrot.lane.b32.xlu1 %v1928_v57, %s7798_s29  ;;  %v547_v57 = vadd.f32 %v8259_v59, %v8088_v52 }
0x231b   : > { %v1931_v58 = vpop.permute.xlu1 %1930 }
0x231c   : > { %1934 = vst.msk [vmem:[#allocation2 + $0x60] sm:$0xff] %vm571_vm2, %v1931_v58  ;;  %6838 = vmatmul.mubr.msk.f32.vlgmr.msra.gmra.mxu1 %vm571_vm2, %v1931_v58 }
0x231d   : > { %6852 = vmatpush3.msra.mxu1 %v7718_v31  ;;  %6859 = vmatprep.mubr.msk.f32.mxu1 %vm7796_vm1, %v7795_v2 }
0x231e   : > { %6853 = vmatprep.subr.mxu1 %v7795_v2 }
0x231f   : > { %6854 = vmatpush3.msra.mxu1 %v7719_v32 }
0x2320   : > { %6855 = vmatprep.subr.mxu1 %v7795_v2 }
0x2321   : > { %6856 = vmatpush3.msra.mxu1 %v7720_v33 }
0x2322   : > { %6857 = vmatprep.subr.mxu1 %v7795_v2 }
0x2323   : > { %6858 = vmatpush3.msra.mxu1 %v7721_v34  ;;  %v2262_v28 = vld [vmem:[#allocation2 + $0x60] sm:$0xff] }
0x2324   : > { %6894 = vmatprep.subr.mxu1 %v7795_v2 }
0x23dc   : > { %v2005_v61 = vpop.f32.mrf.mxu1 }
0x23dd   : > { %v2009_v62 = vadd.f32 %v2005_v61, %v537_v60 }
0x23de   : > { %v6839_v63 = vpop.f32.mrf.mxu1 }
0x23df   : > { %7436 = vtanh.f32 %v2009_v62  ;;  %v6238_v4 = vmul.f32 -1.442695, %v2009_v62 }
0x23e1   : > { %7438 = vpow2.f32 %v6238_v4 }
0x23ec   : > { %v7437_v1 = vpop.eup %7436 }
0x23ed   : > { %2019 = vrot.lane.b32.xlu0 %v7437_v1, %s7797_s28  ;;  %v8368_v1 = vld [vmem:[%s9083_s6] ss:$0 sm:$0xff] }
0x23ee   : > { %v7439_v7 = vpop.eup %7438 }
0x23ef   : > { %v2013_v8 = vadd.f32 1.0, %v7439_v7 }
0x23f1   : > { %7440 = vrcp.f32 %v2013_v8 }
0x23fe   : > { %v7441_v9 = vpop.eup %7440 }
0x23ff   : > { %v2016_v13 = vmul.f32 %v7441_v9, %v1922_v11 }
0x245f   : > { %v2020_v10 = vpop.permute.xlu0 %2019 }
0x2460   : > { %v2022_v12 = vmul.f32 %v7441_v9, %v2020_v10 }
0x2462   : > { %2024 = vrot.lane.b32.xlu1 %v2022_v12, %s7797_s28 }
0x24d4   : > { %v2025_v44 = vpop.permute.xlu1 %2024 }
0x24d5   : > { %v8265_v50 = vadd.f32 %v2025_v44, %v2016_v13 }
0x24d7   : > { %7442 = vtanh.f32 %v8265_v50 }
0x24e4   : > { %v7443_v49 = vpop.eup %7442 }
0x24e5   : > { %2030 = vrot.lane.b32.xlu0 %v7443_v49, %s7797_s28 }
0x2557   : > { %v2031_v15 = vpop.permute.xlu0 %2030 }
0x2558   : > { %v2033_v16 = vmul.f32 %v7441_v9, %v2031_v15 }
0x255a   : > { %2035 = vrot.lane.b32.xlu1 %v2033_v16, %s7798_s29 }
0x25cc   : > { %v2036_v17 = vpop.permute.xlu1 %2035 }
0x25cd   : > { %2039 = vst.msk [vmem:[#allocation2 + $0x68] sm:$0xff] %vm571_vm2, %v2036_v17  ;;  %6849 = vmatmul.mubr.msk.f32.vlgmr.msra.gmra.mxu0 %vm571_vm2, %v2036_v17 }
0x25ce   : > { %6863 = vmatpush3.msra.mxu0 %v2269_v14  ;;  %6870 = vmatprep.mubr.msk.f32.mxu0 %vm571_vm2, %v2250_v0 }
0x25cf   : > { %6864 = vmatprep.subr.mxu0 %v2268_v18 }
0x25d0   : > { %6865 = vmatpush3.msra.mxu0 %v2268_v18 }
0x25d1   : > { %6866 = vmatprep.subr.mxu0 %v2267_v19 }
0x25d2   : > { %6867 = vmatpush3.msra.mxu0 %v2267_v19 }
0x25d3   : > { %6868 = vmatprep.subr.mxu0 %v2266_v20 }
0x25d4   : > { %6869 = vmatpush3.msra.mxu0 %v2266_v20  ;;  %v2263_v29 = vld [vmem:[#allocation2 + $0x68] sm:$0xff] }
0x25d5   : > { %6871 = vmatmul.mubr.msk.f32.vlgmr.msra.gmra.mxu0 %vm571_vm2, %v2251_v21  ;;  %6938 = vmatprep.subr.mxu0 %v7795_v2 }
0x25d6   : > { %6873 = vmatprep.mubr.msk.f32.mxu0 %vm571_vm2, %v2252_v22  ;;  %6939 = vmatpush3.msra.mxu0 %v8311_v43 }
0x25d7   : > { %6940 = vmatprep.subr.mxu0 %v7795_v2 }
0x25d8   : > { %6941 = vmatpush3.msra.mxu0 %v8317_v54 }
0x25d9   : > { %6874 = vmatmul.mubr.msk.f32.gmra.mxu0 %vm571_vm2, %v2253_v3  ;;  %6942 = vmatprep.subr.mxu0 %v7795_v2 }
0x25da   : > { %6876 = vmatprep.mubr.msk.f32.mxu0 %vm571_vm2, %v2254_v23  ;;  %6943 = vmatpush3.msra.mxu0 %v8324_v45 }
0x25db   : > { %6944 = vmatprep.subr.mxu0 %v7795_v2 }
0x25dc   : > { %6945 = vmatpush3.msra.mxu0 %v8331_v55 }
0x25dd   : > { %6877 = vmatmul.mubr.msk.f32.gmra.mxu0 %vm571_vm2, %v2255_v5  ;;  %6960 = vmatprep.subr.mxu0 %v7795_v2 }
0x25de   : > { %6879 = vmatprep.mubr.msk.f32.mxu0 %vm571_vm2, %v2256_v24 }
0x25e1   : > { %6880 = vmatmul.mubr.msk.f32.gmra.mxu0 %vm571_vm2, %v2257_v25 }
0x25e2   : > { %6882 = vmatprep.mubr.msk.f32.mxu0 %vm571_vm2, %v2258_v6 }
0x25e5   : > { %6883 = vmatmul.mubr.msk.f32.gmra.mxu0 %vm571_vm2, %v2259_v26 }
0x25e6   : > { %6885 = vmatprep.mubr.msk.f32.mxu0 %vm571_vm2, %v2260_v27 }
0x25e9   : > { %6886 = vmatmul.mubr.msk.f32.gmra.mxu0 %vm571_vm2, %v2261_v48 }
0x25ea   : > { %6888 = vmatprep.mubr.msk.f32.mxu0 %vm571_vm2, %v2262_v28 }
0x25ed   : > { %6889 = vmatmul.mubr.msk.f32.gmra.mxu0 %vm571_vm2, %v2263_v29 }
0x268d   : > { %v2110_v47 = vpop.f32.mrf.mxu0 }
0x268e   : > { %v2114_v31 = vadd.f32 %v2110_v47, %v542_v30 }
0x268f   : > { %v6850_v32 = vpop.f32.mrf.mxu0 }
0x2690   : > { %7444 = vtanh.f32 %v2114_v31  ;;  %v6240_v34 = vmul.f32 -1.442695, %v2114_v31 }
0x2692   : > { %7446 = vpow2.f32 %v6240_v34 }
0x2695   : > { %v6872_v58 = vpop.f32.mrf.mxu0 }
0x2696   : > { %v2397_v19 = vadd.f32 %v6872_v58, %v8368_v1 }
0x2697   : > { %v2391_v63 = vpop.f32.mrf.mxu0 }
0x2698   : > { %v2392_v4 = vadd.f32 %v8368_v1, %v2391_v63 }
0x2699   : > { %v6875_v32 = vpop.f32.mrf.mxu0 }
0x269d   : > { %v7445_v33 = vpop.eup %7444 }
0x269e   : > { %2124 = vrot.lane.b32.xlu0 %v7445_v33, %s7797_s28  ;;  %v2401_v33 = vpop.f32.mrf.mxu0 }
0x269f   : > { %v7447_v35 = vpop.eup %7446  ;;  %v2402_v34 = vadd.f32 %v8368_v1, %v2401_v33 }
0x26a0   : > { %v2118_v36 = vadd.f32 1.0, %v7447_v35 }
0x26a2   : > { %7448 = vrcp.f32 %v2118_v36 }
0x26af   : > { %v7449_v37 = vpop.eup %7448 }
0x26b0   : > { %v2121_v40 = vmul.f32 %v7449_v37, %v8265_v50 }
0x2710   : > { %v2125_v38 = vpop.permute.xlu0 %2124 }
0x2711   : > { %v2127_v39 = vmul.f32 %v7449_v37, %v2125_v38 }
0x2713   : > { %2129 = vrot.lane.b32.xlu1 %v2127_v39, %s7797_s28 }
0x2785   : > { %v2130_v53 = vpop.permute.xlu1 %2129 }
0x2786   : > { %v8304_v41 = vadd.f32 %v2130_v53, %v2121_v40 }
0x2788   : > { %7450 = vtanh.f32 %v8304_v41 }
0x2795   : > { %v7451_v42 = vpop.eup %7450 }
0x2796   : > { %2135 = vrot.lane.b32.xlu0 %v7451_v42, %s7797_s28 }
0x2808   : > { %v2136_v56 = vpop.permute.xlu0 %2135 }
0x2809   : > { %v2138_v11 = vmul.f32 %v7449_v37, %v2136_v56 }
0x280b   : > { %2140 = vrot.lane.b32.xlu1 %v2138_v11, %s7798_s29 }
0x287d   : > { %v2141_v51 = vpop.permute.xlu1 %2140 }
0x287e   : > { %2144 = vst.msk [vmem:[#allocation2 + $0x70] sm:$0xff] %vm571_vm2, %v2141_v51  ;;  %6860 = vmatmul.mubr.msk.f32.vlgmr.msra.gmra.mxu1 %vm571_vm2, %v2141_v51 }
0x287f   : > { %6895 = vmatpush3.msra.mxu1 %v8311_v43  ;;  %6902 = vmatprep.mubr.msk.f32.mxu1 %vm7796_vm1, %v7795_v2 }
0x2880   : > { %6896 = vmatprep.subr.mxu1 %v7795_v2 }
0x2881   : > { %6897 = vmatpush3.msra.mxu1 %v8317_v54 }
0x2882   : > { %6898 = vmatprep.subr.mxu1 %v7795_v2 }
0x2883   : > { %6899 = vmatpush3.msra.mxu1 %v8324_v45 }
0x2884   : > { %6900 = vmatprep.subr.mxu1 %v7795_v2 }
0x2885   : > { %6901 = vmatpush3.msra.mxu1 %v8331_v55  ;;  %v2264_v46 = vld [vmem:[#allocation2 + $0x70] sm:$0xff] }
0x2886   : > { %6903 = vmatmul.mubr.f32.vlgmr.msra.gmra.mxu1 %v7795_v2  ;;  %6891 = vmatprep.mubr.msk.f32.mxu0 %vm571_vm2, %v2264_v46 }
0x2887   : > { %6905 = vmatprep.subr.mxu1 %v7795_v2  ;;  %6913 = vmatprep.mubr.msk.f32.mxu1 %vm7796_vm1, %v7795_v2 }
0x2888   : > { %6906 = vmatpush3.msra.mxu1 %v8311_v43 }
0x2889   : > { %6907 = vmatprep.subr.mxu1 %v7795_v2 }
0x288a   : > { %6908 = vmatpush3.msra.mxu1 %v8317_v54 }
0x288b   : > { %6909 = vmatprep.subr.mxu1 %v7795_v2 }
0x288c   : > { %6910 = vmatpush3.msra.mxu1 %v8324_v45 }
0x288d   : > { %6911 = vmatprep.subr.mxu1 %v7795_v2 }
0x288e   : > { %6912 = vmatpush3.msra.mxu1 %v8331_v55 }
0x288f   : > { %6916 = vmatprep.subr.mxu1 %v7795_v2 }
0x293e   : > { %v2215_v60 = vpop.f32.mrf.mxu1 }
0x293f   : > { %v8363_v61 = vadd.f32 %v2215_v60, %v547_v57 }
0x2940   : > { %v6861_v62 = vpop.f32.mrf.mxu1 }
0x2941   : > { %v6242_v62 = vmul.f32 -1.442695, %v8363_v61 }
0x2946   : > { %v2557_v7 = vpop.f32.mrf.mxu1 }
0x2947   : > { %v2561_v8 = vadd.f32 %v2557_v7, %v2392_v4 }
0x2948   : > { %v6904_v9 = vpop.f32.mrf.mxu1 }
0x2949   : > { %7452 = vtanh.f32 %v2561_v8  ;;  %v6260_v52 = vmul.f32 -1.442695, %v2561_v8 }
0x294b   : > { %7454 = vpow2.f32 %v6260_v52 }
0x2956   : > { %v7453_v10 = vpop.eup %7452 }
0x2957   : > { %2571 = vrot.lane.b32.xlu0 %v7453_v10, %s7797_s28 }
0x2958   : > { %v7455_v59 = vpop.eup %7454 }
0x2959   : > { %v2565_v12 = vadd.f32 1.0, %v7455_v59 }
0x295b   : > { %7456 = vrcp.f32 %v2565_v12 }
0x2968   : > { %v7457_v13 = vpop.eup %7456 }
0x2969   : > { %v2568_v14 = vmul.f32 0.0, %v7457_v13 }
0x29c9   : > { %v2572_v44 = vpop.permute.xlu0 %2571 }
0x29ca   : > { %v2574_v50 = vmul.f32 %v7457_v13, %v2572_v44 }
0x29cc   : > { %2576 = vrot.lane.b32.xlu1 %v2574_v50, %s7797_s28 }
0x2a3e   : > { %v2577_v49 = vpop.permute.xlu1 %2576 }
0x2a3f   : > { %v2579_v15 = vadd.f32 %v2577_v49, %v2568_v14  ;;  %v2407_v14 = vadd.f32 %v6875_v32, %v8368_v1 }
0x2a41   : > { %7458 = vtanh.f32 %v2579_v15 }
0x2a4e   : > { %v7459_v16 = vpop.eup %7458 }
0x2a4f   : > { %2582 = vrot.lane.b32.xlu0 %v7459_v16, %s7797_s28 }
0x2ac1   : > { %v2583_v17 = vpop.permute.xlu0 %2582 }
0x2ac2   : > { %v2585_v18 = vmul.f32 %v7457_v13, %v2583_v17 }
0x2ac4   : > { %2587 = vrot.lane.b32.xlu1 %v2585_v18, %s7798_s29 }
0x2b36   : > { %v2588_v0 = vpop.permute.xlu1 %2587 }
0x2b37   : > { %2590 = vst.msk [vmem:[#allocation2] sm:$0xff] %vm571_vm2, %v2588_v0  ;;  %6914 = vmatmul.mubr.msk.f32.vlgmr.msra.gmra.mxu1 %vm571_vm2, %v2588_v0 }
0x2b38   : > { %6917 = vmatpush3.msra.mxu1 %v8311_v43  ;;  %6924 = vmatprep.mubr.msk.f32.mxu1 %vm7796_vm1, %v7795_v2 }
0x2b39   : > { %6918 = vmatprep.subr.mxu1 %v7795_v2 }
0x2b3a   : > { %6919 = vmatpush3.msra.mxu1 %v8317_v54 }
0x2b3b   : > { %6920 = vmatprep.subr.mxu1 %v7795_v2 }
0x2b3c   : > { %6921 = vmatpush3.msra.mxu1 %v8324_v45 }
0x2b3d   : > { %6922 = vmatprep.subr.mxu1 %v7795_v2 }
0x2b3e   : > { %6923 = vmatpush3.msra.mxu1 %v8331_v55 }
0x2b3f   : > { %6927 = vmatprep.subr.mxu1 %v7795_v2 }
0x2bf7   : > { %v2660_v20 = vpop.f32.mrf.mxu1 }
0x2bf8   : > { %v2664_v21 = vadd.f32 %v2660_v20, %v2397_v19 }
0x2bf9   : > { %v6915_v22 = vpop.f32.mrf.mxu1 }
0x2bfa   : > { %7460 = vtanh.f32 %v2664_v21  ;;  %v6262_v23 = vmul.f32 -1.442695, %v2664_v21 }
0x2bfc   : > { %7462 = vpow2.f32 %v6262_v23 }
0x2c07   : > { %v7461_v3 = vpop.eup %7460 }
0x2c08   : > { %2674 = vrot.lane.b32.xlu0 %v7461_v3, %s7797_s28 }
0x2c09   : > { %v7463_v5 = vpop.eup %7462 }
0x2c0a   : > { %v2668_v24 = vadd.f32 1.0, %v7463_v5 }
0x2c0c   : > { %7464 = vrcp.f32 %v2668_v24 }
0x2c19   : > { %v7465_v25 = vpop.eup %7464 }
0x2c1a   : > { %v2671_v27 = vmul.f32 %v7465_v25, %v2579_v15 }
0x2c7a   : > { %v2675_v6 = vpop.permute.xlu0 %2674 }
0x2c7b   : > { %v2677_v26 = vmul.f32 %v7465_v25, %v2675_v6 }
0x2c7d   : > { %2679 = vrot.lane.b32.xlu1 %v2677_v26, %s7797_s28 }
0x2cef   : > { %v2680_v48 = vpop.permute.xlu1 %2679 }
0x2cf0   : > { %v2682_v28 = vadd.f32 %v2680_v48, %v2671_v27 }
0x2cf2   : > { %7466 = vtanh.f32 %v2682_v28 }
0x2cff   : > { %v7467_v29 = vpop.eup %7466 }
0x2d00   : > { %2685 = vrot.lane.b32.xlu0 %v7467_v29, %s7797_s28 }
0x2d72   : > { %v2686_v30 = vpop.permute.xlu0 %2685 }
0x2d73   : > { %v2688_v47 = vmul.f32 %v7465_v25, %v2686_v30 }
0x2d75   : > { %2690 = vrot.lane.b32.xlu1 %v2688_v47, %s7798_s29 }
0x2de7   : > { %v2691_v31 = vpop.permute.xlu1 %2690 }
0x2de8   : > { %2693 = vst.msk [vmem:[#allocation2 + $0x8] sm:$0xff] %vm571_vm2, %v2691_v31  ;;  %6925 = vmatmul.mubr.msk.f32.vlgmr.msra.gmra.mxu1 %vm571_vm2, %v2691_v31 }
0x2de9   : > { %6928 = vmatpush3.msra.mxu1 %v8311_v43  ;;  %6935 = vmatprep.mubr.msk.f32.mxu1 %vm7796_vm1, %v7795_v2 }
0x2dea   : > { %6929 = vmatprep.subr.mxu1 %v7795_v2 }
0x2deb   : > { %6930 = vmatpush3.msra.mxu1 %v8317_v54 }
0x2dec   : > { %6931 = vmatprep.subr.mxu1 %v7795_v2 }
0x2ded   : > { %6932 = vmatpush3.msra.mxu1 %v8324_v45 }
0x2dee   : > { %6933 = vmatprep.subr.mxu1 %v7795_v2 }
0x2def   : > { %6934 = vmatpush3.msra.mxu1 %v8331_v55 }
0x2df0   : > { %6949 = vmatprep.subr.mxu1 %v7795_v2 }
0x2ea8   : > { %v2763_v35 = vpop.f32.mrf.mxu1 }
0x2ea9   : > { %v2767_v36 = vadd.f32 %v2763_v35, %v2402_v34 }
0x2eaa   : > { %v6926_v37 = vpop.f32.mrf.mxu1 }
0x2eab   : > { %7468 = vtanh.f32 %v2767_v36  ;;  %v6264_v39 = vmul.f32 -1.442695, %v2767_v36 }
0x2ead   : > { %7470 = vpow2.f32 %v6264_v39 }
0x2eb8   : > { %v7469_v38 = vpop.eup %7468 }
0x2eb9   : > { %2777 = vrot.lane.b32.xlu0 %v7469_v38, %s7797_s28 }
0x2eba   : > { %v7471_v40 = vpop.eup %7470 }
0x2ebb   : > { %v2771_v53 = vadd.f32 1.0, %v7471_v40 }
0x2ebd   : > { %7472 = vrcp.f32 %v2771_v53 }
0x2eca   : > { %v7473_v42 = vpop.eup %7472 }
0x2ecb   : > { %v2774_v51 = vmul.f32 %v7473_v42, %v2682_v28  ;;  %v6878_v28 = vpop.f32.mrf.mxu0 }
0x2ecd   : > { %v2411_v29 = vpop.f32.mrf.mxu0 }
0x2ece   : > { %v2412_v39 = vadd.f32 %v8368_v1, %v2411_v29 }
0x2ecf   : > { %v8449_v30 = vpop.f32.mrf.mxu0 }
0x2ed1   : > { %v8451_v47 = vpop.f32.mrf.mxu0 }
0x2ed3   : > { %v8453_v31 = vpop.f32.mrf.mxu0 }
0x2ed5   : > { %v8455_v32 = vpop.f32.mrf.mxu0 }
0x2ed7   : > { %v8457_v33 = vpop.f32.mrf.mxu0 }
0x2ed9   : > { %v8459_v34 = vpop.f32.mrf.mxu0 }
0x2edb   : > { %v8461_v35 = vpop.f32.mrf.mxu0 }
0x2edd   : > { %v8463_v36 = vpop.f32.mrf.mxu0 }
0x2f2b   : > { %v2778_v56 = vpop.permute.xlu0 %2777 }
0x2f2c   : > { %v2780_v11 = vmul.f32 %v7473_v42, %v2778_v56 }
0x2f2e   : > { %2782 = vrot.lane.b32.xlu1 %v2780_v11, %s7797_s28 }
0x2fa0   : > { %v2783_v46 = vpop.permute.xlu1 %2782 }
0x2fa1   : > { %v2785_v57 = vadd.f32 %v2783_v46, %v2774_v51 }
0x2fa3   : > { %7474 = vtanh.f32 %v2785_v57 }
0x2fa4   : > { %7476 = vtanh.f32 %v8363_v61 }
0x2fa5   : > { %7478 = vpow2.f32 %v6242_v62 }
0x2fb0   : > { %v7475_v58 = vpop.eup %7474 }
0x2fb1   : > { %2788 = vrot.lane.b32.xlu0 %v7475_v58, %s7797_s28  ;;  %v7477_v60 = vpop.eup %7476 }
0x2fb2   : > { %v7479_v63 = vpop.eup %7478 }
0x2fb3   : > { %v2223_v4 = vadd.f32 1.0, %v7479_v63 }
0x2fb5   : > { %2229 = vrot.lane.b32.xlu0 %v7477_v60, %s7797_s28  ;;  %7480 = vrcp.f32 %v2223_v4 }
0x2fc2   : > { %v7481_v9 = vpop.eup %7480 }
0x2fc3   : > { %v2226_v61 = vmul.f32 %v7481_v9, %v8304_v41 }
0x3023   : > { %v2789_v7 = vpop.permute.xlu0 %2788 }
0x3024   : > { %v2791_v8 = vmul.f32 %v7473_v42, %v2789_v7 }
0x3026   : > { %2793 = vrot.lane.b32.xlu1 %v2791_v8, %s7798_s29 }
0x3027   : > { %v2230_v10 = vpop.permute.xlu0 %2229 }
0x3028   : > { %v2232_v52 = vmul.f32 %v7481_v9, %v2230_v10 }
0x302a   : > { %2234 = vrot.lane.b32.xlu0 %v2232_v52, %s7797_s28  ;;  %v2417_v52 = vadd.f32 %v6878_v28, %v8368_v1 }
0x3098   : > { %v2794_v59 = vpop.permute.xlu1 %2793 }
0x3099   : > { %2796 = vst.msk [vmem:[#allocation2 + $0x10] sm:$0xff] %vm571_vm2, %v2794_v59  ;;  %6936 = vmatmul.mubr.msk.f32.vlgmr.msra.gmra.mxu1 %vm571_vm2, %v2794_v59 }
0x309a   : > { %6950 = vmatpush3.msra.mxu1 %v8311_v43  ;;  %6957 = vmatprep.mubr.msk.f32.mxu1 %vm7796_vm1, %v7795_v2 }
0x309b   : > { %6951 = vmatprep.subr.mxu1 %v7795_v2 }
0x309c   : > { %v2235_v12 = vpop.permute.xlu0 %2234  ;;  %6952 = vmatpush3.msra.mxu1 %v8317_v54 }
0x309d   : > { %v2237_v13 = vadd.f32 %v2235_v12, %v2226_v61  ;;  %6953 = vmatprep.subr.mxu1 %v7795_v2 }
0x309e   : > { %6954 = vmatpush3.msra.mxu1 %v8324_v45 }
0x309f   : > { %7482 = vtanh.f32 %v2237_v13  ;;  %6955 = vmatprep.subr.mxu1 %v7795_v2 }
0x30a0   : > { %6956 = vmatpush3.msra.mxu1 %v8331_v55 }
0x30a1   : > { %6971 = vmatprep.subr.mxu1 %v7795_v2 }
0x30ac   : > { %v7483_v44 = vpop.eup %7482 }
0x30ad   : > { %2240 = vrot.lane.b32.xlu0 %v7483_v44, %s7797_s28 }
0x311f   : > { %v2241_v41 = vpop.permute.xlu0 %2240 }
0x3120   : > { %v2243_v50 = vmul.f32 %v7481_v9, %v2241_v41 }
0x3122   : > { %2245 = vrot.lane.b32.xlu0 %v2243_v50, %s7798_s29 }
0x3159   : > { %v2866_v49 = vpop.f32.mrf.mxu1 }
0x315a   : > { %v2870_v15 = vadd.f32 %v2866_v49, %v2407_v14 }
0x315b   : > { %v6937_v16 = vpop.f32.mrf.mxu1 }
0x315c   : > { %7484 = vtanh.f32 %v2870_v15  ;;  %v6266_v19 = vmul.f32 -1.442695, %v2870_v15 }
0x315e   : > { %7486 = vpow2.f32 %v6266_v19 }
0x3169   : > { %v7485_v17 = vpop.eup %7484 }
0x316a   : > { %2880 = vrot.lane.b32.xlu1 %v7485_v17, %s7797_s28 }
0x316b   : > { %v7487_v20 = vpop.eup %7486 }
0x316c   : > { %v2874_v21 = vadd.f32 1.0, %v7487_v20 }
0x316e   : > { %7488 = vrcp.f32 %v2874_v21 }
0x317b   : > { %v7489_v22 = vpop.eup %7488 }
0x317c   : > { %v2877_v5 = vmul.f32 %v7489_v22, %v2785_v57 }
0x3194   : > { %v2246_v18 = vpop.permute.xlu0 %2245 }
0x3195   : > { %2249 = vst.msk [vmem:[#allocation2 + $0x78] sm:$0xff] %vm571_vm2, %v2246_v18 }
0x319c   : > { %v2265_v0 = vld [vmem:[#allocation2 + $0x78] sm:$0xff] }
0x319d   : > { %6892 = vmatmul.mubr.msk.f32.gmra.mxu0 %vm571_vm2, %v2265_v0 }
0x319e   : > { %6946 = vmatprep.mubr.msk.f32.mxu0 %vm7796_vm1, %v7795_v2 }
0x31dc   : > { %v2881_v3 = vpop.permute.xlu1 %2880 }
0x31dd   : > { %v2883_v23 = vmul.f32 %v7489_v22, %v2881_v3 }
0x31df   : > { %2885 = vrot.lane.b32.xlu1 %v2883_v23, %s7797_s28 }
0x3251   : > { %v2886_v24 = vpop.permute.xlu1 %2885 }
0x3252   : > { %v2888_v25 = vadd.f32 %v2886_v24, %v2877_v5 }
0x3254   : > { %7490 = vtanh.f32 %v2888_v25 }
0x325d   : > { %v8465_v37 = vpop.f32.mrf.mxu0 }
0x325f   : > { %v8467_v38 = vpop.f32.mrf.mxu0 }
0x3261   : > { %v7491_v6 = vpop.eup %7490 }
0x3262   : > { %2891 = vrot.lane.b32.xlu1 %v7491_v6, %s7797_s28 }
0x32d4   : > { %v2892_v26 = vpop.permute.xlu1 %2891 }
0x32d5   : > { %v2894_v27 = vmul.f32 %v7489_v22, %v2892_v26  ;;  %v2422_v22 = vadd.f32 %v8368_v1, %v8451_v47 }
0x32d7   : > { %2896 = vrot.lane.b32.xlu1 %v2894_v27, %s7798_s29 }
0x3349   : > { %v2897_v48 = vpop.permute.xlu1 %2896 }
0x334a   : > { %2899 = vst.msk [vmem:[#allocation2 + $0x18] sm:$0xff] %vm571_vm2, %v2897_v48  ;;  %6947 = vmatmul.mubr.msk.f32.vlgmr.msra.gmra.mxu0 %vm571_vm2, %v2897_v48 }
0x334b   : > { %6961 = vmatpush3.msra.mxu0 %v8311_v43  ;;  %6968 = vmatprep.mubr.msk.f32.mxu0 %vm7796_vm1, %v7795_v2 }
0x334c   : > { %6962 = vmatprep.subr.mxu0 %v7795_v2 }
0x334d   : > { %6963 = vmatpush3.msra.mxu0 %v8317_v54 }
0x334e   : > { %6964 = vmatprep.subr.mxu0 %v7795_v2 }
0x334f   : > { %6965 = vmatpush3.msra.mxu0 %v8324_v45 }
0x3350   : > { %6966 = vmatprep.subr.mxu0 %v7795_v2 }
0x3351   : > { %6967 = vmatpush3.msra.mxu0 %v8331_v55 }
0x3352   : > { %6982 = vmatprep.subr.mxu0 %v7795_v2 }
0x340a   : > { %v2969_v40 = vpop.f32.mrf.mxu0 }
0x340b   : > { %v2973_v53 = vadd.f32 %v2969_v40, %v2412_v39 }
0x340c   : > { %v6948_v42 = vpop.f32.mrf.mxu0 }
0x340d   : > { %7492 = vtanh.f32 %v2973_v53  ;;  %v6268_v11 = vmul.f32 -1.442695, %v2973_v53 }
0x340f   : > { %7494 = vpow2.f32 %v6268_v11  ;;  %v2427_v11 = vadd.f32 %v8449_v30, %v8368_v1 }
0x341a   : > { %v7493_v56 = vpop.eup %7492 }
0x341b   : > { %2983 = vrot.lane.b32.xlu0 %v7493_v56, %s7797_s28 }
0x341c   : > { %v7495_v51 = vpop.eup %7494 }
0x341d   : > { %v2977_v46 = vadd.f32 1.0, %v7495_v51 }
0x341f   : > { %7496 = vrcp.f32 %v2977_v46 }
0x342c   : > { %v7497_v57 = vpop.eup %7496 }
0x342d   : > { %v2980_v62 = vmul.f32 %v7497_v57, %v2888_v25 }
0x348d   : > { %v2984_v58 = vpop.permute.xlu0 %2983 }
0x348e   : > { %v2986_v60 = vmul.f32 %v7497_v57, %v2984_v58 }
0x3490   : > { %2988 = vrot.lane.b32.xlu1 %v2986_v60, %s7797_s28 }
0x3502   : > { %v2989_v63 = vpop.permute.xlu1 %2988 }
0x3503   : > { %v2991_v4 = vadd.f32 %v2989_v63, %v2980_v62 }
0x3505   : > { %7498 = vtanh.f32 %v2991_v4 }
0x3512   : > { %v7499_v7 = vpop.eup %7498 }
0x3513   : > { %2994 = vrot.lane.b32.xlu0 %v7499_v7, %s7797_s28 }
0x3585   : > { %v2995_v8 = vpop.permute.xlu0 %2994 }
0x3586   : > { %v2997_v9 = vmul.f32 %v7497_v57, %v2995_v8 }
0x3588   : > { %2999 = vrot.lane.b32.xlu1 %v2997_v9, %s7798_s29 }
0x35fa   : > { %v3000_v10 = vpop.permute.xlu1 %2999 }
0x35fb   : > { %3002 = vst.msk [vmem:[#allocation2 + $0x20] sm:$0xff] %vm571_vm2, %v3000_v10  ;;  %6958 = vmatmul.mubr.msk.f32.vlgmr.msra.gmra.mxu1 %vm571_vm2, %v3000_v10 }
0x35fc   : > { %6972 = vmatpush3.msra.mxu1 %v8311_v43  ;;  %6979 = vmatprep.mubr.msk.f32.mxu1 %vm7796_vm1, %v7795_v2 }
0x35fd   : > { %6973 = vmatprep.subr.mxu1 %v7795_v2 }
0x35fe   : > { %6974 = vmatpush3.msra.mxu1 %v8317_v54 }
0x35ff   : > { %6975 = vmatprep.subr.mxu1 %v7795_v2 }
0x3600   : > { %6976 = vmatpush3.msra.mxu1 %v8324_v45 }
0x3601   : > { %6977 = vmatprep.subr.mxu1 %v7795_v2 }
0x3602   : > { %6978 = vmatpush3.msra.mxu1 %v8331_v55 }
0x3603   : > { %6993 = vmatprep.subr.mxu1 %v7795_v2 }
0x36bb   : > { %v3072_v59 = vpop.f32.mrf.mxu1 }
0x36bc   : > { %v3076_v61 = vadd.f32 %v3072_v59, %v2417_v52 }
0x36bd   : > { %v6959_v12 = vpop.f32.mrf.mxu1 }
0x36be   : > { %7500 = vtanh.f32 %v3076_v61  ;;  %v6270_v44 = vmul.f32 -1.442695, %v3076_v61 }
0x36c0   : > { %7502 = vpow2.f32 %v6270_v44 }
0x36cb   : > { %v7501_v13 = vpop.eup %7500 }
0x36cc   : > { %3086 = vrot.lane.b32.xlu0 %v7501_v13, %s7797_s28  ;;  %v2432_v13 = vadd.f32 %v8368_v1, %v8455_v32 }
0x36cd   : > { %v7503_v41 = vpop.eup %7502 }
0x36ce   : > { %v3080_v50 = vadd.f32 1.0, %v7503_v41 }
0x36d0   : > { %7504 = vrcp.f32 %v3080_v50 }
0x36dd   : > { %v7505_v14 = vpop.eup %7504 }
0x36de   : > { %v3083_v16 = vmul.f32 %v7505_v14, %v2991_v4 }
0x373e   : > { %v3087_v49 = vpop.permute.xlu0 %3086 }
0x373f   : > { %v3089_v15 = vmul.f32 %v7505_v14, %v3087_v49 }
0x3741   : > { %3091 = vrot.lane.b32.xlu1 %v3089_v15, %s7797_s28 }
0x37b3   : > { %v3092_v17 = vpop.permute.xlu1 %3091 }
0x37b4   : > { %v3094_v18 = vadd.f32 %v3092_v17, %v3083_v16 }
0x37b6   : > { %7506 = vtanh.f32 %v3094_v18 }
0x37c3   : > { %v7507_v0 = vpop.eup %7506 }
0x37c4   : > { %3097 = vrot.lane.b32.xlu0 %v7507_v0, %s7797_s28 }
0x3836   : > { %v3098_v19 = vpop.permute.xlu0 %3097 }
0x3837   : > { %v3100_v20 = vmul.f32 %v7505_v14, %v3098_v19 }
0x3839   : > { %3102 = vrot.lane.b32.xlu1 %v3100_v20, %s7798_s29 }
0x38ab   : > { %v3103_v21 = vpop.permute.xlu1 %3102 }
0x38ac   : > { %3105 = vst.msk [vmem:[#allocation2 + $0x28] sm:$0xff] %vm571_vm2, %v3103_v21  ;;  %6969 = vmatmul.mubr.msk.f32.vlgmr.msra.gmra.mxu0 %vm571_vm2, %v3103_v21 }
0x38ad   : > { %6983 = vmatpush3.msra.mxu0 %v8311_v43  ;;  %6990 = vmatprep.mubr.msk.f32.mxu0 %vm7796_vm1, %v7795_v2 }
0x38ae   : > { %6984 = vmatprep.subr.mxu0 %v7795_v2 }
0x38af   : > { %6985 = vmatpush3.msra.mxu0 %v8317_v54 }
0x38b0   : > { %6986 = vmatprep.subr.mxu0 %v7795_v2 }
0x38b1   : > { %6987 = vmatpush3.msra.mxu0 %v8324_v45 }
0x38b2   : > { %6988 = vmatprep.subr.mxu0 %v7795_v2 }
0x38b3   : > { %6989 = vmatpush3.msra.mxu0 %v8331_v55 }
0x38b4   : > { %7004 = vmatprep.subr.mxu0 %v7795_v2 }
0x396c   : > { %v3175_v3 = vpop.f32.mrf.mxu0 }
0x396d   : > { %v3179_v23 = vadd.f32 %v3175_v3, %v2422_v22 }
0x396e   : > { %v6970_v5 = vpop.f32.mrf.mxu0 }
0x396f   : > { %7508 = vtanh.f32 %v3179_v23  ;;  %v6272_v25 = vmul.f32 -1.442695, %v3179_v23  ;;  %v2437_v5 = vadd.f32 %v8453_v31, %v8368_v1 }
0x3971   : > { %7510 = vpow2.f32 %v6272_v25 }
0x397c   : > { %v7509_v24 = vpop.eup %7508 }
0x397d   : > { %3189 = vrot.lane.b32.xlu0 %v7509_v24, %s7797_s28 }
0x397e   : > { %v7511_v6 = vpop.eup %7510 }
0x397f   : > { %v3183_v26 = vadd.f32 1.0, %v7511_v6 }
0x3981   : > { %7512 = vrcp.f32 %v3183_v26 }
0x398e   : > { %v7513_v27 = vpop.eup %7512 }
0x398f   : > { %v3186_v29 = vmul.f32 %v7513_v27, %v3094_v18 }
0x39ef   : > { %v3190_v48 = vpop.permute.xlu0 %3189 }
0x39f0   : > { %v3192_v28 = vmul.f32 %v7513_v27, %v3190_v48 }
0x39f2   : > { %3194 = vrot.lane.b32.xlu1 %v3192_v28, %s7797_s28 }
0x3a64   : > { %v3195_v39 = vpop.permute.xlu1 %3194 }
0x3a65   : > { %v3197_v47 = vadd.f32 %v3195_v39, %v3186_v29 }
0x3a67   : > { %7514 = vtanh.f32 %v3197_v47 }
0x3a74   : > { %v7515_v40 = vpop.eup %7514 }
0x3a75   : > { %3200 = vrot.lane.b32.xlu0 %v7515_v40, %s7797_s28 }
0x3ae7   : > { %v3201_v53 = vpop.permute.xlu0 %3200 }
0x3ae8   : > { %v3203_v42 = vmul.f32 %v7513_v27, %v3201_v53 }
0x3aea   : > { %3205 = vrot.lane.b32.xlu1 %v3203_v42, %s7798_s29 }
0x3b5c   : > { %v3206_v56 = vpop.permute.xlu1 %3205 }
0x3b5d   : > { %3208 = vst.msk [vmem:[#allocation2 + $0x30] sm:$0xff] %vm571_vm2, %v3206_v56  ;;  %6980 = vmatmul.mubr.msk.f32.vlgmr.msra.gmra.mxu1 %vm571_vm2, %v3206_v56 }
0x3b5e   : > { %6994 = vmatpush3.msra.mxu1 %v8311_v43  ;;  %7001 = vmatprep.mubr.msk.f32.mxu1 %vm7796_vm1, %v7795_v2 }
0x3b5f   : > { %6995 = vmatprep.subr.mxu1 %v7795_v2 }
0x3b60   : > { %6996 = vmatpush3.msra.mxu1 %v8317_v54 }
0x3b61   : > { %6997 = vmatprep.subr.mxu1 %v7795_v2 }
0x3b62   : > { %6998 = vmatpush3.msra.mxu1 %v8324_v45 }
0x3b63   : > { %6999 = vmatprep.subr.mxu1 %v7795_v2 }
0x3b64   : > { %7000 = vmatpush3.msra.mxu1 %v8331_v55 }
0x3b65   : > { %7015 = vmatprep.subr.mxu1 %v7795_v2 }
0x3c1d   : > { %v3278_v51 = vpop.f32.mrf.mxu1 }
0x3c1e   : > { %v3282_v46 = vadd.f32 %v3278_v51, %v2427_v11 }
0x3c1f   : > { %v6981_v57 = vpop.f32.mrf.mxu1 }
0x3c20   : > { %7516 = vtanh.f32 %v3282_v46  ;;  %v6274_v60 = vmul.f32 -1.442695, %v3282_v46  ;;  %v2442_v46 = vadd.f32 %v8368_v1, %v8459_v34 }
0x3c22   : > { %7518 = vpow2.f32 %v6274_v60 }
0x3c2d   : > { %v7517_v58 = vpop.eup %7516 }
0x3c2e   : > { %3292 = vrot.lane.b32.xlu0 %v7517_v58, %s7797_s28 }
0x3c2f   : > { %v7519_v62 = vpop.eup %7518 }
0x3c30   : > { %v3286_v63 = vadd.f32 1.0, %v7519_v62 }
0x3c32   : > { %7520 = vrcp.f32 %v3286_v63 }
0x3c3f   : > { %v7521_v4 = vpop.eup %7520 }
0x3c40   : > { %v3289_v9 = vmul.f32 %v7521_v4, %v3197_v47 }
0x3ca0   : > { %v3293_v7 = vpop.permute.xlu0 %3292 }
0x3ca1   : > { %v3295_v8 = vmul.f32 %v7521_v4, %v3293_v7 }
0x3ca3   : > { %3297 = vrot.lane.b32.xlu1 %v3295_v8, %s7797_s28 }
0x3d15   : > { %v3298_v10 = vpop.permute.xlu1 %3297 }
0x3d16   : > { %v3300_v30 = vadd.f32 %v3298_v10, %v3289_v9 }
0x3d18   : > { %7522 = vtanh.f32 %v3300_v30 }
0x3d25   : > { %v7523_v52 = vpop.eup %7522 }
0x3d26   : > { %3303 = vrot.lane.b32.xlu0 %v7523_v52, %s7797_s28 }
0x3d98   : > { %v3304_v59 = vpop.permute.xlu0 %3303 }
0x3d99   : > { %v3306_v61 = vmul.f32 %v7521_v4, %v3304_v59 }
0x3d9b   : > { %3308 = vrot.lane.b32.xlu1 %v3306_v61, %s7798_s29 }
0x3e0d   : > { %v3309_v12 = vpop.permute.xlu1 %3308 }
0x3e0e   : > { %3311 = vst.msk [vmem:[#allocation2 + $0x38] sm:$0xff] %vm571_vm2, %v3309_v12  ;;  %6991 = vmatmul.mubr.msk.f32.vlgmr.msra.gmra.mxu0 %vm571_vm2, %v3309_v12 }
0x3e0f   : > { %7005 = vmatpush3.msra.mxu0 %v8311_v43  ;;  %7012 = vmatprep.mubr.msk.f32.mxu0 %vm7796_vm1, %v7795_v2 }
0x3e10   : > { %7006 = vmatprep.subr.mxu0 %v7795_v2 }
0x3e11   : > { %7007 = vmatpush3.msra.mxu0 %v8317_v54 }
0x3e12   : > { %7008 = vmatprep.subr.mxu0 %v7795_v2 }
0x3e13   : > { %7009 = vmatpush3.msra.mxu0 %v8324_v45 }
0x3e14   : > { %7010 = vmatprep.subr.mxu0 %v7795_v2 }
0x3e15   : > { %7011 = vmatpush3.msra.mxu0 %v8331_v55 }
0x3e16   : > { %7026 = vmatprep.subr.mxu0 %v7795_v2 }
0x3ece   : > { %v3381_v44 = vpop.f32.mrf.mxu0 }
0x3ecf   : > { %v3385_v41 = vadd.f32 %v3381_v44, %v2432_v13 }
0x3ed0   : > { %v6992_v50 = vpop.f32.mrf.mxu0 }
0x3ed1   : > { %7524 = vtanh.f32 %v3385_v41  ;;  %v6276_v49 = vmul.f32 -1.442695, %v3385_v41 }
0x3ed3   : > { %7526 = vpow2.f32 %v6276_v49 }
0x3ede   : > { %v7525_v14 = vpop.eup %7524 }
0x3edf   : > { %3395 = vrot.lane.b32.xlu0 %v7525_v14, %s7797_s28 }
0x3ee0   : > { %v7527_v15 = vpop.eup %7526 }
0x3ee1   : > { %v3389_v16 = vadd.f32 1.0, %v7527_v15 }
0x3ee3   : > { %7528 = vrcp.f32 %v3389_v16 }
0x3ef0   : > { %v7529_v17 = vpop.eup %7528 }
0x3ef1   : > { %v3392_v19 = vmul.f32 %v7529_v17, %v3300_v30 }
0x3f51   : > { %v3396_v18 = vpop.permute.xlu0 %3395 }
0x3f52   : > { %v3398_v0 = vmul.f32 %v7529_v17, %v3396_v18 }
0x3f54   : > { %3400 = vrot.lane.b32.xlu1 %v3398_v0, %s7797_s28 }
0x3fc6   : > { %v3401_v20 = vpop.permute.xlu1 %3400 }
0x3fc7   : > { %v3403_v32 = vadd.f32 %v3401_v20, %v3392_v19 }
0x3fc9   : > { %7530 = vtanh.f32 %v3403_v32 }
0x3fd6   : > { %v7531_v21 = vpop.eup %7530 }
0x3fd7   : > { %3406 = vrot.lane.b32.xlu0 %v7531_v21, %s7797_s28  ;;  %v7723_v21 = vld [vmem:[%s9082_s5 + $0x18] sm:$0xff] }
0x4049   : > { %v3407_v22 = vpop.permute.xlu0 %3406 }
0x404a   : > { %v3409_v3 = vmul.f32 %v7529_v17, %v3407_v22  ;;  %v7724_v22 = vld [vmem:[%s9082_s5 + $0x10] sm:$0xff] }
0x404c   : > { %3411 = vrot.lane.b32.xlu1 %v3409_v3, %s7798_s29  ;;  %v7725_v3 = vld [vmem:[%s9082_s5 + $0x8] sm:$0xff] }
0x40be   : > { %v3412_v23 = vpop.permute.xlu1 %3411 }
0x40bf   : > { %3414 = vst.msk [vmem:[#allocation2 + $0x40] sm:$0xff] %vm571_vm2, %v3412_v23  ;;  %7002 = vmatmul.mubr.msk.f32.vlgmr.msra.gmra.mxu1 %vm571_vm2, %v3412_v23  ;;  %v7726_v23 = vld [vmem:[%s9082_s5] sm:$0xff] }
0x40c0   : > { %7016 = vmatpush3.msra.mxu1 %v8311_v43  ;;  %7023 = vmatprep.mubr.msk.f32.mxu1 %vm7796_vm1, %v7795_v2 }
0x40c1   : > { %7017 = vmatprep.subr.mxu1 %v7795_v2 }
0x40c2   : > { %7018 = vmatpush3.msra.mxu1 %v8317_v54 }
0x40c3   : > { %7019 = vmatprep.subr.mxu1 %v7795_v2 }
0x40c4   : > { %7020 = vmatpush3.msra.mxu1 %v8324_v45 }
0x40c5   : > { %7021 = vmatprep.subr.mxu1 %v7795_v2 }
0x40c6   : > { %7022 = vmatpush3.msra.mxu1 %v8331_v55 }
0x40c7   : > { %7037 = vmatprep.subr.mxu1 %v7795_v2 }
0x417f   : > { %v3484_v24 = vpop.f32.mrf.mxu1 }
0x4180   : > { %v3488_v25 = vadd.f32 %v3484_v24, %v2437_v5  ;;  %v2452_v5 = vadd.f32 %v8368_v1, %v8463_v36 }
0x4181   : > { %v7003_v6 = vpop.f32.mrf.mxu1 }
0x4182   : > { %7532 = vtanh.f32 %v3488_v25  ;;  %v6278_v27 = vmul.f32 -1.442695, %v3488_v25 }
0x4184   : > { %7534 = vpow2.f32 %v6278_v27 }
0x418f   : > { %v7533_v26 = vpop.eup %7532 }
0x4190   : > { %3498 = vrot.lane.b32.xlu0 %v7533_v26, %s7797_s28 }
0x4191   : > { %v7535_v48 = vpop.eup %7534 }
0x4192   : > { %v3492_v28 = vadd.f32 1.0, %v7535_v48 }
0x4194   : > { %7536 = vrcp.f32 %v3492_v28 }
0x41a1   : > { %v7537_v29 = vpop.eup %7536 }
0x41a2   : > { %v3495_v40 = vmul.f32 %v7537_v29, %v3403_v32 }
0x4202   : > { %v3499_v39 = vpop.permute.xlu0 %3498 }
0x4203   : > { %v3501_v47 = vmul.f32 %v7537_v29, %v3499_v39 }
0x4205   : > { %3503 = vrot.lane.b32.xlu1 %v3501_v47, %s7797_s28 }
0x4277   : > { %v3504_v53 = vpop.permute.xlu1 %3503 }
0x4278   : > { %v3506_v31 = vadd.f32 %v3504_v53, %v3495_v40 }
0x427a   : > { %7538 = vtanh.f32 %v3506_v31 }
0x4287   : > { %v7539_v42 = vpop.eup %7538 }
0x4288   : > { %3509 = vrot.lane.b32.xlu0 %v7539_v42, %s7797_s28 }
0x42fa   : > { %v3510_v56 = vpop.permute.xlu0 %3509 }
0x42fb   : > { %v3512_v11 = vmul.f32 %v7537_v29, %v3510_v56 }
0x42fd   : > { %3514 = vrot.lane.b32.xlu1 %v3512_v11, %s7798_s29  ;;  %v8635_v11 = vld [vmem:[%s9083_s6] ss:$0 sm:$0xff] }
0x436f   : > { %v3515_v51 = vpop.permute.xlu1 %3514 }
0x4370   : > { %3517 = vst.msk [vmem:[#allocation2 + $0x48] sm:$0xff] %vm571_vm2, %v3515_v51  ;;  %7013 = vmatmul.mubr.msk.f32.vlgmr.msra.gmra.mxu0 %vm571_vm2, %v3515_v51  ;;  %v2457_v51 = vadd.f32 %v8635_v11, %v8461_v35 }
0x4371   : > { %7027 = vmatpush3.msra.mxu0 %v8311_v43  ;;  %7034 = vmatprep.mubr.msk.f32.mxu0 %vm7796_vm1, %v7795_v2 }
0x4372   : > { %7028 = vmatprep.subr.mxu0 %v7795_v2 }
0x4373   : > { %7029 = vmatpush3.msra.mxu0 %v8317_v54 }
0x4374   : > { %7030 = vmatprep.subr.mxu0 %v7795_v2 }
0x4375   : > { %7031 = vmatpush3.msra.mxu0 %v8324_v45 }
0x4376   : > { %7032 = vmatprep.subr.mxu0 %v7795_v2 }
0x4377   : > { %7033 = vmatpush3.msra.mxu0 %v8331_v55 }
0x4378   : > { %7048 = vmatprep.subr.mxu0 %v7795_v2 }
0x4430   : > { %v3587_v57 = vpop.f32.mrf.mxu0 }
0x4431   : > { %v3591_v58 = vadd.f32 %v3587_v57, %v2442_v46 }
0x4432   : > { %v7014_v60 = vpop.f32.mrf.mxu0 }
0x4433   : > { %7540 = vtanh.f32 %v3591_v58  ;;  %v6280_v63 = vmul.f32 -1.442695, %v3591_v58 }
0x4435   : > { %7542 = vpow2.f32 %v6280_v63 }
0x4440   : > { %v7541_v62 = vpop.eup %7540 }
0x4441   : > { %3601 = vrot.lane.b32.xlu0 %v7541_v62, %s7797_s28 }
0x4442   : > { %v7543_v4 = vpop.eup %7542 }
0x4443   : > { %v3595_v7 = vadd.f32 1.0, %v7543_v4 }
0x4445   : > { %7544 = vrcp.f32 %v3595_v7 }
0x4452   : > { %v7545_v8 = vpop.eup %7544 }
0x4453   : > { %v3598_v30 = vmul.f32 %v7545_v8, %v3506_v31 }
0x44b3   : > { %v3602_v9 = vpop.permute.xlu0 %3601 }
0x44b4   : > { %v3604_v10 = vmul.f32 %v7545_v8, %v3602_v9 }
0x44b6   : > { %3606 = vrot.lane.b32.xlu1 %v3604_v10, %s7797_s28 }
0x4528   : > { %v3607_v52 = vpop.permute.xlu1 %3606 }
0x4529   : > { %v3609_v34 = vadd.f32 %v3607_v52, %v3598_v30  ;;  %v6294_v52 = vld [vmem:[%s9081_s4 + $0x38] sm:$0xff] }
0x452b   : > { %7546 = vtanh.f32 %v3609_v34 }
0x4538   : > { %v7547_v59 = vpop.eup %7546 }
0x4539   : > { %3612 = vrot.lane.b32.xlu0 %v7547_v59, %s7797_s28 }
0x45ab   : > { %v3613_v61 = vpop.permute.xlu0 %3612 }
0x45ac   : > { %v3615_v12 = vmul.f32 %v7545_v8, %v3613_v61 }
0x45ae   : > { %3617 = vrot.lane.b32.xlu1 %v3615_v12, %s7798_s29 }
0x4620   : > { %v3618_v13 = vpop.permute.xlu1 %3617 }
0x4621   : > { %3620 = vst.msk [vmem:[#allocation2 + $0x50] sm:$0xff] %vm571_vm2, %v3618_v13  ;;  %7024 = vmatmul.mubr.msk.f32.vlgmr.msra.gmra.mxu1 %vm571_vm2, %v3618_v13  ;;  %v6293_v13 = vld [vmem:[%s9081_s4 + $0x30] sm:$0xff] }
0x4622   : > { %7038 = vmatpush3.msra.mxu1 %v8311_v43  ;;  %7045 = vmatprep.mubr.msk.f32.mxu1 %vm7796_vm1, %v7795_v2  ;;  %v2447_v43 = vadd.f32 %v8457_v33, %v8368_v1 }
0x4623   : > { %7039 = vmatprep.subr.mxu1 %v7795_v2 }
0x4624   : > { %7040 = vmatpush3.msra.mxu1 %v8317_v54 }
0x4625   : > { %7041 = vmatprep.subr.mxu1 %v7795_v2 }
0x4626   : > { %7042 = vmatpush3.msra.mxu1 %v8324_v45 }
0x4627   : > { %7043 = vmatprep.subr.mxu1 %v7795_v2 }
0x4628   : > { %7044 = vmatpush3.msra.mxu1 %v8331_v55 }
0x4629   : > { %7059 = vmatprep.subr.mxu1 %v7795_v2 }
0x46e1   : > { %v3690_v44 = vpop.f32.mrf.mxu1 }
0x46e2   : > { %v3694_v41 = vadd.f32 %v3690_v44, %v2447_v43  ;;  %v4136_v43 = vld [vmem:[#allocation2] sm:$0xff]  ;;  %v6292_v44 = vld [vmem:[%s9081_s4 + $0x28] sm:$0xff] }
0x46e3   : > { %v7025_v50 = vpop.f32.mrf.mxu1 }
0x46e4   : > { %7548 = vtanh.f32 %v3694_v41  ;;  %v6282_v54 = vmul.f32 -1.442695, %v3694_v41  ;;  %v6291_v41 = vld [vmem:[%s9081_s4 + $0x20] sm:$0xff]  ;;  %v4137_v50 = vld [vmem:[#allocation2 + $0x8] sm:$0xff] }
0x46e6   : > { %7550 = vpow2.f32 %v6282_v54  ;;  %v4139_v54 = vld [vmem:[#allocation2 + $0x18] sm:$0xff] }
0x46f1   : > { %v7549_v14 = vpop.eup %7548 }
0x46f2   : > { %3704 = vrot.lane.b32.xlu0 %v7549_v14, %s7797_s28  ;;  %v4138_v14 = vld [vmem:[#allocation2 + $0x10] sm:$0xff] }
0x46f3   : > { %v7551_v49 = vpop.eup %7550 }
0x46f4   : > { %v3698_v45 = vadd.f32 1.0, %v7551_v49  ;;  %v4140_v49 = vld [vmem:[#allocation2 + $0x20] sm:$0xff] }
0x46f6   : > { %7552 = vrcp.f32 %v3698_v45  ;;  %v4141_v45 = vld [vmem:[#allocation2 + $0x28] sm:$0xff] }
0x4703   : > { %v7553_v15 = vpop.eup %7552 }
0x4704   : > { %v3701_v17 = vmul.f32 %v7553_v15, %v3609_v34 }
0x4764   : > { %v3705_v16 = vpop.permute.xlu0 %3704 }
0x4765   : > { %v3707_v55 = vmul.f32 %v7553_v15, %v3705_v16  ;;  %v4143_v16 = vld [vmem:[#allocation2 + $0x38] sm:$0xff] }
0x4767   : > { %3709 = vrot.lane.b32.xlu1 %v3707_v55, %s7797_s28  ;;  %v4144_v55 = vld [vmem:[#allocation2 + $0x40] sm:$0xff] }
0x47d9   : > { %v3710_v18 = vpop.permute.xlu1 %3709 }
0x47da   : > { %v3712_v33 = vadd.f32 %v3710_v18, %v3701_v17  ;;  %v4145_v17 = vld [vmem:[#allocation2 + $0x48] sm:$0xff]  ;;  %v4146_v18 = vld [vmem:[#allocation2 + $0x50] sm:$0xff] }
0x47dc   : > { %7554 = vtanh.f32 %v3712_v33 }
0x47e9   : > { %v7555_v0 = vpop.eup %7554 }
0x47ea   : > { %3715 = vrot.lane.b32.xlu0 %v7555_v0, %s7797_s28 }
0x485c   : > { %v3716_v19 = vpop.permute.xlu0 %3715 }
0x485d   : > { %v3718_v20 = vmul.f32 %v7553_v15, %v3716_v19  ;;  %v4142_v15 = vld [vmem:[#allocation2 + $0x30] sm:$0xff] }
0x485f   : > { %3720 = vrot.lane.b32.xlu1 %v3718_v20, %s7798_s29  ;;  %v2462_v20 = vadd.f32 %v8635_v11, %v8467_v38 }
0x48d1   : > { %v3721_v32 = vpop.permute.xlu1 %3720 }
0x48d2   : > { %3723 = vst.msk [vmem:[#allocation2 + $0x58] sm:$0xff] %vm571_vm2, %v3721_v32  ;;  %7035 = vmatmul.mubr.msk.f32.vlgmr.msra.gmra.mxu0 %vm571_vm2, %v3721_v32 }
0x48d3   : > { %7049 = vmatpush3.msra.mxu0 %v7723_v21  ;;  %7056 = vmatprep.mubr.msk.f32.mxu0 %vm7796_vm1, %v7795_v2 }
0x48d4   : > { %7050 = vmatprep.subr.mxu0 %v7795_v2 }
0x48d5   : > { %7051 = vmatpush3.msra.mxu0 %v7724_v22 }
0x48d6   : > { %7052 = vmatprep.subr.mxu0 %v7795_v2 }
0x48d7   : > { %7053 = vmatpush3.msra.mxu0 %v7725_v3 }
0x48d8   : > { %7054 = vmatprep.subr.mxu0 %v7795_v2 }
0x48d9   : > { %7055 = vmatpush3.msra.mxu0 %v7726_v23 }
0x48da   : > { %7070 = vmatprep.subr.mxu0 %v6294_v52 }
0x4992   : > { %v3793_v24 = vpop.f32.mrf.mxu0 }
0x4993   : > { %v3797_v25 = vadd.f32 %v3793_v24, %v2452_v5 }
0x4994   : > { %v7036_v6 = vpop.f32.mrf.mxu0 }
0x4995   : > { %7556 = vtanh.f32 %v3797_v25  ;;  %v6284_v27 = vmul.f32 -1.442695, %v3797_v25 }
0x4997   : > { %7558 = vpow2.f32 %v6284_v27 }
0x49a2   : > { %v7557_v26 = vpop.eup %7556 }
0x49a3   : > { %3807 = vrot.lane.b32.xlu0 %v7557_v26, %s7797_s28 }
0x49a4   : > { %v7559_v48 = vpop.eup %7558 }
0x49a5   : > { %v3801_v28 = vadd.f32 1.0, %v7559_v48 }
0x49a7   : > { %7560 = vrcp.f32 %v3801_v28 }
0x49b4   : > { %v7561_v29 = vpop.eup %7560 }
0x49b5   : > { %v3804_v40 = vmul.f32 %v7561_v29, %v3712_v33  ;;  %v4147_v33 = vld [vmem:[#allocation2 + $0x58] sm:$0xff] }
0x4a15   : > { %v3808_v39 = vpop.permute.xlu0 %3807 }
0x4a16   : > { %v3810_v47 = vmul.f32 %v7561_v29, %v3808_v39  ;;  %v8693_v39 = vld [vmem:[%s9082_s5 + $0x30] sm:$0xff] }
0x4a18   : > { %3812 = vrot.lane.b32.xlu1 %v3810_v47, %s7797_s28  ;;  %v8700_v47 = vld [vmem:[%s9082_s5 + $0x28] sm:$0xff] }
0x4a8a   : > { %v3813_v53 = vpop.permute.xlu1 %3812 }
0x4a8b   : > { %v3815_v1 = vadd.f32 %v3813_v53, %v3804_v40  ;;  %v8707_v40 = vld [vmem:[%s9082_s5 + $0x20] sm:$0xff] }
0x4a8d   : > { %7562 = vtanh.f32 %v3815_v1 }
0x4a9a   : > { %v7563_v36 = vpop.eup %7562 }
0x4a9b   : > { %3818 = vrot.lane.b32.xlu0 %v7563_v36, %s7797_s28 }
0x4b0d   : > { %v3819_v31 = vpop.permute.xlu0 %3818 }
0x4b0e   : > { %v3821_v42 = vmul.f32 %v7561_v29, %v3819_v31  ;;  %v8687_v29 = vld [vmem:[%s9082_s5 + $0x38] sm:$0xff] }
0x4b10   : > { %3823 = vrot.lane.b32.xlu1 %v3821_v42, %s7798_s29  ;;  %v2467_v42 = vadd.f32 %v8635_v11, %v8465_v37 }
0x4b82   : > { %v3824_v56 = vpop.permute.xlu1 %3823 }
0x4b83   : > { %3826 = vst.msk [vmem:[#allocation2 + $0x60] sm:$0xff] %vm571_vm2, %v3824_v56  ;;  %7046 = vmatmul.mubr.msk.f32.vlgmr.msra.gmra.mxu1 %vm571_vm2, %v3824_v56 }
0x4b84   : > { %7060 = vmatpush3.msra.mxu1 %v7723_v21  ;;  %7067 = vmatprep.mubr.msk.f32.mxu1 %vm7796_vm1, %v7795_v2 }
0x4b85   : > { %7061 = vmatprep.subr.mxu1 %v7795_v2 }
0x4b86   : > { %7062 = vmatpush3.msra.mxu1 %v7724_v22 }
0x4b87   : > { %7063 = vmatprep.subr.mxu1 %v7795_v2 }
0x4b88   : > { %7064 = vmatpush3.msra.mxu1 %v7725_v3 }
0x4b89   : > { %7065 = vmatprep.subr.mxu1 %v7795_v2 }
0x4b8a   : > { %7066 = vmatpush3.msra.mxu1 %v7726_v23  ;;  %v4148_v0 = vld [vmem:[#allocation2 + $0x60] sm:$0xff] }
0x4b8b   : > { %7102 = vmatprep.subr.mxu1 %v7795_v2 }
0x4c43   : > { %v3896_v46 = vpop.f32.mrf.mxu1 }
0x4c44   : > { %v3900_v57 = vadd.f32 %v3896_v46, %v2457_v51 }
0x4c45   : > { %v7047_v58 = vpop.f32.mrf.mxu1 }
0x4c46   : > { %7564 = vtanh.f32 %v3900_v57  ;;  %v6286_v62 = vmul.f32 -1.442695, %v3900_v57 }
0x4c48   : > { %7566 = vpow2.f32 %v6286_v62 }
0x4c53   : > { %v7565_v60 = vpop.eup %7564 }
0x4c54   : > { %3910 = vrot.lane.b32.xlu0 %v7565_v60, %s7797_s28  ;;  %v8744_v60 = vld [vmem:[%s9083_s6 + $0x1] ss:$0 sm:$0xff] }
0x4c55   : > { %v7567_v63 = vpop.eup %7566 }
0x4c56   : > { %v3904_v4 = vadd.f32 1.0, %v7567_v63 }
0x4c58   : > { %7568 = vrcp.f32 %v3904_v4 }
0x4c65   : > { %v7569_v7 = vpop.eup %7568 }
0x4c66   : > { %v3907_v10 = vmul.f32 %v7569_v7, %v3815_v1 }
0x4cc6   : > { %v3911_v8 = vpop.permute.xlu0 %3910 }
0x4cc7   : > { %v3913_v9 = vmul.f32 %v7569_v7, %v3911_v8 }
0x4cc9   : > { %3915 = vrot.lane.b32.xlu1 %v3913_v9, %s7797_s28 }
0x4d3b   : > { %v3916_v30 = vpop.permute.xlu1 %3915 }
0x4d3c   : > { %v8641_v35 = vadd.f32 %v3916_v30, %v3907_v10 }
0x4d3e   : > { %7570 = vtanh.f32 %v8641_v35 }
0x4d4b   : > { %v7571_v34 = vpop.eup %7570 }
0x4d4c   : > { %3921 = vrot.lane.b32.xlu0 %v7571_v34, %s7797_s28 }
0x4dbe   : > { %v3922_v59 = vpop.permute.xlu0 %3921 }
0x4dbf   : > { %v3924_v61 = vmul.f32 %v7569_v7, %v3922_v59 }
0x4dc1   : > { %3926 = vrot.lane.b32.xlu1 %v3924_v61, %s7798_s29 }
0x4e33   : > { %v3927_v12 = vpop.permute.xlu1 %3926 }
0x4e34   : > { %3929 = vst.msk [vmem:[#allocation2 + $0x68] sm:$0xff] %vm571_vm2, %v3927_v12  ;;  %7057 = vmatmul.mubr.msk.f32.vlgmr.msra.gmra.mxu0 %vm571_vm2, %v3927_v12 }
0x4e35   : > { %7071 = vmatpush3.msra.mxu0 %v6294_v52  ;;  %7078 = vmatprep.mubr.msk.f32.mxu0 %vm571_vm2, %v4136_v43 }
0x4e36   : > { %7072 = vmatprep.subr.mxu0 %v6293_v13 }
0x4e37   : > { %7073 = vmatpush3.msra.mxu0 %v6293_v13 }
0x4e38   : > { %7074 = vmatprep.subr.mxu0 %v6292_v44 }
0x4e39   : > { %7075 = vmatpush3.msra.mxu0 %v6292_v44 }
0x4e3a   : > { %7076 = vmatprep.subr.mxu0 %v6291_v41 }
0x4e3b   : > { %7077 = vmatpush3.msra.mxu0 %v6291_v41  ;;  %v4149_v19 = vld [vmem:[#allocation2 + $0x68] sm:$0xff] }
0x4e3c   : > { %7079 = vmatmul.mubr.msk.f32.vlgmr.msra.gmra.mxu0 %vm571_vm2, %v4137_v50  ;;  %7146 = vmatprep.subr.mxu0 %v7795_v2 }
0x4e3d   : > { %7081 = vmatprep.mubr.msk.f32.mxu0 %vm571_vm2, %v4138_v14  ;;  %7147 = vmatpush3.msra.mxu0 %v8687_v29 }
0x4e3e   : > { %7148 = vmatprep.subr.mxu0 %v7795_v2 }
0x4e3f   : > { %7149 = vmatpush3.msra.mxu0 %v8693_v39 }
0x4e40   : > { %7082 = vmatmul.mubr.msk.f32.gmra.mxu0 %vm571_vm2, %v4139_v54  ;;  %7150 = vmatprep.subr.mxu0 %v7795_v2 }
0x4e41   : > { %7084 = vmatprep.mubr.msk.f32.mxu0 %vm571_vm2, %v4140_v49  ;;  %7151 = vmatpush3.msra.mxu0 %v8700_v47 }
0x4e42   : > { %7152 = vmatprep.subr.mxu0 %v7795_v2 }
0x4e43   : > { %7153 = vmatpush3.msra.mxu0 %v8707_v40 }
0x4e44   : > { %7085 = vmatmul.mubr.msk.f32.gmra.mxu0 %vm571_vm2, %v4141_v45  ;;  %7168 = vmatprep.subr.mxu0 %v7795_v2 }
0x4e45   : > { %7087 = vmatprep.mubr.msk.f32.mxu0 %vm571_vm2, %v4142_v15 }
0x4e48   : > { %7088 = vmatmul.mubr.msk.f32.gmra.mxu0 %vm571_vm2, %v4143_v16 }
0x4e49   : > { %7090 = vmatprep.mubr.msk.f32.mxu0 %vm571_vm2, %v4144_v55 }
0x4e4c   : > { %7091 = vmatmul.mubr.msk.f32.gmra.mxu0 %vm571_vm2, %v4145_v17 }
0x4e4d   : > { %7093 = vmatprep.mubr.msk.f32.mxu0 %vm571_vm2, %v4146_v18 }
0x4e50   : > { %7094 = vmatmul.mubr.msk.f32.gmra.mxu0 %vm571_vm2, %v4147_v33 }
0x4e51   : > { %7096 = vmatprep.mubr.msk.f32.mxu0 %vm571_vm2, %v4148_v0 }
0x4e54   : > { %7097 = vmatmul.mubr.msk.f32.gmra.mxu0 %vm571_vm2, %v4149_v19 }
0x4ef4   : > { %v3999_v32 = vpop.f32.mrf.mxu0 }
0x4ef5   : > { %v4003_v21 = vadd.f32 %v3999_v32, %v2462_v20 }
0x4ef6   : > { %v7058_v22 = vpop.f32.mrf.mxu0 }
0x4ef7   : > { %7572 = vtanh.f32 %v4003_v21  ;;  %v6288_v23 = vmul.f32 -1.442695, %v4003_v21 }
0x4ef9   : > { %7574 = vpow2.f32 %v6288_v23 }
0x4efc   : > { %v7080_v56 = vpop.f32.mrf.mxu0 }
0x4efd   : > { %v4285_v44 = vadd.f32 %v7080_v56, %v8744_v60 }
0x4efe   : > { %v4279_v58 = vpop.f32.mrf.mxu0 }
0x4eff   : > { %v4280_v62 = vadd.f32 %v8744_v60, %v4279_v58 }
0x4f00   : > { %v7083_v22 = vpop.f32.mrf.mxu0 }
0x4f04   : > { %v7573_v3 = vpop.eup %7572 }
0x4f05   : > { %4013 = vrot.lane.b32.xlu0 %v7573_v3, %s7797_s28  ;;  %v4289_v3 = vpop.f32.mrf.mxu0 }
0x4f06   : > { %v7575_v5 = vpop.eup %7574  ;;  %v4290_v23 = vadd.f32 %v8744_v60, %v4289_v3 }
0x4f07   : > { %v4007_v24 = vadd.f32 1.0, %v7575_v5 }
0x4f09   : > { %7576 = vrcp.f32 %v4007_v24 }
0x4f16   : > { %v7577_v25 = vpop.eup %7576 }
0x4f17   : > { %v4010_v27 = vmul.f32 %v7577_v25, %v8641_v35 }
0x4f77   : > { %v4014_v6 = vpop.permute.xlu0 %4013 }
0x4f78   : > { %v4016_v26 = vmul.f32 %v7577_v25, %v4014_v6 }
0x4f7a   : > { %4018 = vrot.lane.b32.xlu1 %v4016_v26, %s7797_s28 }
0x4fec   : > { %v4019_v38 = vpop.permute.xlu1 %4018 }
0x4fed   : > { %v8680_v48 = vadd.f32 %v4019_v38, %v4010_v27 }
0x4fef   : > { %7578 = vtanh.f32 %v8680_v48 }
0x4ffc   : > { %v7579_v28 = vpop.eup %7578 }
0x4ffd   : > { %4024 = vrot.lane.b32.xlu0 %v7579_v28, %s7797_s28 }
0x506f   : > { %v4025_v53 = vpop.permute.xlu0 %4024 }
0x5070   : > { %v4027_v1 = vmul.f32 %v7577_v25, %v4025_v53 }
0x5072   : > { %4029 = vrot.lane.b32.xlu1 %v4027_v1, %s7798_s29 }
0x50e4   : > { %v4030_v36 = vpop.permute.xlu1 %4029 }
0x50e5   : > { %4032 = vst.msk [vmem:[#allocation2 + $0x70] sm:$0xff] %vm571_vm2, %v4030_v36  ;;  %7068 = vmatmul.mubr.msk.f32.vlgmr.msra.gmra.mxu1 %vm571_vm2, %v4030_v36 }
0x50e6   : > { %7103 = vmatpush3.msra.mxu1 %v8687_v29  ;;  %7110 = vmatprep.mubr.msk.f32.mxu1 %vm7796_vm1, %v7795_v2 }
0x50e7   : > { %7104 = vmatprep.subr.mxu1 %v7795_v2 }
0x50e8   : > { %7105 = vmatpush3.msra.mxu1 %v8693_v39 }
0x50e9   : > { %7106 = vmatprep.subr.mxu1 %v7795_v2 }
0x50ea   : > { %7107 = vmatpush3.msra.mxu1 %v8700_v47 }
0x50eb   : > { %7108 = vmatprep.subr.mxu1 %v7795_v2 }
0x50ec   : > { %7109 = vmatpush3.msra.mxu1 %v8707_v40  ;;  %v4150_v31 = vld [vmem:[#allocation2 + $0x70] sm:$0xff] }
0x50ed   : > { %7111 = vmatmul.mubr.f32.vlgmr.msra.gmra.mxu1 %v7795_v2  ;;  %7099 = vmatprep.mubr.msk.f32.mxu0 %vm571_vm2, %v4150_v31 }
0x50ee   : > { %7113 = vmatprep.subr.mxu1 %v7795_v2  ;;  %7121 = vmatprep.mubr.msk.f32.mxu1 %vm7796_vm1, %v7795_v2 }
0x50ef   : > { %7114 = vmatpush3.msra.mxu1 %v8687_v29 }
0x50f0   : > { %7115 = vmatprep.subr.mxu1 %v7795_v2 }
0x50f1   : > { %7116 = vmatpush3.msra.mxu1 %v8693_v39 }
0x50f2   : > { %7117 = vmatprep.subr.mxu1 %v7795_v2 }
0x50f3   : > { %7118 = vmatpush3.msra.mxu1 %v8700_v47 }
0x50f4   : > { %7119 = vmatprep.subr.mxu1 %v7795_v2 }
0x50f5   : > { %7120 = vmatpush3.msra.mxu1 %v8707_v40 }
0x50f6   : > { %7124 = vmatprep.subr.mxu1 %v7795_v2 }
0x51a5   : > { %v4102_v51 = vpop.f32.mrf.mxu1 }
0x51a6   : > { %v8739_v46 = vadd.f32 %v4102_v51, %v2467_v42 }
0x51a7   : > { %v7069_v57 = vpop.f32.mrf.mxu1 }
0x51a8   : > { %v6290_v57 = vmul.f32 -1.442695, %v8739_v46 }
0x51ad   : > { %v4446_v63 = vpop.f32.mrf.mxu1 }
0x51ae   : > { %v4450_v4 = vadd.f32 %v4446_v63, %v4280_v62 }
0x51af   : > { %v7112_v7 = vpop.f32.mrf.mxu1 }
0x51b0   : > { %7580 = vtanh.f32 %v4450_v4  ;;  %v6317_v37 = vmul.f32 -1.442695, %v4450_v4 }
0x51b2   : > { %7582 = vpow2.f32 %v6317_v37 }
0x51bd   : > { %v7581_v8 = vpop.eup %7580 }
0x51be   : > { %4460 = vrot.lane.b32.xlu0 %v7581_v8, %s7797_s28 }
0x51bf   : > { %v7583_v11 = vpop.eup %7582 }
0x51c0   : > { %v4454_v9 = vadd.f32 1.0, %v7583_v11 }
0x51c2   : > { %7584 = vrcp.f32 %v4454_v9 }
0x51cf   : > { %v7585_v10 = vpop.eup %7584 }
0x51d0   : > { %v4457_v52 = vmul.f32 0.0, %v7585_v10 }
0x5230   : > { %v4461_v30 = vpop.permute.xlu0 %4460 }
0x5231   : > { %v4463_v35 = vmul.f32 %v7585_v10, %v4461_v30 }
0x5233   : > { %4465 = vrot.lane.b32.xlu1 %v4463_v35, %s7797_s28 }
0x52a5   : > { %v4466_v34 = vpop.permute.xlu1 %4465 }
0x52a6   : > { %v4468_v59 = vadd.f32 %v4466_v34, %v4457_v52 }
0x52a8   : > { %7586 = vtanh.f32 %v4468_v59 }
0x52b5   : > { %v7587_v61 = vpop.eup %7586 }
0x52b6   : > { %4471 = vrot.lane.b32.xlu0 %v7587_v61, %s7797_s28 }
0x5328   : > { %v4472_v12 = vpop.permute.xlu0 %4471 }
0x5329   : > { %v8750_v13 = vmul.f32 %v7585_v10, %v4472_v12 }
0x532b   : > { %4478 = vrot.lane.b32.xlu1 %v8750_v13, %s7798_s29 }
0x539d   : > { %v4479_v43 = vpop.permute.xlu1 %4478 }
0x539e   : > { %7122 = vmatmul.mubr.msk.f32.vlgmr.msra.gmra.mxu1 %vm571_vm2, %v4479_v43 }
0x539f   : > { %7125 = vmatpush3.msra.mxu1 %v8687_v29  ;;  %7132 = vmatprep.mubr.msk.f32.mxu1 %vm7796_vm1, %v7795_v2 }
0x53a0   : > { %7126 = vmatprep.subr.mxu1 %v7795_v2 }
0x53a1   : > { %7127 = vmatpush3.msra.mxu1 %v8693_v39 }
0x53a2   : > { %7128 = vmatprep.subr.mxu1 %v7795_v2 }
0x53a3   : > { %7129 = vmatpush3.msra.mxu1 %v8700_v47 }
0x53a4   : > { %7130 = vmatprep.subr.mxu1 %v7795_v2 }
0x53a5   : > { %7131 = vmatpush3.msra.mxu1 %v8707_v40 }
0x53a6   : > { %7135 = vmatprep.subr.mxu1 %v7795_v2 }
0x545e   : > { %v4548_v41 = vpop.f32.mrf.mxu1 }
0x545f   : > { %v4552_v50 = vadd.f32 %v4548_v41, %v4285_v44 }
0x5460   : > { %v7123_v14 = vpop.f32.mrf.mxu1 }
0x5461   : > { %7588 = vtanh.f32 %v4552_v50  ;;  %v6319_v49 = vmul.f32 -1.442695, %v4552_v50 }
0x5463   : > { %7590 = vpow2.f32 %v6319_v49 }
0x546e   : > { %v7589_v54 = vpop.eup %7588 }
0x546f   : > { %4562 = vrot.lane.b32.xlu0 %v7589_v54, %s7797_s28 }
0x5470   : > { %v7591_v45 = vpop.eup %7590 }
0x5471   : > { %v4556_v15 = vadd.f32 1.0, %v7591_v45 }
0x5473   : > { %7592 = vrcp.f32 %v4556_v15 }
0x5480   : > { %v7593_v16 = vpop.eup %7592 }
0x5481   : > { %v4559_v18 = vmul.f32 %v7593_v16, %v4468_v59  ;;  %v4295_v59 = vadd.f32 %v7083_v22, %v8744_v60 }
0x54e1   : > { %v4563_v55 = vpop.permute.xlu0 %4562 }
0x54e2   : > { %v4565_v17 = vmul.f32 %v7593_v16, %v4563_v55 }
0x54e4   : > { %4567 = vrot.lane.b32.xlu1 %v4565_v17, %s7797_s28 }
0x5556   : > { %v4568_v33 = vpop.permute.xlu1 %4567 }
0x5557   : > { %v4570_v0 = vadd.f32 %v4568_v33, %v4559_v18 }
0x5559   : > { %7594 = vtanh.f32 %v4570_v0 }
0x5566   : > { %v7595_v19 = vpop.eup %7594 }
0x5567   : > { %4573 = vrot.lane.b32.xlu0 %v7595_v19, %s7797_s28 }
0x55d9   : > { %v4574_v20 = vpop.permute.xlu0 %4573 }
0x55da   : > { %v4576_v32 = vmul.f32 %v7593_v16, %v4574_v20 }
0x55dc   : > { %4580 = vrot.lane.b32.xlu1 %v4576_v32, %s7798_s29  ;;  %v4577_v4 = vadd.f32 %v4576_v32, %v8750_v13  ;;  %v7086_v32 = vpop.f32.mrf.mxu0 }
0x564e   : > { %v4581_v21 = vpop.permute.xlu1 %4580 }
0x564f   : > { %7133 = vmatmul.mubr.msk.f32.vlgmr.msra.gmra.mxu1 %vm571_vm2, %v4581_v21  ;;  %v4299_v21 = vpop.f32.mrf.mxu0 }
0x5650   : > { %7136 = vmatpush3.msra.mxu1 %v8687_v29  ;;  %7143 = vmatprep.mubr.msk.f32.mxu1 %vm7796_vm1, %v7795_v2 }
0x5651   : > { %7137 = vmatprep.subr.mxu1 %v7795_v2  ;;  %v8825_v22 = vpop.f32.mrf.mxu0 }
0x5652   : > { %7138 = vmatpush3.msra.mxu1 %v8693_v39 }
0x5653   : > { %7139 = vmatprep.subr.mxu1 %v7795_v2  ;;  %v8827_v3 = vpop.f32.mrf.mxu0 }
0x5654   : > { %7140 = vmatpush3.msra.mxu1 %v8700_v47 }
0x5655   : > { %7141 = vmatprep.subr.mxu1 %v7795_v2 }
0x5656   : > { %7142 = vmatpush3.msra.mxu1 %v8707_v40 }
0x5657   : > { %7157 = vmatprep.subr.mxu1 %v7795_v2 }
0x570f   : > { %v4650_v5 = vpop.f32.mrf.mxu1 }
0x5710   : > { %v4654_v24 = vadd.f32 %v4650_v5, %v4290_v23  ;;  %v8829_v23 = vpop.f32.mrf.mxu0 }
0x5711   : > { %v7134_v25 = vpop.f32.mrf.mxu1 }
0x5712   : > { %7596 = vtanh.f32 %v4654_v24  ;;  %v6321_v26 = vmul.f32 -1.442695, %v4654_v24  ;;  %v8831_v5 = vpop.f32.mrf.mxu0 }
0x5714   : > { %7598 = vpow2.f32 %v6321_v26  ;;  %v8833_v24 = vpop.f32.mrf.mxu0 }
0x5716   : > { %v8835_v25 = vpop.f32.mrf.mxu0 }
0x571f   : > { %v7597_v6 = vpop.eup %7596 }
0x5720   : > { %4664 = vrot.lane.b32.xlu0 %v7597_v6, %s7797_s28  ;;  %v8837_v6 = vpop.f32.mrf.mxu0 }
0x5721   : > { %v7599_v27 = vpop.eup %7598 }
0x5722   : > { %v4658_v38 = vadd.f32 1.0, %v7599_v27  ;;  %v8839_v26 = vpop.f32.mrf.mxu0 }
0x5724   : > { %7600 = vrcp.f32 %v4658_v38 }
0x5731   : > { %v7601_v28 = vpop.eup %7600 }
0x5732   : > { %v4661_v36 = vmul.f32 %v7601_v28, %v4570_v0 }
0x5792   : > { %v4665_v53 = vpop.permute.xlu0 %4664 }
0x5793   : > { %v4667_v1 = vmul.f32 %v7601_v28, %v4665_v53 }
0x5795   : > { %4669 = vrot.lane.b32.xlu1 %v4667_v1, %s7797_s28 }
0x5807   : > { %v4670_v31 = vpop.permute.xlu1 %4669 }
0x5808   : > { %v4672_v42 = vadd.f32 %v4670_v31, %v4661_v36 }
0x580a   : > { %7602 = vtanh.f32 %v4672_v42 }
0x580b   : > { %7604 = vtanh.f32 %v8739_v46 }
0x580c   : > { %7606 = vpow2.f32 %v6290_v57 }
0x5817   : > { %v7603_v56 = vpop.eup %7602 }
0x5818   : > { %4675 = vrot.lane.b32.xlu0 %v7603_v56, %s7797_s28  ;;  %v7605_v51 = vpop.eup %7604 }
0x5819   : > { %v7607_v58 = vpop.eup %7606 }
0x581a   : > { %v4110_v62 = vadd.f32 1.0, %v7607_v58 }
0x581c   : > { %4116 = vrot.lane.b32.xlu0 %v7605_v51, %s7797_s28  ;;  %7608 = vrcp.f32 %v4110_v62 }
0x5829   : > { %v7609_v37 = vpop.eup %7608 }
0x582a   : > { %v4113_v46 = vmul.f32 %v7609_v37, %v8680_v48 }
0x588a   : > { %v4676_v63 = vpop.permute.xlu0 %4675 }
0x588b   : > { %v4678_v7 = vmul.f32 %v7601_v28, %v4676_v63  ;;  %v4300_v28 = vadd.f32 %v8744_v60, %v4299_v21 }
0x588d   : > { %v4679_v8 = vadd.f32 %v4678_v7, %v4577_v4  ;;  %4682 = vrot.lane.b32.xlu1 %v4678_v7, %s7798_s29 }
0x588e   : > { %v4117_v11 = vpop.permute.xlu0 %4116 }
0x588f   : > { %v4119_v9 = vmul.f32 %v7609_v37, %v4117_v11 }
0x5891   : > { %4121 = vrot.lane.b32.xlu0 %v4119_v9, %s7797_s28 }
0x58ff   : > { %v4683_v10 = vpop.permute.xlu1 %4682 }
0x5900   : > { %7144 = vmatmul.mubr.msk.f32.vlgmr.msra.gmra.mxu1 %vm571_vm2, %v4683_v10 }
0x5901   : > { %7158 = vmatpush3.msra.mxu1 %v8687_v29  ;;  %7165 = vmatprep.mubr.msk.f32.mxu1 %vm7796_vm1, %v7795_v2 }
0x5902   : > { %7159 = vmatprep.subr.mxu1 %v7795_v2 }
0x5903   : > { %v4122_v30 = vpop.permute.xlu0 %4121  ;;  %7160 = vmatpush3.msra.mxu1 %v8693_v39 }
0x5904   : > { %v4124_v35 = vadd.f32 %v4122_v30, %v4113_v46  ;;  %7161 = vmatprep.subr.mxu1 %v7795_v2  ;;  %v4305_v46 = vadd.f32 %v7086_v32, %v8744_v60 }
0x5905   : > { %7162 = vmatpush3.msra.mxu1 %v8700_v47 }
0x5906   : > { %7610 = vtanh.f32 %v4124_v35  ;;  %7163 = vmatprep.subr.mxu1 %v7795_v2 }
0x5907   : > { %7164 = vmatpush3.msra.mxu1 %v8707_v40 }
0x5908   : > { %7179 = vmatprep.subr.mxu1 %v7795_v2 }
0x5913   : > { %v7611_v52 = vpop.eup %7610 }
0x5914   : > { %4127 = vrot.lane.b32.xlu0 %v7611_v52, %s7797_s28 }
0x5986   : > { %v4128_v48 = vpop.permute.xlu0 %4127 }
0x5987   : > { %v4130_v34 = vmul.f32 %v7609_v37, %v4128_v48 }
0x5989   : > { %4132 = vrot.lane.b32.xlu0 %v4130_v34, %s7798_s29 }
0x59c0   : > { %v4752_v61 = vpop.f32.mrf.mxu1 }
0x59c1   : > { %v4756_v12 = vadd.f32 %v4752_v61, %v4295_v59 }
0x59c2   : > { %v7145_v13 = vpop.f32.mrf.mxu1 }
0x59c3   : > { %7612 = vtanh.f32 %v4756_v12  ;;  %v6323_v50 = vmul.f32 -1.442695, %v4756_v12 }
0x59c5   : > { %7614 = vpow2.f32 %v6323_v50 }
0x59d0   : > { %v7613_v43 = vpop.eup %7612 }
0x59d1   : > { %4766 = vrot.lane.b32.xlu1 %v7613_v43, %s7797_s28 }
0x59d2   : > { %v7615_v14 = vpop.eup %7614 }
0x59d3   : > { %v4760_v54 = vadd.f32 1.0, %v7615_v14 }
0x59d5   : > { %7616 = vrcp.f32 %v4760_v54 }
0x59e2   : > { %v7617_v49 = vpop.eup %7616 }
0x59e3   : > { %v4763_v16 = vmul.f32 %v7617_v49, %v4672_v42 }
0x59fb   : > { %v4133_v44 = vpop.permute.xlu0 %4132 }
0x59fc   : > { %4135 = vst.msk [vmem:[#allocation2 + $0x78] sm:$0xff] %vm571_vm2, %v4133_v44 }
0x5a03   : > { %v4151_v41 = vld [vmem:[#allocation2 + $0x78] sm:$0xff] }
0x5a04   : > { %7100 = vmatmul.mubr.msk.f32.gmra.mxu0 %vm571_vm2, %v4151_v41 }
0x5a05   : > { %7154 = vmatprep.mubr.msk.f32.mxu0 %vm7796_vm1, %v7795_v2 }
0x5a43   : > { %v4767_v45 = vpop.permute.xlu1 %4766 }
0x5a44   : > { %v4769_v15 = vmul.f32 %v7617_v49, %v4767_v45 }
0x5a46   : > { %4771 = vrot.lane.b32.xlu1 %v4769_v15, %s7797_s28 }
0x5ab8   : > { %v4772_v55 = vpop.permute.xlu1 %4771 }
0x5ab9   : > { %v4774_v17 = vadd.f32 %v4772_v55, %v4763_v16  ;;  %v4310_v16 = vadd.f32 %v8744_v60, %v8827_v3 }
0x5abb   : > { %7618 = vtanh.f32 %v4774_v17 }
0x5ac4   : > { %v8841_v27 = vpop.f32.mrf.mxu0 }
0x5ac6   : > { %v8843_v38 = vpop.f32.mrf.mxu0 }
0x5ac8   : > { %v7619_v18 = vpop.eup %7618 }
0x5ac9   : > { %4777 = vrot.lane.b32.xlu1 %v7619_v18, %s7797_s28 }
0x5b3b   : > { %v4778_v33 = vpop.permute.xlu1 %4777 }
0x5b3c   : > { %v4780_v0 = vmul.f32 %v7617_v49, %v4778_v33 }
0x5b3e   : > { %v4781_v19 = vadd.f32 %v4780_v0, %v4679_v8  ;;  %4784 = vrot.lane.b32.xlu1 %v4780_v0, %s7798_s29 }
0x5bb0   : > { %v4785_v20 = vpop.permute.xlu1 %4784 }
0x5bb1   : > { %7155 = vmatmul.mubr.msk.f32.vlgmr.msra.gmra.mxu0 %vm571_vm2, %v4785_v20 }
0x5bb2   : > { %7169 = vmatpush3.msra.mxu0 %v8687_v29  ;;  %7176 = vmatprep.mubr.msk.f32.mxu0 %vm7796_vm1, %v7795_v2 }
0x5bb3   : > { %7170 = vmatprep.subr.mxu0 %v7795_v2 }
0x5bb4   : > { %7171 = vmatpush3.msra.mxu0 %v8693_v39 }
0x5bb5   : > { %7172 = vmatprep.subr.mxu0 %v7795_v2 }
0x5bb6   : > { %7173 = vmatpush3.msra.mxu0 %v8700_v47 }
0x5bb7   : > { %7174 = vmatprep.subr.mxu0 %v7795_v2 }
0x5bb8   : > { %7175 = vmatpush3.msra.mxu0 %v8707_v40 }
0x5bb9   : > { %7190 = vmatprep.subr.mxu0 %v7795_v2 }
0x5c71   : > { %v4854_v53 = vpop.f32.mrf.mxu0 }
0x5c72   : > { %v4858_v1 = vadd.f32 %v4854_v53, %v4300_v28 }
0x5c73   : > { %v7156_v36 = vpop.f32.mrf.mxu0 }
0x5c74   : > { %7620 = vtanh.f32 %v4858_v1  ;;  %v6325_v42 = vmul.f32 -1.442695, %v4858_v1 }
0x5c76   : > { %7622 = vpow2.f32 %v6325_v42 }
0x5c81   : > { %v7621_v31 = vpop.eup %7620 }
0x5c82   : > { %4868 = vrot.lane.b32.xlu0 %v7621_v31, %s7797_s28 }
0x5c83   : > { %v7623_v56 = vpop.eup %7622 }
0x5c84   : > { %v4862_v51 = vadd.f32 1.0, %v7623_v56 }
0x5c86   : > { %7624 = vrcp.f32 %v4862_v51 }
0x5c93   : > { %v7625_v57 = vpop.eup %7624 }
0x5c94   : > { %v4865_v63 = vmul.f32 %v7625_v57, %v4774_v17 }
0x5cf4   : > { %v4869_v58 = vpop.permute.xlu0 %4868 }
0x5cf5   : > { %v4871_v62 = vmul.f32 %v7625_v57, %v4869_v58 }
0x5cf7   : > { %4873 = vrot.lane.b32.xlu1 %v4871_v62, %s7797_s28 }
0x5d69   : > { %v4874_v4 = vpop.permute.xlu1 %4873 }
0x5d6a   : > { %v4876_v7 = vadd.f32 %v4874_v4, %v4865_v63 }
0x5d6c   : > { %7626 = vtanh.f32 %v4876_v7 }
0x5d79   : > { %v7627_v8 = vpop.eup %7626 }
0x5d7a   : > { %4879 = vrot.lane.b32.xlu0 %v7627_v8, %s7797_s28 }
0x5dec   : > { %v4880_v37 = vpop.permute.xlu0 %4879 }
0x5ded   : > { %v4882_v11 = vmul.f32 %v7625_v57, %v4880_v37  ;;  %v4315_v57 = vadd.f32 %v8825_v22, %v8744_v60 }
0x5def   : > { %v4883_v9 = vadd.f32 %v4882_v11, %v4781_v19  ;;  %4886 = vrot.lane.b32.xlu1 %v4882_v11, %s7798_s29 }
0x5e61   : > { %v4887_v10 = vpop.permute.xlu1 %4886 }
0x5e62   : > { %7166 = vmatmul.mubr.msk.f32.vlgmr.msra.gmra.mxu1 %vm571_vm2, %v4887_v10 }
0x5e63   : > { %7180 = vmatpush3.msra.mxu1 %v8687_v29  ;;  %7187 = vmatprep.mubr.msk.f32.mxu1 %vm7796_vm1, %v7795_v2 }
0x5e64   : > { %7181 = vmatprep.subr.mxu1 %v7795_v2 }
0x5e65   : > { %7182 = vmatpush3.msra.mxu1 %v8693_v39 }
0x5e66   : > { %7183 = vmatprep.subr.mxu1 %v7795_v2 }
0x5e67   : > { %7184 = vmatpush3.msra.mxu1 %v8700_v47 }
0x5e68   : > { %7185 = vmatprep.subr.mxu1 %v7795_v2 }
0x5e69   : > { %7186 = vmatpush3.msra.mxu1 %v8707_v40 }
0x5e6a   : > { %7201 = vmatprep.subr.mxu1 %v7795_v2 }
0x5f22   : > { %v4956_v30 = vpop.f32.mrf.mxu1 }
0x5f23   : > { %v4960_v35 = vadd.f32 %v4956_v30, %v4305_v46 }
0x5f24   : > { %v7167_v52 = vpop.f32.mrf.mxu1 }
0x5f25   : > { %7628 = vtanh.f32 %v4960_v35  ;;  %v6327_v34 = vmul.f32 -1.442695, %v4960_v35 }
0x5f27   : > { %7630 = vpow2.f32 %v6327_v34 }
0x5f32   : > { %v7629_v48 = vpop.eup %7628 }
0x5f33   : > { %4970 = vrot.lane.b32.xlu0 %v7629_v48, %s7797_s28 }
0x5f34   : > { %v7631_v59 = vpop.eup %7630 }
0x5f35   : > { %v4964_v61 = vadd.f32 1.0, %v7631_v59 }
0x5f37   : > { %7632 = vrcp.f32 %v4964_v61  ;;  %v4320_v61 = vadd.f32 %v8744_v60, %v8831_v5 }
0x5f44   : > { %v7633_v12 = vpop.eup %7632 }
0x5f45   : > { %v4967_v44 = vmul.f32 %v7633_v12, %v4876_v7 }
0x5fa5   : > { %v4971_v13 = vpop.permute.xlu0 %4970 }
0x5fa6   : > { %v4973_v43 = vmul.f32 %v7633_v12, %v4971_v13 }
0x5fa8   : > { %4975 = vrot.lane.b32.xlu1 %v4973_v43, %s7797_s28 }
0x601a   : > { %v4976_v41 = vpop.permute.xlu1 %4975 }
0x601b   : > { %v4978_v50 = vadd.f32 %v4976_v41, %v4967_v44 }
0x601d   : > { %7634 = vtanh.f32 %v4978_v50 }
0x602a   : > { %v7635_v14 = vpop.eup %7634 }
0x602b   : > { %4981 = vrot.lane.b32.xlu0 %v7635_v14, %s7797_s28 }
0x609d   : > { %v4982_v54 = vpop.permute.xlu0 %4981 }
0x609e   : > { %v4984_v49 = vmul.f32 %v7633_v12, %v4982_v54 }
0x60a0   : > { %v4985_v45 = vadd.f32 %v4984_v49, %v4883_v9  ;;  %4988 = vrot.lane.b32.xlu1 %v4984_v49, %s7798_s29 }
0x6112   : > { %v4989_v15 = vpop.permute.xlu1 %4988 }
0x6113   : > { %7177 = vmatmul.mubr.msk.f32.vlgmr.msra.gmra.mxu0 %vm571_vm2, %v4989_v15 }
0x6114   : > { %7191 = vmatpush3.msra.mxu0 %v8687_v29  ;;  %7198 = vmatprep.mubr.msk.f32.mxu0 %vm7796_vm1, %v7795_v2 }
0x6115   : > { %7192 = vmatprep.subr.mxu0 %v7795_v2 }
0x6116   : > { %7193 = vmatpush3.msra.mxu0 %v8693_v39 }
0x6117   : > { %7194 = vmatprep.subr.mxu0 %v7795_v2 }
0x6118   : > { %7195 = vmatpush3.msra.mxu0 %v8700_v47 }
0x6119   : > { %7196 = vmatprep.subr.mxu0 %v7795_v2 }
0x611a   : > { %7197 = vmatpush3.msra.mxu0 %v8707_v40 }
0x611b   : > { %7212 = vmatprep.subr.mxu0 %v7795_v2 }
0x61d3   : > { %v5058_v55 = vpop.f32.mrf.mxu0 }
0x61d4   : > { %v5062_v17 = vadd.f32 %v5058_v55, %v4310_v16 }
0x61d5   : > { %v7178_v18 = vpop.f32.mrf.mxu0 }
0x61d6   : > { %7636 = vtanh.f32 %v5062_v17  ;;  %v6329_v0 = vmul.f32 -1.442695, %v5062_v17 }
0x61d8   : > { %7638 = vpow2.f32 %v6329_v0 }
0x61e3   : > { %v7637_v33 = vpop.eup %7636 }
0x61e4   : > { %5072 = vrot.lane.b32.xlu0 %v7637_v33, %s7797_s28 }
0x61e5   : > { %v7639_v19 = vpop.eup %7638 }
0x61e6   : > { %v5066_v20 = vadd.f32 1.0, %v7639_v19  ;;  %v4325_v19 = vadd.f32 %v8829_v23, %v8744_v60 }
0x61e8   : > { %7640 = vrcp.f32 %v5066_v20 }
0x61f5   : > { %v7641_v32 = vpop.eup %7640 }
0x61f6   : > { %v5069_v53 = vmul.f32 %v7641_v32, %v4978_v50 }
0x6256   : > { %v5073_v21 = vpop.permute.xlu0 %5072 }
0x6257   : > { %v5075_v28 = vmul.f32 %v7641_v32, %v5073_v21 }
0x6259   : > { %5077 = vrot.lane.b32.xlu1 %v5075_v28, %s7797_s28 }
0x62cb   : > { %v5078_v1 = vpop.permute.xlu1 %5077 }
0x62cc   : > { %v5080_v3 = vadd.f32 %v5078_v1, %v5069_v53 }
0x62ce   : > { %7642 = vtanh.f32 %v5080_v3 }
0x62db   : > { %v7643_v36 = vpop.eup %7642 }
0x62dc   : > { %5083 = vrot.lane.b32.xlu0 %v7643_v36, %s7797_s28 }
0x634e   : > { %v5084_v31 = vpop.permute.xlu0 %5083 }
0x634f   : > { %v5086_v42 = vmul.f32 %v7641_v32, %v5084_v31 }
0x6351   : > { %v5087_v56 = vadd.f32 %v5086_v42, %v4985_v45  ;;  %5090 = vrot.lane.b32.xlu1 %v5086_v42, %s7798_s29 }
0x63c3   : > { %v5091_v51 = vpop.permute.xlu1 %5090 }
0x63c4   : > { %7188 = vmatmul.mubr.msk.f32.vlgmr.msra.gmra.mxu1 %vm571_vm2, %v5091_v51 }
0x63c5   : > { %7202 = vmatpush3.msra.mxu1 %v8687_v29  ;;  %7209 = vmatprep.mubr.msk.f32.mxu1 %vm7796_vm1, %v7795_v2 }
0x63c6   : > { %7203 = vmatprep.subr.mxu1 %v7795_v2 }
0x63c7   : > { %7204 = vmatpush3.msra.mxu1 %v8693_v39 }
0x63c8   : > { %7205 = vmatprep.subr.mxu1 %v7795_v2 }
0x63c9   : > { %7206 = vmatpush3.msra.mxu1 %v8700_v47 }
0x63ca   : > { %7207 = vmatprep.subr.mxu1 %v7795_v2 }
0x63cb   : > { %7208 = vmatpush3.msra.mxu1 %v8707_v40 }
0x63cc   : > { %7223 = vmatprep.subr.mxu1 %v7795_v2 }
0x6484   : > { %v5160_v58 = vpop.f32.mrf.mxu1 }
0x6485   : > { %v5164_v62 = vadd.f32 %v5160_v58, %v4315_v57 }
0x6486   : > { %v7189_v63 = vpop.f32.mrf.mxu1 }
0x6487   : > { %7644 = vtanh.f32 %v5164_v62  ;;  %v6331_v7 = vmul.f32 -1.442695, %v5164_v62 }
0x6489   : > { %7646 = vpow2.f32 %v6331_v7  ;;  %v4330_v7 = vadd.f32 %v8744_v60, %v8835_v25 }
0x6494   : > { %v7645_v4 = vpop.eup %7644 }
0x6495   : > { %5174 = vrot.lane.b32.xlu0 %v7645_v4, %s7797_s28 }
0x6496   : > { %v7647_v8 = vpop.eup %7646 }
0x6497   : > { %v5168_v37 = vadd.f32 1.0, %v7647_v8 }
0x6499   : > { %7648 = vrcp.f32 %v5168_v37 }
0x64a6   : > { %v7649_v11 = vpop.eup %7648 }
0x64a7   : > { %v5171_v46 = vmul.f32 %v7649_v11, %v5080_v3 }
0x6507   : > { %v5175_v9 = vpop.permute.xlu0 %5174 }
0x6508   : > { %v5177_v10 = vmul.f32 %v7649_v11, %v5175_v9 }
0x650a   : > { %5179 = vrot.lane.b32.xlu1 %v5177_v10, %s7797_s28 }
0x657c   : > { %v5180_v30 = vpop.permute.xlu1 %5179 }
0x657d   : > { %v5182_v22 = vadd.f32 %v5180_v30, %v5171_v46 }
0x657f   : > { %7650 = vtanh.f32 %v5182_v22 }
0x658c   : > { %v7651_v35 = vpop.eup %7650 }
0x658d   : > { %5185 = vrot.lane.b32.xlu0 %v7651_v35, %s7797_s28 }
0x65ff   : > { %v5186_v52 = vpop.permute.xlu0 %5185 }
0x6600   : > { %v5188_v48 = vmul.f32 %v7649_v11, %v5186_v52 }
0x6602   : > { %v5189_v34 = vadd.f32 %v5188_v48, %v5087_v56  ;;  %5192 = vrot.lane.b32.xlu1 %v5188_v48, %s7798_s29 }
0x6674   : > { %v5193_v59 = vpop.permute.xlu1 %5192 }
0x6675   : > { %7199 = vmatmul.mubr.msk.f32.vlgmr.msra.gmra.mxu0 %vm571_vm2, %v5193_v59 }
0x6676   : > { %7213 = vmatpush3.msra.mxu0 %v8687_v29  ;;  %7220 = vmatprep.mubr.msk.f32.mxu0 %vm7796_vm1, %v7795_v2 }
0x6677   : > { %7214 = vmatprep.subr.mxu0 %v7795_v2 }
0x6678   : > { %7215 = vmatpush3.msra.mxu0 %v8693_v39 }
0x6679   : > { %7216 = vmatprep.subr.mxu0 %v7795_v2 }
0x667a   : > { %7217 = vmatpush3.msra.mxu0 %v8700_v47 }
0x667b   : > { %7218 = vmatprep.subr.mxu0 %v7795_v2 }
0x667c   : > { %7219 = vmatpush3.msra.mxu0 %v8707_v40 }
0x667d   : > { %7234 = vmatprep.subr.mxu0 %v7795_v2 }
0x6735   : > { %v5262_v12 = vpop.f32.mrf.mxu0 }
0x6736   : > { %v5266_v13 = vadd.f32 %v5262_v12, %v4320_v61 }
0x6737   : > { %v7200_v43 = vpop.f32.mrf.mxu0 }
0x6738   : > { %7652 = vtanh.f32 %v5266_v13  ;;  %v6333_v41 = vmul.f32 -1.442695, %v5266_v13 }
0x673a   : > { %7654 = vpow2.f32 %v6333_v41 }
0x6745   : > { %v7653_v44 = vpop.eup %7652 }
0x6746   : > { %5276 = vrot.lane.b32.xlu0 %v7653_v44, %s7797_s28 }
0x6747   : > { %v7655_v50 = vpop.eup %7654 }
0x6748   : > { %v5270_v14 = vadd.f32 1.0, %v7655_v50 }
0x674a   : > { %7656 = vrcp.f32 %v5270_v14 }
0x6757   : > { %v7657_v54 = vpop.eup %7656 }
0x6758   : > { %v5273_v15 = vmul.f32 %v7657_v54, %v5182_v22 }
0x67b8   : > { %v5277_v49 = vpop.permute.xlu0 %5276 }
0x67b9   : > { %v5279_v45 = vmul.f32 %v7657_v54, %v5277_v49 }
0x67bb   : > { %5281 = vrot.lane.b32.xlu1 %v5279_v45, %s7797_s28 }
0x682d   : > { %v5282_v16 = vpop.permute.xlu1 %5281 }
0x682e   : > { %v5284_v5 = vadd.f32 %v5282_v16, %v5273_v15 }
0x6830   : > { %7658 = vtanh.f32 %v5284_v5 }
0x683d   : > { %v7659_v55 = vpop.eup %7658 }
0x683e   : > { %5287 = vrot.lane.b32.xlu0 %v7659_v55, %s7797_s28 }
0x68b0   : > { %v5288_v17 = vpop.permute.xlu0 %5287 }
0x68b1   : > { %v5290_v18 = vmul.f32 %v7657_v54, %v5288_v17 }
0x68b3   : > { %v5291_v33 = vadd.f32 %v5290_v18, %v5189_v34  ;;  %5294 = vrot.lane.b32.xlu1 %v5290_v18, %s7798_s29 }
0x6925   : > { %v5295_v0 = vpop.permute.xlu1 %5294 }
0x6926   : > { %7210 = vmatmul.mubr.msk.f32.vlgmr.msra.gmra.mxu1 %vm571_vm2, %v5295_v0  ;;  %v7728_v0 = vld [vmem:[%s9082_s5 + $0x38] sm:$0xff] }
0x6927   : > { %7224 = vmatpush3.msra.mxu1 %v8687_v29  ;;  %7231 = vmatprep.mubr.msk.f32.mxu1 %vm7796_vm1, %v7795_v2 }
0x6928   : > { %7225 = vmatprep.subr.mxu1 %v7795_v2 }
0x6929   : > { %7226 = vmatpush3.msra.mxu1 %v8693_v39 }
0x692a   : > { %7227 = vmatprep.subr.mxu1 %v7795_v2 }
0x692b   : > { %7228 = vmatpush3.msra.mxu1 %v8700_v47 }
0x692c   : > { %7229 = vmatprep.subr.mxu1 %v7795_v2 }
0x692d   : > { %7230 = vmatpush3.msra.mxu1 %v8707_v40 }
0x692e   : > { %7245 = vmatprep.subr.mxu1 %v7795_v2 }
0x69e6   : > { %v5364_v20 = vpop.f32.mrf.mxu1 }
0x69e7   : > { %v5368_v32 = vadd.f32 %v5364_v20, %v4325_v19  ;;  %v7729_v19 = vld [vmem:[%s9082_s5 + $0x30] sm:$0xff]  ;;  %v7730_v20 = vld [vmem:[%s9082_s5 + $0x28] sm:$0xff] }
0x69e8   : > { %v7211_v21 = vpop.f32.mrf.mxu1 }
0x69e9   : > { %7660 = vtanh.f32 %v5368_v32  ;;  %v6335_v53 = vmul.f32 -1.442695, %v5368_v32  ;;  %v7731_v32 = vld [vmem:[%s9082_s5 + $0x20] sm:$0xff]  ;;  %v4340_v21 = vadd.f32 %v8744_v60, %v8839_v26 }
0x69eb   : > { %7662 = vpow2.f32 %v6335_v53 }
0x69f6   : > { %v7661_v28 = vpop.eup %7660 }
0x69f7   : > { %5378 = vrot.lane.b32.xlu0 %v7661_v28, %s7797_s28 }
0x69f8   : > { %v7663_v1 = vpop.eup %7662 }
0x69f9   : > { %v5372_v3 = vadd.f32 1.0, %v7663_v1 }
0x69fb   : > { %7664 = vrcp.f32 %v5372_v3 }
0x6a08   : > { %v7665_v36 = vpop.eup %7664 }
0x6a09   : > { %v5375_v56 = vmul.f32 %v7665_v36, %v5284_v5 }
0x6a69   : > { %v5379_v31 = vpop.permute.xlu0 %5378 }
0x6a6a   : > { %v5381_v42 = vmul.f32 %v7665_v36, %v5379_v31 }
0x6a6c   : > { %5383 = vrot.lane.b32.xlu1 %v5381_v42, %s7797_s28 }
0x6ade   : > { %v5384_v51 = vpop.permute.xlu1 %5383 }
0x6adf   : > { %v5386_v23 = vadd.f32 %v5384_v51, %v5375_v56 }
0x6ae1   : > { %7666 = vtanh.f32 %v5386_v23 }
0x6aee   : > { %v7667_v57 = vpop.eup %7666 }
0x6aef   : > { %5389 = vrot.lane.b32.xlu0 %v7667_v57, %s7797_s28 }
0x6b61   : > { %v5390_v58 = vpop.permute.xlu0 %5389 }
0x6b62   : > { %v5392_v62 = vmul.f32 %v7665_v36, %v5390_v58 }
0x6b64   : > { %v5393_v63 = vadd.f32 %v5392_v62, %v5291_v33  ;;  %5396 = vrot.lane.b32.xlu1 %v5392_v62, %s7798_s29 }
0x6bd6   : > { %v5397_v4 = vpop.permute.xlu1 %5396 }
0x6bd7   : > { %7221 = vmatmul.mubr.msk.f32.vlgmr.msra.gmra.mxu0 %vm571_vm2, %v5397_v4 }
0x6bd8   : > { %7235 = vmatpush3.msra.mxu0 %v8687_v29  ;;  %7242 = vmatprep.mubr.msk.f32.mxu0 %vm7796_vm1, %v7795_v2 }
0x6bd9   : > { %7236 = vmatprep.subr.mxu0 %v7795_v2 }
0x6bda   : > { %7237 = vmatpush3.msra.mxu0 %v8693_v39 }
0x6bdb   : > { %7238 = vmatprep.subr.mxu0 %v7795_v2 }
0x6bdc   : > { %7239 = vmatpush3.msra.mxu0 %v8700_v47 }
0x6bdd   : > { %7240 = vmatprep.subr.mxu0 %v7795_v2 }
0x6bde   : > { %7241 = vmatpush3.msra.mxu0 %v8707_v40 }
0x6bdf   : > { %7256 = vmatprep.subr.mxu0 %v7795_v2 }
0x6c97   : > { %v5466_v8 = vpop.f32.mrf.mxu0 }
0x6c98   : > { %v5470_v37 = vadd.f32 %v5466_v8, %v4330_v7  ;;  %v7732_v8 = vld [vmem:[%s9083_s6 + $0x1] ss:$0 sm:$0xff] }
0x6c99   : > { %v7222_v11 = vpop.f32.mrf.mxu0 }
0x6c9a   : > { %7668 = vtanh.f32 %v5470_v37  ;;  %v6337_v10 = vmul.f32 -1.442695, %v5470_v37  ;;  %v4345_v37 = vadd.f32 %v7732_v8, %v8837_v6 }
0x6c9c   : > { %7670 = vpow2.f32 %v6337_v10 }
0x6ca7   : > { %v7669_v9 = vpop.eup %7668 }
0x6ca8   : > { %5480 = vrot.lane.b32.xlu0 %v7669_v9, %s7797_s28 }
0x6ca9   : > { %v7671_v46 = vpop.eup %7670 }
0x6caa   : > { %v5474_v30 = vadd.f32 1.0, %v7671_v46 }
0x6cac   : > { %7672 = vrcp.f32 %v5474_v30 }
0x6cb9   : > { %v7673_v22 = vpop.eup %7672 }
0x6cba   : > { %v5477_v48 = vmul.f32 %v7673_v22, %v5386_v23 }
0x6d1a   : > { %v5481_v35 = vpop.permute.xlu0 %5480 }
0x6d1b   : > { %v5483_v52 = vmul.f32 %v7673_v22, %v5481_v35 }
0x6d1d   : > { %5485 = vrot.lane.b32.xlu1 %v5483_v52, %s7797_s28 }
0x6d8f   : > { %v5486_v34 = vpop.permute.xlu1 %5485 }
0x6d90   : > { %v5488_v25 = vadd.f32 %v5486_v34, %v5477_v48 }
0x6d92   : > { %7674 = vtanh.f32 %v5488_v25 }
0x6d9f   : > { %v7675_v59 = vpop.eup %7674 }
0x6da0   : > { %5491 = vrot.lane.b32.xlu0 %v7675_v59, %s7797_s28 }
0x6e12   : > { %v5492_v61 = vpop.permute.xlu0 %5491 }
0x6e13   : > { %v5494_v12 = vmul.f32 %v7673_v22, %v5492_v61 }
0x6e15   : > { %v5495_v13 = vadd.f32 %v5494_v12, %v5393_v63  ;;  %5498 = vrot.lane.b32.xlu1 %v5494_v12, %s7798_s29 }
0x6e87   : > { %v5499_v43 = vpop.permute.xlu1 %5498 }
0x6e88   : > { %7232 = vmatmul.mubr.msk.f32.vlgmr.msra.gmra.mxu1 %vm571_vm2, %v5499_v43 }
0x6e89   : > { %7246 = vmatpush3.msra.mxu1 %v8687_v29  ;;  %7253 = vmatprep.mubr.msk.f32.mxu1 %vm7796_vm1, %v7795_v2  ;;  %v4335_v29 = vadd.f32 %v8833_v24, %v8744_v60 }
0x6e8a   : > { %7247 = vmatprep.subr.mxu1 %v7795_v2 }
0x6e8b   : > { %7248 = vmatpush3.msra.mxu1 %v8693_v39 }
0x6e8c   : > { %7249 = vmatprep.subr.mxu1 %v7795_v2 }
0x6e8d   : > { %7250 = vmatpush3.msra.mxu1 %v8700_v47 }
0x6e8e   : > { %7251 = vmatprep.subr.mxu1 %v7795_v2 }
0x6e8f   : > { %7252 = vmatpush3.msra.mxu1 %v8707_v40 }
0x6e90   : > { %7267 = vmatprep.subr.mxu1 %v7795_v2 }
0x6f48   : > { %v5568_v44 = vpop.f32.mrf.mxu1 }
0x6f49   : > { %v5572_v41 = vadd.f32 %v5568_v44, %v4335_v29  ;;  %v4350_v44 = vadd.f32 %v7732_v8, %v8843_v38 }
0x6f4a   : > { %v7233_v50 = vpop.f32.mrf.mxu1 }
0x6f4b   : > { %7676 = vtanh.f32 %v5572_v41  ;;  %v6339_v39 = vmul.f32 -1.442695, %v5572_v41 }
0x6f4d   : > { %7678 = vpow2.f32 %v6339_v39 }
0x6f58   : > { %v7677_v14 = vpop.eup %7676 }
0x6f59   : > { %5582 = vrot.lane.b32.xlu0 %v7677_v14, %s7797_s28 }
0x6f5a   : > { %v7679_v54 = vpop.eup %7678 }
0x6f5b   : > { %v5576_v47 = vadd.f32 1.0, %v7679_v54 }
0x6f5d   : > { %7680 = vrcp.f32 %v5576_v47 }
0x6f6a   : > { %v7681_v49 = vpop.eup %7680 }
0x6f6b   : > { %v5579_v15 = vmul.f32 %v7681_v49, %v5488_v25 }
0x6fcb   : > { %v5583_v45 = vpop.permute.xlu0 %5582 }
0x6fcc   : > { %v5585_v40 = vmul.f32 %v7681_v49, %v5583_v45 }
0x6fce   : > { %5587 = vrot.lane.b32.xlu1 %v5585_v40, %s7797_s28 }
0x7040   : > { %v5588_v16 = vpop.permute.xlu1 %5587 }
0x7041   : > { %v5590_v24 = vadd.f32 %v5588_v16, %v5579_v15 }
0x7043   : > { %7682 = vtanh.f32 %v5590_v24 }
0x7050   : > { %v7683_v5 = vpop.eup %7682 }
0x7051   : > { %5593 = vrot.lane.b32.xlu0 %v7683_v5, %s7797_s28 }
0x70c3   : > { %v5594_v55 = vpop.permute.xlu0 %5593 }
0x70c4   : > { %v5596_v17 = vmul.f32 %v7681_v49, %v5594_v55 }
0x70c6   : > { %v5597_v18 = vadd.f32 %v5596_v17, %v5495_v13  ;;  %5600 = vrot.lane.b32.xlu1 %v5596_v17, %s7798_s29 }
0x7138   : > { %v5601_v33 = vpop.permute.xlu1 %5600 }
0x7139   : > { %7243 = vmatmul.mubr.msk.f32.vlgmr.msra.gmra.mxu0 %vm571_vm2, %v5601_v33 }
0x713a   : > { %7257 = vmatpush3.msra.mxu0 %v7728_v0  ;;  %7264 = vmatprep.mubr.msk.f32.mxu0 %vm7796_vm1, %v7795_v2 }
0x713b   : > { %7258 = vmatprep.subr.mxu0 %v7795_v2 }
0x713c   : > { %7259 = vmatpush3.msra.mxu0 %v7729_v19 }
0x713d   : > { %7260 = vmatprep.subr.mxu0 %v7795_v2 }
0x713e   : > { %7261 = vmatpush3.msra.mxu0 %v7730_v20 }
0x713f   : > { %7262 = vmatprep.subr.mxu0 %v7795_v2 }
0x7140   : > { %7263 = vmatpush3.msra.mxu0 %v7731_v32 }
0x7141   : > { %7278 = vmatprep.subr.mxu0 %v7795_v2 }
0x71f9   : > { %v5670_v28 = vpop.f32.mrf.mxu0 }
0x71fa   : > { %v5674_v53 = vadd.f32 %v5670_v28, %v4340_v21 }
0x71fb   : > { %v7244_v1 = vpop.f32.mrf.mxu0 }
0x71fc   : > { %7684 = vtanh.f32 %v5674_v53  ;;  %v6341_v36 = vmul.f32 -1.442695, %v5674_v53 }
0x71fe   : > { %7686 = vpow2.f32 %v6341_v36 }
0x7209   : > { %v7685_v3 = vpop.eup %7684 }
0x720a   : > { %5684 = vrot.lane.b32.xlu0 %v7685_v3, %s7797_s28 }
0x720b   : > { %v7687_v31 = vpop.eup %7686 }
0x720c   : > { %v5678_v42 = vadd.f32 1.0, %v7687_v31 }
0x720e   : > { %7688 = vrcp.f32 %v5678_v42 }
0x721b   : > { %v7689_v56 = vpop.eup %7688 }
0x721c   : > { %v5681_v57 = vmul.f32 %v7689_v56, %v5590_v24 }
0x727c   : > { %v5685_v51 = vpop.permute.xlu0 %5684 }
0x727d   : > { %v5687_v23 = vmul.f32 %v7689_v56, %v5685_v51  ;;  %v6010_v51 = vld [vmem:[%s9084_s7 + $0x18] sm:$0xff] }
0x727f   : > { %5689 = vrot.lane.b32.xlu1 %v5687_v23, %s7797_s28  ;;  %v6009_v23 = vld [vmem:[%s9084_s7 + $0x10] sm:$0xff] }
0x72f1   : > { %v5690_v58 = vpop.permute.xlu1 %5689 }
0x72f2   : > { %v5692_v60 = vadd.f32 %v5690_v58, %v5681_v57  ;;  %v6008_v57 = vld [vmem:[%s9084_s7 + $0x8] sm:$0xff]  ;;  %v6007_v58 = vld [vmem:[%s9084_s7] sm:$0xff] }
0x72f4   : > { %7690 = vtanh.f32 %v5692_v60 }
0x7301   : > { %v7691_v26 = vpop.eup %7690 }
0x7302   : > { %5695 = vrot.lane.b32.xlu0 %v7691_v26, %s7797_s28 }
0x7374   : > { %v5696_v62 = vpop.permute.xlu0 %5695 }
0x7375   : > { %v5698_v63 = vmul.f32 %v7689_v56, %v5696_v62 }
0x7377   : > { %v5699_v4 = vadd.f32 %v5698_v63, %v5597_v18  ;;  %5702 = vrot.lane.b32.xlu1 %v5698_v63, %s7798_s29 }
0x73e9   : > { %v5703_v7 = vpop.permute.xlu1 %5702 }
0x73ea   : > { %7254 = vmatmul.mubr.msk.f32.vlgmr.msra.gmra.mxu1 %vm571_vm2, %v5703_v7 }
0x73eb   : > { %7268 = vmatpush3.msra.mxu1 %v7728_v0  ;;  %7275 = vmatprep.mubr.msk.f32.mxu1 %vm7796_vm1, %v7795_v2  ;;  %v4355_v0 = vadd.f32 %v7732_v8, %v8841_v27  ;;  %v6093_v8 = vlaneseq }
0x73ec   : > { %7269 = vmatprep.subr.mxu1 %v7795_v2 }
0x73ed   : > { %7270 = vmatpush3.msra.mxu1 %v7729_v19 }
0x73ee   : > { %7271 = vmatprep.subr.mxu1 %v7795_v2 }
0x73ef   : > { %7272 = vmatpush3.msra.mxu1 %v7730_v20 }
0x73f0   : > { %7273 = vmatprep.subr.mxu1 %v7795_v2 }
0x73f1   : > { %7274 = vmatpush3.msra.mxu1 %v7731_v32 }
0x74aa   : > { %v5772_v11 = vpop.f32.mrf.mxu1 }
0x74ab   : > { %v5776_v9 = vadd.f32 %v5772_v11, %v4345_v37  ;;  %v6094_v37 = vshrl.u32 %v6093_v8, 7  ;;  %v6348_v11 = vld [vmem:[%s9085_s8] ss:$0 sm:$0xff] }
0x74ac   : > { %v7255_v10 = vpop.f32.mrf.mxu1 }
0x74ad   : > { %7692 = vtanh.f32 %v5776_v9  ;;  %v6343_v30 = vmul.f32 -1.442695, %v5776_v9  ;;  %vm6095_vm3 = vcmp.lt.s32.totalorder %v6094_v37, 2 }
0x74af   : > { %7694 = vpow2.f32 %v6343_v30 }
0x74ba   : > { %v7693_v46 = vpop.eup %7692 }
0x74bb   : > { %5786 = vrot.lane.b32.xlu0 %v7693_v46, %s7797_s28 }
0x74bc   : > { %v7695_v22 = vpop.eup %7694 }
0x74bd   : > { %v5780_v35 = vadd.f32 1.0, %v7695_v22 }
0x74bf   : > { %7696 = vrcp.f32 %v5780_v35 }
0x74cc   : > { %v7697_v52 = vpop.eup %7696 }
0x74cd   : > { %v5783_v25 = vmul.f32 %v7697_v52, %v5692_v60 }
0x752d   : > { %v5787_v48 = vpop.permute.xlu0 %5786 }
0x752e   : > { %v5789_v34 = vmul.f32 %v7697_v52, %v5787_v48 }
0x7530   : > { %5791 = vrot.lane.b32.xlu1 %v5789_v34, %s7797_s28 }
0x75a2   : > { %v5792_v59 = vpop.permute.xlu1 %5791 }
0x75a3   : > { %v5794_v6 = vadd.f32 %v5792_v59, %v5783_v25 }
0x75a5   : > { %7698 = vtanh.f32 %v5794_v6 }
0x75b2   : > { %v7699_v61 = vpop.eup %7698 }
0x75b3   : > { %5797 = vrot.lane.b32.xlu0 %v7699_v61, %s7797_s28 }
0x7625   : > { %v5798_v12 = vpop.permute.xlu0 %5797 }
0x7626   : > { %v5800_v13 = vmul.f32 %v7697_v52, %v5798_v12 }
0x7628   : > { %v5801_v43 = vadd.f32 %v5800_v13, %v5699_v4  ;;  %5804 = vrot.lane.b32.xlu1 %v5800_v13, %s7798_s29 }
0x769a   : > { %v5805_v29 = vpop.permute.xlu1 %5804 }
0x769b   : > { %7265 = vmatmul.mubr.msk.f32.vlgmr.msra.gmra.mxu0 %vm571_vm2, %v5805_v29 }
0x769c   : > { %7286 = vmatprep.mubr.msk.f32.mxu0 %vm7796_vm1, %v7795_v2  ;;  %7279 = vmatpush3.msra.mxu0 %v6010_v51 }
0x769d   : > { %7280 = vmatprep.subr.mxu0 %v7795_v2 }
0x769e   : > { %7281 = vmatpush3.msra.mxu0 %v6009_v23 }
0x769f   : > { %7282 = vmatprep.subr.mxu0 %v7795_v2 }
0x76a0   : > { %7283 = vmatpush3.msra.mxu0 %v6008_v57 }
0x76a1   : > { %7284 = vmatprep.subr.mxu0 %v7795_v2 }
0x76a2   : > { %7285 = vmatpush3.msra.mxu0 %v6007_v58 }
0x775b   : > { %v5874_v41 = vpop.f32.mrf.mxu0 }
0x775c   : > { %v5878_v50 = vadd.f32 %v5874_v41, %v4350_v44 }
0x775d   : > { %v7266_v14 = vpop.f32.mrf.mxu0 }
0x775e   : > { %7700 = vtanh.f32 %v5878_v50  ;;  %v6345_v54 = vmul.f32 -1.442695, %v5878_v50 }
0x7760   : > { %7702 = vpow2.f32 %v6345_v54 }
0x776b   : > { %v7701_v39 = vpop.eup %7700 }
0x776c   : > { %5888 = vrot.lane.b32.xlu0 %v7701_v39, %s7797_s28 }
0x776d   : > { %v7703_v47 = vpop.eup %7702 }
0x776e   : > { %v5882_v49 = vadd.f32 1.0, %v7703_v47 }
0x7770   : > { %7704 = vrcp.f32 %v5882_v49 }
0x777d   : > { %v7705_v45 = vpop.eup %7704 }
0x777e   : > { %v5885_v16 = vmul.f32 %v7705_v45, %v5794_v6 }
0x77de   : > { %v5889_v40 = vpop.permute.xlu0 %5888 }
0x77df   : > { %v5891_v15 = vmul.f32 %v7705_v45, %v5889_v40 }
0x77e1   : > { %5893 = vrot.lane.b32.xlu1 %v5891_v15, %s7797_s28 }
0x7853   : > { %v5894_v24 = vpop.permute.xlu1 %5893 }
0x7854   : > { %v5896_v38 = vadd.f32 %v5894_v24, %v5885_v16 }
0x7856   : > { %7706 = vtanh.f32 %v5896_v38 }
0x7863   : > { %v7707_v5 = vpop.eup %7706 }
0x7864   : > { %5899 = vrot.lane.b32.xlu0 %v7707_v5, %s7797_s28 }
0x78d6   : > { %v5900_v55 = vpop.permute.xlu0 %5899 }
0x78d7   : > { %v5902_v17 = vmul.f32 %v7705_v45, %v5900_v55 }
0x78d9   : > { %v5903_v18 = vadd.f32 %v5902_v17, %v5801_v43  ;;  %5906 = vrot.lane.b32.xlu1 %v5902_v17, %s7798_s29 }
0x794b   : > { %v5907_v33 = vpop.permute.xlu1 %5906 }
0x794c   : > { %7276 = vmatmul.mubr.msk.f32.vlgmr.msra.gmra.mxu1 %vm571_vm2, %v5907_v33 }
0x7a0c   : > { %v5976_v19 = vpop.f32.mrf.mxu1 }
0x7a0d   : > { %v5980_v20 = vadd.f32 %v5976_v19, %v4355_v0 }
0x7a0e   : > { %v7277_v32 = vpop.f32.mrf.mxu1 }
0x7a0f   : > { %7708 = vtanh.f32 %v5980_v20  ;;  %v6347_v28 = vmul.f32 -1.442695, %v5980_v20 }
0x7a11   : > { %7710 = vpow2.f32 %v6347_v28 }
0x7a1c   : > { %v7709_v21 = vpop.eup %7708 }
0x7a1d   : > { %5990 = vrot.lane.b32.xlu0 %v7709_v21, %s7797_s28 }
0x7a1e   : > { %v7711_v53 = vpop.eup %7710 }
0x7a1f   : > { %v5984_v1 = vadd.f32 1.0, %v7711_v53 }
0x7a21   : > { %7712 = vrcp.f32 %v5984_v1 }
0x7a2e   : > { %v7713_v3 = vpop.eup %7712 }
0x7a2f   : > { %v5987_v42 = vmul.f32 %v7713_v3, %v5896_v38 }
0x7a8f   : > { %v5991_v36 = vpop.permute.xlu0 %5990 }
0x7a90   : > { %v5993_v31 = vmul.f32 %v7713_v3, %v5991_v36 }
0x7a92   : > { %5995 = vrot.lane.b32.xlu1 %v5993_v31, %s7797_s28 }
0x7b04   : > { %v5996_v56 = vpop.permute.xlu1 %5995 }
0x7b05   : > { %v5998_v27 = vadd.f32 %v5996_v56, %v5987_v42 }
0x7b07   : > { %7714 = vtanh.f32 %v5998_v27 }
0x7b14   : > { %v7715_v60 = vpop.eup %7714 }
0x7b15   : > { %6001 = vrot.lane.b32.xlu0 %v7715_v60, %s7797_s28  ;;  %s323_s28 = sand.u32 1, %s7785_s10  }
0x7b16   : > { %s6116_s17 = scalar_lea.sflag [#allocation5], %s323_s28 }
0x7b87   : > { %v6002_v26 = vpop.permute.xlu0 %6001 }
0x7b88   : > { %v6004_v62 = vmul.f32 %v7713_v3, %v6002_v26 }
0x7b8a   : > { %v6005_v63 = vadd.f32 %v6004_v62, %v5903_v18 }
0x7b8c   : > { %v6006_v4 = vmul.f32 0.0625, %v6005_v63 }
0x7b8e   : > { %6019 = vrot.lane.b32.xlu1 %v6006_v4, %s7798_s29  ;;  %s6192_s29 = sshll.u32 %s323_s28, 3 }
0x7b8f   : > { %s325_s25 = scalar_lea.vmem [#allocation4], %s6192_s29 }
0x7b90   : > { %s6129_s26 = sshll.u32 %s325_s25, 4  ;;  %s6130_s26 = int_to_ptr.vmem [resolvable:$true] %s6129_s26 }
0x7b91   : > { %s7733_s21 = scalar_lea.vmem %s6130_s26, 128  ;;  %p7740_p0 = scmp.lt.s32.totalorder %s6130_s26, %s7738_s23 }
0x7b92   : > { %p7734_p11 = scmp.ne.s32.totalorder %s6130_s26, %s7733_s21  ;;  %p7741_p1 = scmp.lt.s32.totalorder %s7739_s13, %s7733_s21 }
0x7b94   : > { %p7735_p12 = pnand %p7734_p11, %p7888_p5  ;;  %p7742_p2 = por %p7741_p1, %p7740_p0 }
0x7b96   : > { %p7736_p13 = pneg %p7735_p12 }
0x7b98   : > { %p7743_p3 = pnand %p7742_p2, %p7736_p13 }
0x7c00   : > { %v6020_v7 = vpop.permute.xlu1 %6019 }
0x7c01   : > { %7287 = vmatmul.mubr.msk.f32.vlgmr.msra.gmra.mxu0 %vm571_vm2, %v6020_v7 }
0x7cc1   : > { %v6089_v9 = vpop.f32.mrf.mxu0 }
0x7cc2   : > { %v6090_v2 = vadd.f32 %v6348_v11, %v6089_v9 }
0x7cc3   : > { %v7288_v10 = vpop.f32.mrf.mxu0 }
0x7cc4   : > { %v6098_v46 = vsel %vm6095_vm3, %v6090_v2, 0.0 }
0x7cc5   : > { %v6099_v30 = vsel %vm571_vm2, %v6098_v46, 0.0 }
0x7cc6   : > { %v6100_v22 = vrot.slane %v6099_v30, 4 }
0x7cc8   : > { %v6101_v35 = vadd.f32 %v6100_v22, %v6099_v30 }
0x7cca   : > { %v6102_v52 = vrot.slane %v6101_v35, 2 }
0x7ccc   : > { %v6103_v48 = vadd.f32 %v6102_v52, %v6101_v35 }
0x7cce   : > { %v6104_v34 = vrot.slane %v6103_v48, 1 }
0x7cd0   : > { %v6105_v25 = vadd.f32 %v6104_v34, %v6103_v48 }
0x7cd2   : > { %v6106_v59 = vmul.f32 0.5, %v6105_v25 }
0x7cd4   : > { %v6107_v6 = vmul.f32 %v6106_v59, %v6106_v59 }
0x7cd6   : > { %v6108_v61 = vsel %vm571_vm2, %v6107_v6, 0.0 }
0x7cd7   : > { %6109 = vadd.xlane.f32.xlu0 %v6108_v61 }
0x7d60   : > { %v6110_v12 = vpop.xlane.xlu0 %6109 }
0x7d61   : > { %v6111_v13 = vmax.f32 %v6110_v12, 1e-24 }
0x7d63   : > { %7716 = vrsqrt.f32 %v6111_v13 }
0x7d70   : > { %v7717_v43 = vpop.eup %7716 }
0x7d71   : > { %v6113_v29 = vmul.f32 %v7717_v43, %v6106_v59 }
0x7d73   : > { %6114 = vst.msk [vmem:[%s325_s25] sm:$0xff] %vm571_vm2, %v6113_v29 }
0x7d74   : > { %7746 = shalt.err (!%p7743_p3)
}
0x7d75   : > { %s7747_s29 = scalar_lea.hbm %s6127_s16, 128  ;;  %s7751_s25 = scalar_lea.hbm %s9086_s9, 256 }
0x7d76   : > { %p7748_p4 = scmp.ne.s32.totalorder %s6127_s16, %s7747_s29  ;;  %p7752_p9 = scmp.lt.s32.totalorder %s6127_s16, %s9086_s9 }
0x7d77   : > { %p7753_p10 = scmp.lt.s32.totalorder %s7751_s25, %s7747_s29 }
0x7d78   : > { %p7749_p7 = pnand %p7748_p4, %p7888_p5 }
0x7d79   : > { %p7754_p11 = por %p7753_p10, %p7752_p9 }
0x7d7a   : > { %p7750_p8 = pneg %p7749_p7 }
0x7d7c   : > { %p7755_p12 = pnand %p7754_p11, %p7750_p8 }
0x7d7e   : > { %7758 = shalt.err (!%p7755_p12)
}
0x7d7f   : > { %7289 = dma.vmem_to_hbm [thread:$0]  (%p7888_p5), %s6130_s26, 128, %s6127_s16, %s6116_s17  }
0x7d80 PF: > { %p7295_p13 = scmp.ge.s32.totalorder %s7793_s12, 2  ;;  %s6141_s21 = sand.u32 1, %s7781_s30  }
0x7d81   : > { %s6142_s22 = scalar_lea.sflag [#allocation5], %s6141_s21 }
0x7d82   : > { %p7292_p0 = pnand %p7295_p13, %p7892_p6 }
0x7d84   : > { %p7293_p1 = pneg %p7292_p0 }
0x7d86   : > { %7776 = dma.done.wait (%p7293_p1), %s6142_s22, 128  }
0x7d87   : > { %7778 = vsyncadd (%p7293_p1), %s6142_s22, 4294967168  ;;  %p19_p2 = scmp.ge.s32.totalorder %s7875_s15, 4   ;;  %s9089_s30 = smov %s7785_s10 }
0x7d88   : > { %s9090_s10 = smov %s7789_s11  ;;  %s9091_s11 = smov %s7886_s18 }
0x7d89   : > { %s9092_s12 = smov %s7875_s15  ;;  %21 = sbr.rel (!%p19_p2) target bundleno = 3 (0x3), region = 124 }
0x7d8e   :  { %6147 = vsyncpa [#allocation5], 1 }
0x7d8f   :  { %6149 = vsyncpa [#allocation5 + $0x1], 1 }

</bundles_post_ra>
